<compile_context>
chip_gen: v7x
topology: tpu7x:2x2x1
jax: 0.10.0
libtpu: 0.0.40
codegen_flags: <defaults>
</compile_context>

<pallas_src>
import jax
import jax.numpy as jnp
from jax.experimental import pallas as pl
from jax.experimental.pallas import tpu as pltpu

EPS = 1e-5  # torch GroupNorm default


def _round_up(x, m):
    return ((x + m - 1) // m) * m


# ---------------------------------------------------------------------------
# in-kernel helpers
# ---------------------------------------------------------------------------
def _gn1(y, gamma, beta):
    """GroupNorm(num_groups=1) on a (rows, C) tile: per-row norm over channels."""
    mu = jnp.mean(y, axis=-1, keepdims=True)
    var = jnp.mean(jnp.square(y - mu), axis=-1, keepdims=True)
    return (y - mu) * jax.lax.rsqrt(var + EPS) * gamma + beta


# ---------------------------------------------------------------------------
# fused kernel (closure over the number of weight refs)
# ---------------------------------------------------------------------------
def _make_fused_kernel(n_weight_refs):
    def kernel(*refs):
        x_ref = refs[0]
        w = refs[1 : 1 + n_weight_refs]
        out_refs = refs[1 + n_weight_refs :]

        it = iter(w)
        enc = [tuple(next(it) for _ in range(3)) for _ in range(3)]    # w, g, b
        head = [tuple(next(it) for _ in range(8)) for _ in range(3)]   # w1,g1,b1,w2,g2,b2,wo,bo
        feat = {i: tuple(next(it) for _ in range(3)) for i in (1, 2)}  # w, g, b
        sel = {i: (next(it), next(it)) for i in (2, 1)}                # Ea, Eb

        # ---- encoder chain: pd_in[i] = relu(gn1(res @ W)) ----
        res = x_ref[...]
        pd_in = []
        for i in range(3):
            w_, g_, b_ = enc[i]
            y = jnp.dot(res, w_[...], preferred_element_type=jnp.float32)
            res = jnp.maximum(_gn1(y, g_[...], b_[...]), 0.0)
            pd_in.append(res)

        # ---- pyramid heads, coarse -> fine (i = 2, 1, 0); all in VMEM ----
        for slot, i in enumerate((2, 1, 0)):
            w1, g1, b1, w2, g2, b2, wo, bo = head[i]
            xin = pd_in[i]
            # LinearRes with identity shortcut
            h = jnp.dot(xin, w1[...], preferred_element_type=jnp.float32)
            h = jnp.maximum(_gn1(h, g1[...], b1[...]), 0.0)
            h = jnp.dot(h, w2[...], preferred_element_type=jnp.float32)
            h = _gn1(h, g2[...], b2[...])
            h = jnp.maximum(h + xin, 0.0)
            # nn.Linear head (with bias) — only these leave the kernel
            kp = jnp.dot(h, wo[...], preferred_element_type=jnp.float32) + bo[...]
            out_refs[slot][...] = kp

            if i != 0:
                fw, fg, fb = feat[i]
                y = jnp.dot(kp, fw[...], preferred_element_type=jnp.float32)
                kpf = jnp.maximum(_gn1(y, fg[...], fb[...]), 0.0)
                # torch.cat((pd_in[i-1], kpf), -1) as exact selector matmuls
                ea, eb = sel[i]
                pd_in[i - 1] = (
                    jnp.dot(pd_in[i - 1], ea[...], preferred_element_type=jnp.float32)
                    + jnp.dot(kpf, eb[...], preferred_element_type=jnp.float32)
                )

    return kernel


# ---------------------------------------------------------------------------
# wrapper: single pallas_call, grid over agent tiles, weights resident in VMEM
# ---------------------------------------------------------------------------
def trajectory_decoder(agents, params, in_dims, out_dims, *, blk_n=None):
    n, c0 = agents.shape
    assert c0 == in_dims[0]
    if blk_n is None:
        blk_n = min(_round_up(n, 8), 256)  # big row tiles; grid=(1,) for small N

    flat_inputs = [agents]
    in_specs = [pl.BlockSpec((blk_n, c0), lambda g: (g, 0))]

    def add_resident(arr):
        arr = jnp.asarray(arr, jnp.float32)
        if arr.ndim == 1:
            arr = arr.reshape(1, -1)
        r, c = arr.shape
        flat_inputs.append(arr)
        # full-array block with constant index map -> stays resident in VMEM
        in_specs.append(pl.BlockSpec((r, c), lambda g: (0, 0)))

    for i in range(3):
        p = params[f"enc{i}"]
        add_resident(p["w"]); add_resident(p["g"]); add_resident(p["b"])
    for i in range(3):
        p = params[f"head{i}"]
        for k in ("w1", "g1", "b1", "w2", "g2", "b2", "wo", "bo"):
            add_resident(p[k])
    for i in (1, 2):
        p = params[f"feat{i}"]
        add_resident(p["w"]); add_resident(p["g"]); add_resident(p["b"])
    # 0/1 selector matrices implementing cat((pd_in[i-1], kpf), -1) exactly
    for i in (2, 1):
        d1, d2 = in_dims[i], in_dims[i + 1]
        ea = jnp.concatenate(
            [jnp.eye(d1, dtype=jnp.float32), jnp.zeros((d1, d2), jnp.float32)], axis=1)
        eb = jnp.concatenate(
            [jnp.zeros((d2, d1), jnp.float32), jnp.eye(d2, dtype=jnp.float32)], axis=1)
        add_resident(ea); add_resident(eb)

    n_weight_refs = len(flat_inputs) - 1

    out_shapes = tuple(
        jax.ShapeDtypeStruct((n, 2 * out_dims[i]), jnp.float32) for i in (2, 1, 0))
    out_specs = tuple(
        pl.BlockSpec((blk_n, 2 * out_dims[i]), lambda g: (g, 0)) for i in (2, 1, 0))

    kps = pl.pallas_call(
        _make_fused_kernel(n_weight_refs),
        out_shape=out_shapes,
        grid=(pl.cdiv(n, blk_n),),
        in_specs=in_specs,
        out_specs=out_specs,
        compiler_params=pltpu.CompilerParams(
            dimension_semantics=("parallel",),  # split agent tiles across TCs (v7x)
        ),
    )(*flat_inputs)

    # metadata-only rearrange 'n (m1 m2 c) -> n m1 m2 c' with m1=1, c=2
    return [kp.reshape(n, 1, out_dims[i], 2) for kp, i in zip(kps, (2, 1, 0))]


# ---------------------------------------------------------------------------
# parameter construction (deterministic, synthetic)
# ---------------------------------------------------------------------------
def init_params(key, in_dims, out_dims):
    params = {}

    def w_init(k, cin, cout):
        return jax.random.normal(k, (cin, cout), jnp.float32) * (1.0 / jnp.sqrt(cin))

    for i in range(3):
        key, k0, k1, k2, k3, k4 = jax.random.split(key, 6)
        # layers[3i]: Linear(in_dims[i] -> in_dims[i+1]), GN(1), ReLU
        params[f"enc{i}"] = dict(
            w=w_init(k0, in_dims[i], in_dims[i + 1]),
            g=jnp.ones((in_dims[i + 1],), jnp.float32),
            b=jnp.zeros((in_dims[i + 1],), jnp.float32),
        )
        # layers[3i+1]: Sequential(LinearRes(d, d), nn.Linear(d, 2*out_dims[i]))
        d = in_dims[i + 1] if i == 2 else in_dims[i + 1] + in_dims[i + 2]
        params[f"head{i}"] = dict(
            w1=w_init(k1, d, d),
            g1=jnp.ones((d,), jnp.float32),
            b1=jnp.zeros((d,), jnp.float32),
            w2=w_init(k2, d, d),
            g2=jnp.ones((d,), jnp.float32),
            b2=jnp.zeros((d,), jnp.float32),
            wo=w_init(k3, d, 2 * out_dims[i]),
            bo=jax.random.normal(k4, (2 * out_dims[i],), jnp.float32) * 0.01,
        )
        # layers[3i+2]: Linear(2*out_dims[i] -> in_dims[i+1]), GN(1), ReLU
        key, k5 = jax.random.split(key)
        params[f"feat{i}"] = dict(
            w=w_init(k5, 2 * out_dims[i], in_dims[i + 1]),
            g=jnp.ones((in_dims[i + 1],), jnp.float32),
            b=jnp.zeros((in_dims[i + 1],), jnp.float32),
        )
    return params


# ---------------------------------------------------------------------------
# pure-JAX reference (spec-faithful: uses an explicit concat)
# ---------------------------------------------------------------------------
def _ref_gn(y, g, b):
    mu = y.mean(-1, keepdims=True)
    var = ((y - mu) ** 2).mean(-1, keepdims=True)
    return (y - mu) / jnp.sqrt(var + EPS) * g + b


def _ref_lin_gn_relu(x, p):
    return jnp.maximum(_ref_gn(x @ p["w"], p["g"], p["b"]), 0.0)


def _ref_forward(agents, params, out_dims):
    pd_in, res = [], agents
    for i in range(3):
        res = _ref_lin_gn_relu(res, params[f"enc{i}"])
        pd_in.append(res)
    pd_out = []
    for i in (2, 1, 0):
        p = params[f"head{i}"]
        h = jnp.maximum(_ref_gn(pd_in[i] @ p["w1"], p["g1"], p["b1"]), 0.0)
        h = _ref_gn(h @ p["w2"], p["g2"], p["b2"])
        h = jnp.maximum(h + pd_in[i], 0.0)
        kp = h @ p["wo"] + p["bo"]
        if i != 0:
            kpf = _ref_lin_gn_relu(kp, params[f"feat{i}"])
            pd_in[i - 1] = jnp.concatenate([pd_in[i - 1], kpf], axis=-1)
        pd_out.append(kp.reshape(kp.shape[0], 1, out_dims[i], 2))
    return pd_out


# ---------------------------------------------------------------------------
if __name__ == "__main__":
    in_dims = [16, 32, 32, 32]
    out_dims = [8, 4, 2]
    N = 16  # number of agents

    key = jax.random.PRNGKey(0)
    key, kx = jax.random.split(key)
    agents = jax.random.normal(kx, (N, in_dims[0]), jnp.float32)
    params = init_params(key, in_dims, out_dims)

    outs = trajectory_decoder(agents, params, in_dims, out_dims)
    outs = jax.block_until_ready(outs)

    refs = _ref_forward(agents, params, out_dims)
    for o, r in zip(outs, refs):
        assert o.shape == r.shape, (o.shape, r.shape)
        # Selector matmuls are exact under f32 MXU passes; tolerance kept
        # slightly loose to cover reduced-precision matmul configurations.
        assert jnp.allclose(o, r, atol=2e-3, rtol=2e-3), "mismatch vs reference"

    print("KERNEL_OK")
</pallas_src>

<mosaic_0001>
module attributes {stable_mosaic.version = 11 : i64} {
  func.func @kernel(%arg0: i32, %arg1: memref<16x16xf32, #tpu.memory_space<vmem>>, %arg2: memref<16x32xf32, #tpu.memory_space<vmem>>, %arg3: memref<1x32xf32, #tpu.memory_space<vmem>>, %arg4: memref<1x32xf32, #tpu.memory_space<vmem>>, %arg5: memref<32x32xf32, #tpu.memory_space<vmem>>, %arg6: memref<1x32xf32, #tpu.memory_space<vmem>>, %arg7: memref<1x32xf32, #tpu.memory_space<vmem>>, %arg8: memref<32x32xf32, #tpu.memory_space<vmem>>, %arg9: memref<1x32xf32, #tpu.memory_space<vmem>>, %arg10: memref<1x32xf32, #tpu.memory_space<vmem>>, %arg11: memref<64x64xf32, #tpu.memory_space<vmem>>, %arg12: memref<1x64xf32, #tpu.memory_space<vmem>>, %arg13: memref<1x64xf32, #tpu.memory_space<vmem>>, %arg14: memref<64x64xf32, #tpu.memory_space<vmem>>, %arg15: memref<1x64xf32, #tpu.memory_space<vmem>>, %arg16: memref<1x64xf32, #tpu.memory_space<vmem>>, %arg17: memref<64x16xf32, #tpu.memory_space<vmem>>, %arg18: memref<1x16xf32, #tpu.memory_space<vmem>>, %arg19: memref<64x64xf32, #tpu.memory_space<vmem>>, %arg20: memref<1x64xf32, #tpu.memory_space<vmem>>, %arg21: memref<1x64xf32, #tpu.memory_space<vmem>>, %arg22: memref<64x64xf32, #tpu.memory_space<vmem>>, %arg23: memref<1x64xf32, #tpu.memory_space<vmem>>, %arg24: memref<1x64xf32, #tpu.memory_space<vmem>>, %arg25: memref<64x8xf32, #tpu.memory_space<vmem>>, %arg26: memref<1x8xf32, #tpu.memory_space<vmem>>, %arg27: memref<32x32xf32, #tpu.memory_space<vmem>>, %arg28: memref<1x32xf32, #tpu.memory_space<vmem>>, %arg29: memref<1x32xf32, #tpu.memory_space<vmem>>, %arg30: memref<32x32xf32, #tpu.memory_space<vmem>>, %arg31: memref<1x32xf32, #tpu.memory_space<vmem>>, %arg32: memref<1x32xf32, #tpu.memory_space<vmem>>, %arg33: memref<32x4xf32, #tpu.memory_space<vmem>>, %arg34: memref<1x4xf32, #tpu.memory_space<vmem>>, %arg35: memref<8x32xf32, #tpu.memory_space<vmem>>, %arg36: memref<1x32xf32, #tpu.memory_space<vmem>>, %arg37: memref<1x32xf32, #tpu.memory_space<vmem>>, %arg38: memref<4x32xf32, #tpu.memory_space<vmem>>, %arg39: memref<1x32xf32, #tpu.memory_space<vmem>>, %arg40: memref<1x32xf32, #tpu.memory_space<vmem>>, %arg41: memref<32x64xf32, #tpu.memory_space<vmem>>, %arg42: memref<32x64xf32, #tpu.memory_space<vmem>>, %arg43: memref<32x64xf32, #tpu.memory_space<vmem>>, %arg44: memref<32x64xf32, #tpu.memory_space<vmem>>, %arg45: memref<16x4xf32, #tpu.memory_space<vmem>>, %arg46: memref<16x8xf32, #tpu.memory_space<vmem>>, %arg47: memref<16x16xf32, #tpu.memory_space<vmem>>) attributes {dimension_semantics = [#tpu.dimension_semantics<parallel>], iteration_bounds = array<i64: 1>, scalar_prefetch = 0 : i64, scratch_operands = 0 : i64, tpu.core_type = #tpu.core_type<tc>, window_params = [{transform_indices = @transform_0, window_bounds = array<i64: 16, 16>}, {pipeline_mode = #tpu.pipeline_mode<synchronous>, transform_indices = @transform_1, window_bounds = array<i64: 16, 32>}, {pipeline_mode = #tpu.pipeline_mode<synchronous>, transform_indices = @transform_2, window_bounds = array<i64: 1, 32>}, {pipeline_mode = #tpu.pipeline_mode<synchronous>, transform_indices = @transform_3, window_bounds = array<i64: 1, 32>}, {pipeline_mode = #tpu.pipeline_mode<synchronous>, transform_indices = @transform_4, window_bounds = array<i64: 32, 32>}, {pipeline_mode = #tpu.pipeline_mode<synchronous>, transform_indices = @transform_5, window_bounds = array<i64: 1, 32>}, {pipeline_mode = #tpu.pipeline_mode<synchronous>, transform_indices = @transform_6, window_bounds = array<i64: 1, 32>}, {pipeline_mode = #tpu.pipeline_mode<synchronous>, transform_indices = @transform_7, window_bounds = array<i64: 32, 32>}, {pipeline_mode = #tpu.pipeline_mode<synchronous>, transform_indices = @transform_8, window_bounds = array<i64: 1, 32>}, {pipeline_mode = #tpu.pipeline_mode<synchronous>, transform_indices = @transform_9, window_bounds = array<i64: 1, 32>}, {pipeline_mode = #tpu.pipeline_mode<synchronous>, transform_indices = @transform_10, window_bounds = array<i64: 64, 64>}, {pipeline_mode = #tpu.pipeline_mode<synchronous>, transform_indices = @transform_11, window_bounds = array<i64: 1, 64>}, {pipeline_mode = #tpu.pipeline_mode<synchronous>, transform_indices = @transform_12, window_bounds = array<i64: 1, 64>}, {pipeline_mode = #tpu.pipeline_mode<synchronous>, transform_indices = @transform_13, window_bounds = array<i64: 64, 64>}, {pipeline_mode = #tpu.pipeline_mode<synchronous>, transform_indices = @transform_14, window_bounds = array<i64: 1, 64>}, {pipeline_mode = #tpu.pipeline_mode<synchronous>, transform_indices = @transform_15, window_bounds = array<i64: 1, 64>}, {pipeline_mode = #tpu.pipeline_mode<synchronous>, transform_indices = @transform_16, window_bounds = array<i64: 64, 16>}, {pipeline_mode = #tpu.pipeline_mode<synchronous>, transform_indices = @transform_17, window_bounds = array<i64: 1, 16>}, {pipeline_mode = #tpu.pipeline_mode<synchronous>, transform_indices = @transform_18, window_bounds = array<i64: 64, 64>}, {pipeline_mode = #tpu.pipeline_mode<synchronous>, transform_indices = @transform_19, window_bounds = array<i64: 1, 64>}, {pipeline_mode = #tpu.pipeline_mode<synchronous>, transform_indices = @transform_20, window_bounds = array<i64: 1, 64>}, {pipeline_mode = #tpu.pipeline_mode<synchronous>, transform_indices = @transform_21, window_bounds = array<i64: 64, 64>}, {pipeline_mode = #tpu.pipeline_mode<synchronous>, transform_indices = @transform_22, window_bounds = array<i64: 1, 64>}, {pipeline_mode = #tpu.pipeline_mode<synchronous>, transform_indices = @transform_23, window_bounds = array<i64: 1, 64>}, {pipeline_mode = #tpu.pipeline_mode<synchronous>, transform_indices = @transform_24, window_bounds = array<i64: 64, 8>}, {pipeline_mode = #tpu.pipeline_mode<synchronous>, transform_indices = @transform_25, window_bounds = array<i64: 1, 8>}, {pipeline_mode = #tpu.pipeline_mode<synchronous>, transform_indices = @transform_26, window_bounds = array<i64: 32, 32>}, {pipeline_mode = #tpu.pipeline_mode<synchronous>, transform_indices = @transform_27, window_bounds = array<i64: 1, 32>}, {pipeline_mode = #tpu.pipeline_mode<synchronous>, transform_indices = @transform_28, window_bounds = array<i64: 1, 32>}, {pipeline_mode = #tpu.pipeline_mode<synchronous>, transform_indices = @transform_29, window_bounds = array<i64: 32, 32>}, {pipeline_mode = #tpu.pipeline_mode<synchronous>, transform_indices = @transform_30, window_bounds = array<i64: 1, 32>}, {pipeline_mode = #tpu.pipeline_mode<synchronous>, transform_indices = @transform_31, window_bounds = array<i64: 1, 32>}, {pipeline_mode = #tpu.pipeline_mode<synchronous>, transform_indices = @transform_32, window_bounds = array<i64: 32, 4>}, {pipeline_mode = #tpu.pipeline_mode<synchronous>, transform_indices = @transform_33, window_bounds = array<i64: 1, 4>}, {pipeline_mode = #tpu.pipeline_mode<synchronous>, transform_indices = @transform_34, window_bounds = array<i64: 8, 32>}, {pipeline_mode = #tpu.pipeline_mode<synchronous>, transform_indices = @transform_35, window_bounds = array<i64: 1, 32>}, {pipeline_mode = #tpu.pipeline_mode<synchronous>, transform_indices = @transform_36, window_bounds = array<i64: 1, 32>}, {pipeline_mode = #tpu.pipeline_mode<synchronous>, transform_indices = @transform_37, window_bounds = array<i64: 4, 32>}, {pipeline_mode = #tpu.pipeline_mode<synchronous>, transform_indices = @transform_38, window_bounds = array<i64: 1, 32>}, {pipeline_mode = #tpu.pipeline_mode<synchronous>, transform_indices = @transform_39, window_bounds = array<i64: 1, 32>}, {pipeline_mode = #tpu.pipeline_mode<synchronous>, transform_indices = @transform_40, window_bounds = array<i64: 32, 64>}, {pipeline_mode = #tpu.pipeline_mode<synchronous>, transform_indices = @transform_41, window_bounds = array<i64: 32, 64>}, {pipeline_mode = #tpu.pipeline_mode<synchronous>, transform_indices = @transform_42, window_bounds = array<i64: 32, 64>}, {pipeline_mode = #tpu.pipeline_mode<synchronous>, transform_indices = @transform_43, window_bounds = array<i64: 32, 64>}, {transform_indices = @transform_44, window_bounds = array<i64: 16, 4>}, {transform_indices = @transform_45, window_bounds = array<i64: 16, 8>}, {transform_indices = @transform_46, window_bounds = array<i64: 16, 16>}]} {
    %c0 = arith.constant 0 : index
    %c0_0 = arith.constant 0 : index
    %0 = vector.load %arg1[%c0, %c0_0] : memref<16x16xf32, #tpu.memory_space<vmem>>, vector<16x16xf32>
    %c0_1 = arith.constant 0 : index
    %c0_2 = arith.constant 0 : index
    %1 = vector.load %arg2[%c0_1, %c0_2] : memref<16x32xf32, #tpu.memory_space<vmem>>, vector<16x32xf32>
    %cst = arith.constant dense<0.000000e+00> : vector<16x32xf32>
    %2 = tpu.matmul %0, %1, %cst {dimension_numbers = #tpu.dot_dimension_numbers<[1], [0], [0], [1], [0, 0, 1, 1], [], []>} : vector<16x16xf32>, vector<16x32xf32>, vector<16x32xf32> -> vector<16x32xf32>
    %c0_3 = arith.constant 0 : index
    %c0_4 = arith.constant 0 : index
    %3 = vector.load %arg3[%c0_3, %c0_4] : memref<1x32xf32, #tpu.memory_space<vmem>>, vector<1x32xf32>
    %c0_5 = arith.constant 0 : index
    %c0_6 = arith.constant 0 : index
    %4 = vector.load %arg4[%c0_5, %c0_6] : memref<1x32xf32, #tpu.memory_space<vmem>>, vector<1x32xf32>
    %cst_7 = arith.constant dense<0.000000e+00> : vector<16xf32>
    %5 = vector.multi_reduction <add>, %2, %cst_7 [1] : vector<16x32xf32> to vector<16xf32>
    %6 = vector.shape_cast %5 : vector<16xf32> to vector<16x1xf32>
    %cst_8 = arith.constant 3.200000e+01 : f32
    %7 = vector.broadcast %cst_8 : f32 to vector<16x1xf32>
    %8 = arith.divf %6, %7 : vector<16x1xf32>
    %9 = vector.broadcast %8 : vector<16x1xf32> to vector<16x32xf32>
    %10 = arith.subf %2, %9 : vector<16x32xf32>
    %11 = arith.mulf %10, %10 : vector<16x32xf32>
    %cst_9 = arith.constant dense<0.000000e+00> : vector<16xf32>
    %12 = vector.multi_reduction <add>, %11, %cst_9 [1] : vector<16x32xf32> to vector<16xf32>
    %13 = vector.shape_cast %12 : vector<16xf32> to vector<16x1xf32>
    %cst_10 = arith.constant 3.200000e+01 : f32
    %14 = vector.broadcast %cst_10 : f32 to vector<16x1xf32>
    %15 = arith.divf %13, %14 : vector<16x1xf32>
    %16 = vector.broadcast %8 : vector<16x1xf32> to vector<16x32xf32>
    %17 = arith.subf %2, %16 : vector<16x32xf32>
    %cst_11 = arith.constant 9.99999974E-6 : f32
    %18 = vector.broadcast %cst_11 : f32 to vector<16x1xf32>
    %19 = arith.addf %15, %18 : vector<16x1xf32>
    %20 = math.rsqrt %19 : vector<16x1xf32>
    %21 = vector.broadcast %20 : vector<16x1xf32> to vector<16x32xf32>
    %22 = arith.mulf %17, %21 : vector<16x32xf32>
    %23 = vector.broadcast %3 : vector<1x32xf32> to vector<16x32xf32>
    %24 = arith.mulf %22, %23 : vector<16x32xf32>
    %25 = vector.broadcast %4 : vector<1x32xf32> to vector<16x32xf32>
    %26 = arith.addf %24, %25 : vector<16x32xf32>
    %cst_12 = arith.constant 0.000000e+00 : f32
    %27 = vector.broadcast %cst_12 : f32 to vector<16x32xf32>
    %28 = arith.maximumf %26, %27 : vector<16x32xf32>
    %c0_13 = arith.constant 0 : index
    %c0_14 = arith.constant 0 : index
    %29 = vector.load %arg5[%c0_13, %c0_14] : memref<32x32xf32, #tpu.memory_space<vmem>>, vector<32x32xf32>
    %cst_15 = arith.constant dense<0.000000e+00> : vector<16x32xf32>
    %30 = tpu.matmul %28, %29, %cst_15 {dimension_numbers = #tpu.dot_dimension_numbers<[1], [0], [0], [1], [0, 0, 1, 1], [], []>} : vector<16x32xf32>, vector<32x32xf32>, vector<16x32xf32> -> vector<16x32xf32>
    %c0_16 = arith.constant 0 : index
    %c0_17 = arith.constant 0 : index
    %31 = vector.load %arg6[%c0_16, %c0_17] : memref<1x32xf32, #tpu.memory_space<vmem>>, vector<1x32xf32>
    %c0_18 = arith.constant 0 : index
    %c0_19 = arith.constant 0 : index
    %32 = vector.load %arg7[%c0_18, %c0_19] : memref<1x32xf32, #tpu.memory_space<vmem>>, vector<1x32xf32>
    %cst_20 = arith.constant dense<0.000000e+00> : vector<16xf32>
    %33 = vector.multi_reduction <add>, %30, %cst_20 [1] : vector<16x32xf32> to vector<16xf32>
    %34 = vector.shape_cast %33 : vector<16xf32> to vector<16x1xf32>
    %cst_21 = arith.constant 3.200000e+01 : f32
    %35 = vector.broadcast %cst_21 : f32 to vector<16x1xf32>
    %36 = arith.divf %34, %35 : vector<16x1xf32>
    %37 = vector.broadcast %36 : vector<16x1xf32> to vector<16x32xf32>
    %38 = arith.subf %30, %37 : vector<16x32xf32>
    %39 = arith.mulf %38, %38 : vector<16x32xf32>
    %cst_22 = arith.constant dense<0.000000e+00> : vector<16xf32>
    %40 = vector.multi_reduction <add>, %39, %cst_22 [1] : vector<16x32xf32> to vector<16xf32>
    %41 = vector.shape_cast %40 : vector<16xf32> to vector<16x1xf32>
    %cst_23 = arith.constant 3.200000e+01 : f32
    %42 = vector.broadcast %cst_23 : f32 to vector<16x1xf32>
    %43 = arith.divf %41, %42 : vector<16x1xf32>
    %44 = vector.broadcast %36 : vector<16x1xf32> to vector<16x32xf32>
    %45 = arith.subf %30, %44 : vector<16x32xf32>
    %cst_24 = arith.constant 9.99999974E-6 : f32
    %46 = vector.broadcast %cst_24 : f32 to vector<16x1xf32>
    %47 = arith.addf %43, %46 : vector<16x1xf32>
    %48 = math.rsqrt %47 : vector<16x1xf32>
    %49 = vector.broadcast %48 : vector<16x1xf32> to vector<16x32xf32>
    %50 = arith.mulf %45, %49 : vector<16x32xf32>
    %51 = vector.broadcast %31 : vector<1x32xf32> to vector<16x32xf32>
    %52 = arith.mulf %50, %51 : vector<16x32xf32>
    %53 = vector.broadcast %32 : vector<1x32xf32> to vector<16x32xf32>
    %54 = arith.addf %52, %53 : vector<16x32xf32>
    %cst_25 = arith.constant 0.000000e+00 : f32
    %55 = vector.broadcast %cst_25 : f32 to vector<16x32xf32>
    %56 = arith.maximumf %54, %55 : vector<16x32xf32>
    %c0_26 = arith.constant 0 : index
    %c0_27 = arith.constant 0 : index
    %57 = vector.load %arg8[%c0_26, %c0_27] : memref<32x32xf32, #tpu.memory_space<vmem>>, vector<32x32xf32>
    %cst_28 = arith.constant dense<0.000000e+00> : vector<16x32xf32>
    %58 = tpu.matmul %56, %57, %cst_28 {dimension_numbers = #tpu.dot_dimension_numbers<[1], [0], [0], [1], [0, 0, 1, 1], [], []>} : vector<16x32xf32>, vector<32x32xf32>, vector<16x32xf32> -> vector<16x32xf32>
    %c0_29 = arith.constant 0 : index
    %c0_30 = arith.constant 0 : index
    %59 = vector.load %arg9[%c0_29, %c0_30] : memref<1x32xf32, #tpu.memory_space<vmem>>, vector<1x32xf32>
    %c0_31 = arith.constant 0 : index
    %c0_32 = arith.constant 0 : index
    %60 = vector.load %arg10[%c0_31, %c0_32] : memref<1x32xf32, #tpu.memory_space<vmem>>, vector<1x32xf32>
    %cst_33 = arith.constant dense<0.000000e+00> : vector<16xf32>
    %61 = vector.multi_reduction <add>, %58, %cst_33 [1] : vector<16x32xf32> to vector<16xf32>
    %62 = vector.shape_cast %61 : vector<16xf32> to vector<16x1xf32>
    %cst_34 = arith.constant 3.200000e+01 : f32
    %63 = vector.broadcast %cst_34 : f32 to vector<16x1xf32>
    %64 = arith.divf %62, %63 : vector<16x1xf32>
    %65 = vector.broadcast %64 : vector<16x1xf32> to vector<16x32xf32>
    %66 = arith.subf %58, %65 : vector<16x32xf32>
    %67 = arith.mulf %66, %66 : vector<16x32xf32>
    %cst_35 = arith.constant dense<0.000000e+00> : vector<16xf32>
    %68 = vector.multi_reduction <add>, %67, %cst_35 [1] : vector<16x32xf32> to vector<16xf32>
    %69 = vector.shape_cast %68 : vector<16xf32> to vector<16x1xf32>
    %cst_36 = arith.constant 3.200000e+01 : f32
    %70 = vector.broadcast %cst_36 : f32 to vector<16x1xf32>
    %71 = arith.divf %69, %70 : vector<16x1xf32>
    %72 = vector.broadcast %64 : vector<16x1xf32> to vector<16x32xf32>
    %73 = arith.subf %58, %72 : vector<16x32xf32>
    %cst_37 = arith.constant 9.99999974E-6 : f32
    %74 = vector.broadcast %cst_37 : f32 to vector<16x1xf32>
    %75 = arith.addf %71, %74 : vector<16x1xf32>
    %76 = math.rsqrt %75 : vector<16x1xf32>
    %77 = vector.broadcast %76 : vector<16x1xf32> to vector<16x32xf32>
    %78 = arith.mulf %73, %77 : vector<16x32xf32>
    %79 = vector.broadcast %59 : vector<1x32xf32> to vector<16x32xf32>
    %80 = arith.mulf %78, %79 : vector<16x32xf32>
    %81 = vector.broadcast %60 : vector<1x32xf32> to vector<16x32xf32>
    %82 = arith.addf %80, %81 : vector<16x32xf32>
    %cst_38 = arith.constant 0.000000e+00 : f32
    %83 = vector.broadcast %cst_38 : f32 to vector<16x32xf32>
    %84 = arith.maximumf %82, %83 : vector<16x32xf32>
    %c0_39 = arith.constant 0 : index
    %c0_40 = arith.constant 0 : index
    %85 = vector.load %arg27[%c0_39, %c0_40] : memref<32x32xf32, #tpu.memory_space<vmem>>, vector<32x32xf32>
    %cst_41 = arith.constant dense<0.000000e+00> : vector<16x32xf32>
    %86 = tpu.matmul %84, %85, %cst_41 {dimension_numbers = #tpu.dot_dimension_numbers<[1], [0], [0], [1], [0, 0, 1, 1], [], []>} : vector<16x32xf32>, vector<32x32xf32>, vector<16x32xf32> -> vector<16x32xf32>
    %c0_42 = arith.constant 0 : index
    %c0_43 = arith.constant 0 : index
    %87 = vector.load %arg28[%c0_42, %c0_43] : memref<1x32xf32, #tpu.memory_space<vmem>>, vector<1x32xf32>
    %c0_44 = arith.constant 0 : index
    %c0_45 = arith.constant 0 : index
    %88 = vector.load %arg29[%c0_44, %c0_45] : memref<1x32xf32, #tpu.memory_space<vmem>>, vector<1x32xf32>
    %cst_46 = arith.constant dense<0.000000e+00> : vector<16xf32>
    %89 = vector.multi_reduction <add>, %86, %cst_46 [1] : vector<16x32xf32> to vector<16xf32>
    %90 = vector.shape_cast %89 : vector<16xf32> to vector<16x1xf32>
    %cst_47 = arith.constant 3.200000e+01 : f32
    %91 = vector.broadcast %cst_47 : f32 to vector<16x1xf32>
    %92 = arith.divf %90, %91 : vector<16x1xf32>
    %93 = vector.broadcast %92 : vector<16x1xf32> to vector<16x32xf32>
    %94 = arith.subf %86, %93 : vector<16x32xf32>
    %95 = arith.mulf %94, %94 : vector<16x32xf32>
    %cst_48 = arith.constant dense<0.000000e+00> : vector<16xf32>
    %96 = vector.multi_reduction <add>, %95, %cst_48 [1] : vector<16x32xf32> to vector<16xf32>
    %97 = vector.shape_cast %96 : vector<16xf32> to vector<16x1xf32>
    %cst_49 = arith.constant 3.200000e+01 : f32
    %98 = vector.broadcast %cst_49 : f32 to vector<16x1xf32>
    %99 = arith.divf %97, %98 : vector<16x1xf32>
    %100 = vector.broadcast %92 : vector<16x1xf32> to vector<16x32xf32>
    %101 = arith.subf %86, %100 : vector<16x32xf32>
    %cst_50 = arith.constant 9.99999974E-6 : f32
    %102 = vector.broadcast %cst_50 : f32 to vector<16x1xf32>
    %103 = arith.addf %99, %102 : vector<16x1xf32>
    %104 = math.rsqrt %103 : vector<16x1xf32>
    %105 = vector.broadcast %104 : vector<16x1xf32> to vector<16x32xf32>
    %106 = arith.mulf %101, %105 : vector<16x32xf32>
    %107 = vector.broadcast %87 : vector<1x32xf32> to vector<16x32xf32>
    %108 = arith.mulf %106, %107 : vector<16x32xf32>
    %109 = vector.broadcast %88 : vector<1x32xf32> to vector<16x32xf32>
    %110 = arith.addf %108, %109 : vector<16x32xf32>
    %cst_51 = arith.constant 0.000000e+00 : f32
    %111 = vector.broadcast %cst_51 : f32 to vector<16x32xf32>
    %112 = arith.maximumf %110, %111 : vector<16x32xf32>
    %c0_52 = arith.constant 0 : index
    %c0_53 = arith.constant 0 : index
    %113 = vector.load %arg30[%c0_52, %c0_53] : memref<32x32xf32, #tpu.memory_space<vmem>>, vector<32x32xf32>
    %cst_54 = arith.constant dense<0.000000e+00> : vector<16x32xf32>
    %114 = tpu.matmul %112, %113, %cst_54 {dimension_numbers = #tpu.dot_dimension_numbers<[1], [0], [0], [1], [0, 0, 1, 1], [], []>} : vector<16x32xf32>, vector<32x32xf32>, vector<16x32xf32> -> vector<16x32xf32>
    %c0_55 = arith.constant 0 : index
    %c0_56 = arith.constant 0 : index
    %115 = vector.load %arg31[%c0_55, %c0_56] : memref<1x32xf32, #tpu.memory_space<vmem>>, vector<1x32xf32>
    %c0_57 = arith.constant 0 : index
    %c0_58 = arith.constant 0 : index
    %116 = vector.load %arg32[%c0_57, %c0_58] : memref<1x32xf32, #tpu.memory_space<vmem>>, vector<1x32xf32>
    %cst_59 = arith.constant dense<0.000000e+00> : vector<16xf32>
    %117 = vector.multi_reduction <add>, %114, %cst_59 [1] : vector<16x32xf32> to vector<16xf32>
    %118 = vector.shape_cast %117 : vector<16xf32> to vector<16x1xf32>
    %cst_60 = arith.constant 3.200000e+01 : f32
    %119 = vector.broadcast %cst_60 : f32 to vector<16x1xf32>
    %120 = arith.divf %118, %119 : vector<16x1xf32>
    %121 = vector.broadcast %120 : vector<16x1xf32> to vector<16x32xf32>
    %122 = arith.subf %114, %121 : vector<16x32xf32>
    %123 = arith.mulf %122, %122 : vector<16x32xf32>
    %cst_61 = arith.constant dense<0.000000e+00> : vector<16xf32>
    %124 = vector.multi_reduction <add>, %123, %cst_61 [1] : vector<16x32xf32> to vector<16xf32>
    %125 = vector.shape_cast %124 : vector<16xf32> to vector<16x1xf32>
    %cst_62 = arith.constant 3.200000e+01 : f32
    %126 = vector.broadcast %cst_62 : f32 to vector<16x1xf32>
    %127 = arith.divf %125, %126 : vector<16x1xf32>
    %128 = vector.broadcast %120 : vector<16x1xf32> to vector<16x32xf32>
    %129 = arith.subf %114, %128 : vector<16x32xf32>
    %cst_63 = arith.constant 9.99999974E-6 : f32
    %130 = vector.broadcast %cst_63 : f32 to vector<16x1xf32>
    %131 = arith.addf %127, %130 : vector<16x1xf32>
    %132 = math.rsqrt %131 : vector<16x1xf32>
    %133 = vector.broadcast %132 : vector<16x1xf32> to vector<16x32xf32>
    %134 = arith.mulf %129, %133 : vector<16x32xf32>
    %135 = vector.broadcast %115 : vector<1x32xf32> to vector<16x32xf32>
    %136 = arith.mulf %134, %135 : vector<16x32xf32>
    %137 = vector.broadcast %116 : vector<1x32xf32> to vector<16x32xf32>
    %138 = arith.addf %136, %137 : vector<16x32xf32>
    %139 = arith.addf %138, %84 : vector<16x32xf32>
    %cst_64 = arith.constant 0.000000e+00 : f32
    %140 = vector.broadcast %cst_64 : f32 to vector<16x32xf32>
    %141 = arith.maximumf %139, %140 : vector<16x32xf32>
    %c0_65 = arith.constant 0 : index
    %c0_66 = arith.constant 0 : index
    %142 = vector.load %arg33[%c0_65, %c0_66] : memref<32x4xf32, #tpu.memory_space<vmem>>, vector<32x4xf32>
    %cst_67 = arith.constant dense<0.000000e+00> : vector<16x4xf32>
    %143 = tpu.matmul %141, %142, %cst_67 {dimension_numbers = #tpu.dot_dimension_numbers<[1], [0], [0], [1], [0, 0, 1, 1], [], []>} : vector<16x32xf32>, vector<32x4xf32>, vector<16x4xf32> -> vector<16x4xf32>
    %c0_68 = arith.constant 0 : index
    %c0_69 = arith.constant 0 : index
    %144 = vector.load %arg34[%c0_68, %c0_69] : memref<1x4xf32, #tpu.memory_space<vmem>>, vector<1x4xf32>
    %145 = vector.broadcast %144 : vector<1x4xf32> to vector<16x4xf32>
    %146 = arith.addf %143, %145 : vector<16x4xf32>
    %c0_70 = arith.constant 0 : index
    %c0_71 = arith.constant 0 : index
    %147 = vector.load %arg45[%c0_70, %c0_71] : memref<16x4xf32, #tpu.memory_space<vmem>>, vector<16x4xf32>
    tpu.vector_store %arg45[%c0_70, %c0_71], %146 {strides = array<i32>} : memref<16x4xf32, #tpu.memory_space<vmem>>, vector<16x4xf32>,
    %c0_72 = arith.constant 0 : index
    %c0_73 = arith.constant 0 : index
    %148 = vector.load %arg38[%c0_72, %c0_73] : memref<4x32xf32, #tpu.memory_space<vmem>>, vector<4x32xf32>
    %cst_74 = arith.constant dense<0.000000e+00> : vector<16x32xf32>
    %149 = tpu.matmul %146, %148, %cst_74 {dimension_numbers = #tpu.dot_dimension_numbers<[1], [0], [0], [1], [0, 0, 1, 1], [], []>} : vector<16x4xf32>, vector<4x32xf32>, vector<16x32xf32> -> vector<16x32xf32>
    %c0_75 = arith.constant 0 : index
    %c0_76 = arith.constant 0 : index
    %150 = vector.load %arg39[%c0_75, %c0_76] : memref<1x32xf32, #tpu.memory_space<vmem>>, vector<1x32xf32>
    %c0_77 = arith.constant 0 : index
    %c0_78 = arith.constant 0 : index
    %151 = vector.load %arg40[%c0_77, %c0_78] : memref<1x32xf32, #tpu.memory_space<vmem>>, vector<1x32xf32>
    %cst_79 = arith.constant dense<0.000000e+00> : vector<16xf32>
    %152 = vector.multi_reduction <add>, %149, %cst_79 [1] : vector<16x32xf32> to vector<16xf32>
    %153 = vector.shape_cast %152 : vector<16xf32> to vector<16x1xf32>
    %cst_80 = arith.constant 3.200000e+01 : f32
    %154 = vector.broadcast %cst_80 : f32 to vector<16x1xf32>
    %155 = arith.divf %153, %154 : vector<16x1xf32>
    %156 = vector.broadcast %155 : vector<16x1xf32> to vector<16x32xf32>
    %157 = arith.subf %149, %156 : vector<16x32xf32>
    %158 = arith.mulf %157, %157 : vector<16x32xf32>
    %cst_81 = arith.constant dense<0.000000e+00> : vector<16xf32>
    %159 = vector.multi_reduction <add>, %158, %cst_81 [1] : vector<16x32xf32> to vector<16xf32>
    %160 = vector.shape_cast %159 : vector<16xf32> to vector<16x1xf32>
    %cst_82 = arith.constant 3.200000e+01 : f32
    %161 = vector.broadcast %cst_82 : f32 to vector<16x1xf32>
    %162 = arith.divf %160, %161 : vector<16x1xf32>
    %163 = vector.broadcast %155 : vector<16x1xf32> to vector<16x32xf32>
    %164 = arith.subf %149, %163 : vector<16x32xf32>
    %cst_83 = arith.constant 9.99999974E-6 : f32
    %165 = vector.broadcast %cst_83 : f32 to vector<16x1xf32>
    %166 = arith.addf %162, %165 : vector<16x1xf32>
    %167 = math.rsqrt %166 : vector<16x1xf32>
    %168 = vector.broadcast %167 : vector<16x1xf32> to vector<16x32xf32>
    %169 = arith.mulf %164, %168 : vector<16x32xf32>
    %170 = vector.broadcast %150 : vector<1x32xf32> to vector<16x32xf32>
    %171 = arith.mulf %169, %170 : vector<16x32xf32>
    %172 = vector.broadcast %151 : vector<1x32xf32> to vector<16x32xf32>
    %173 = arith.addf %171, %172 : vector<16x32xf32>
    %cst_84 = arith.constant 0.000000e+00 : f32
    %174 = vector.broadcast %cst_84 : f32 to vector<16x32xf32>
    %175 = arith.maximumf %173, %174 : vector<16x32xf32>
    %c0_85 = arith.constant 0 : index
    %c0_86 = arith.constant 0 : index
    %176 = vector.load %arg41[%c0_85, %c0_86] : memref<32x64xf32, #tpu.memory_space<vmem>>, vector<32x64xf32>
    %cst_87 = arith.constant dense<0.000000e+00> : vector<16x64xf32>
    %177 = tpu.matmul %56, %176, %cst_87 {dimension_numbers = #tpu.dot_dimension_numbers<[1], [0], [0], [1], [0, 0, 1, 1], [], []>} : vector<16x32xf32>, vector<32x64xf32>, vector<16x64xf32> -> vector<16x64xf32>
    %c0_88 = arith.constant 0 : index
    %c0_89 = arith.constant 0 : index
    %178 = vector.load %arg42[%c0_88, %c0_89] : memref<32x64xf32, #tpu.memory_space<vmem>>, vector<32x64xf32>
    %cst_90 = arith.constant dense<0.000000e+00> : vector<16x64xf32>
    %179 = tpu.matmul %175, %178, %cst_90 {dimension_numbers = #tpu.dot_dimension_numbers<[1], [0], [0], [1], [0, 0, 1, 1], [], []>} : vector<16x32xf32>, vector<32x64xf32>, vector<16x64xf32> -> vector<16x64xf32>
    %180 = arith.addf %177, %179 : vector<16x64xf32>
    %c0_91 = arith.constant 0 : index
    %c0_92 = arith.constant 0 : index
    %181 = vector.load %arg19[%c0_91, %c0_92] : memref<64x64xf32, #tpu.memory_space<vmem>>, vector<64x64xf32>
    %cst_93 = arith.constant dense<0.000000e+00> : vector<16x64xf32>
    %182 = tpu.matmul %180, %181, %cst_93 {dimension_numbers = #tpu.dot_dimension_numbers<[1], [0], [0], [1], [0, 0, 1, 1], [], []>} : vector<16x64xf32>, vector<64x64xf32>, vector<16x64xf32> -> vector<16x64xf32>
    %c0_94 = arith.constant 0 : index
    %c0_95 = arith.constant 0 : index
    %183 = vector.load %arg20[%c0_94, %c0_95] : memref<1x64xf32, #tpu.memory_space<vmem>>, vector<1x64xf32>
    %c0_96 = arith.constant 0 : index
    %c0_97 = arith.constant 0 : index
    %184 = vector.load %arg21[%c0_96, %c0_97] : memref<1x64xf32, #tpu.memory_space<vmem>>, vector<1x64xf32>
    %cst_98 = arith.constant dense<0.000000e+00> : vector<16xf32>
    %185 = vector.multi_reduction <add>, %182, %cst_98 [1] : vector<16x64xf32> to vector<16xf32>
    %186 = vector.shape_cast %185 : vector<16xf32> to vector<16x1xf32>
    %cst_99 = arith.constant 6.400000e+01 : f32
    %187 = vector.broadcast %cst_99 : f32 to vector<16x1xf32>
    %188 = arith.divf %186, %187 : vector<16x1xf32>
    %189 = vector.broadcast %188 : vector<16x1xf32> to vector<16x64xf32>
    %190 = arith.subf %182, %189 : vector<16x64xf32>
    %191 = arith.mulf %190, %190 : vector<16x64xf32>
    %cst_100 = arith.constant dense<0.000000e+00> : vector<16xf32>
    %192 = vector.multi_reduction <add>, %191, %cst_100 [1] : vector<16x64xf32> to vector<16xf32>
    %193 = vector.shape_cast %192 : vector<16xf32> to vector<16x1xf32>
    %cst_101 = arith.constant 6.400000e+01 : f32
    %194 = vector.broadcast %cst_101 : f32 to vector<16x1xf32>
    %195 = arith.divf %193, %194 : vector<16x1xf32>
    %196 = vector.broadcast %188 : vector<16x1xf32> to vector<16x64xf32>
    %197 = arith.subf %182, %196 : vector<16x64xf32>
    %cst_102 = arith.constant 9.99999974E-6 : f32
    %198 = vector.broadcast %cst_102 : f32 to vector<16x1xf32>
    %199 = arith.addf %195, %198 : vector<16x1xf32>
    %200 = math.rsqrt %199 : vector<16x1xf32>
    %201 = vector.broadcast %200 : vector<16x1xf32> to vector<16x64xf32>
    %202 = arith.mulf %197, %201 : vector<16x64xf32>
    %203 = vector.broadcast %183 : vector<1x64xf32> to vector<16x64xf32>
    %204 = arith.mulf %202, %203 : vector<16x64xf32>
    %205 = vector.broadcast %184 : vector<1x64xf32> to vector<16x64xf32>
    %206 = arith.addf %204, %205 : vector<16x64xf32>
    %cst_103 = arith.constant 0.000000e+00 : f32
    %207 = vector.broadcast %cst_103 : f32 to vector<16x64xf32>
    %208 = arith.maximumf %206, %207 : vector<16x64xf32>
    %c0_104 = arith.constant 0 : index
    %c0_105 = arith.constant 0 : index
    %209 = vector.load %arg22[%c0_104, %c0_105] : memref<64x64xf32, #tpu.memory_space<vmem>>, vector<64x64xf32>
    %cst_106 = arith.constant dense<0.000000e+00> : vector<16x64xf32>
    %210 = tpu.matmul %208, %209, %cst_106 {dimension_numbers = #tpu.dot_dimension_numbers<[1], [0], [0], [1], [0, 0, 1, 1], [], []>} : vector<16x64xf32>, vector<64x64xf32>, vector<16x64xf32> -> vector<16x64xf32>
    %c0_107 = arith.constant 0 : index
    %c0_108 = arith.constant 0 : index
    %211 = vector.load %arg23[%c0_107, %c0_108] : memref<1x64xf32, #tpu.memory_space<vmem>>, vector<1x64xf32>
    %c0_109 = arith.constant 0 : index
    %c0_110 = arith.constant 0 : index
    %212 = vector.load %arg24[%c0_109, %c0_110] : memref<1x64xf32, #tpu.memory_space<vmem>>, vector<1x64xf32>
    %cst_111 = arith.constant dense<0.000000e+00> : vector<16xf32>
    %213 = vector.multi_reduction <add>, %210, %cst_111 [1] : vector<16x64xf32> to vector<16xf32>
    %214 = vector.shape_cast %213 : vector<16xf32> to vector<16x1xf32>
    %cst_112 = arith.constant 6.400000e+01 : f32
    %215 = vector.broadcast %cst_112 : f32 to vector<16x1xf32>
    %216 = arith.divf %214, %215 : vector<16x1xf32>
    %217 = vector.broadcast %216 : vector<16x1xf32> to vector<16x64xf32>
    %218 = arith.subf %210, %217 : vector<16x64xf32>
    %219 = arith.mulf %218, %218 : vector<16x64xf32>
    %cst_113 = arith.constant dense<0.000000e+00> : vector<16xf32>
    %220 = vector.multi_reduction <add>, %219, %cst_113 [1] : vector<16x64xf32> to vector<16xf32>
    %221 = vector.shape_cast %220 : vector<16xf32> to vector<16x1xf32>
    %cst_114 = arith.constant 6.400000e+01 : f32
    %222 = vector.broadcast %cst_114 : f32 to vector<16x1xf32>
    %223 = arith.divf %221, %222 : vector<16x1xf32>
    %224 = vector.broadcast %216 : vector<16x1xf32> to vector<16x64xf32>
    %225 = arith.subf %210, %224 : vector<16x64xf32>
    %cst_115 = arith.constant 9.99999974E-6 : f32
    %226 = vector.broadcast %cst_115 : f32 to vector<16x1xf32>
    %227 = arith.addf %223, %226 : vector<16x1xf32>
    %228 = math.rsqrt %227 : vector<16x1xf32>
    %229 = vector.broadcast %228 : vector<16x1xf32> to vector<16x64xf32>
    %230 = arith.mulf %225, %229 : vector<16x64xf32>
    %231 = vector.broadcast %211 : vector<1x64xf32> to vector<16x64xf32>
    %232 = arith.mulf %230, %231 : vector<16x64xf32>
    %233 = vector.broadcast %212 : vector<1x64xf32> to vector<16x64xf32>
    %234 = arith.addf %232, %233 : vector<16x64xf32>
    %235 = arith.addf %234, %180 : vector<16x64xf32>
    %cst_116 = arith.constant 0.000000e+00 : f32
    %236 = vector.broadcast %cst_116 : f32 to vector<16x64xf32>
    %237 = arith.maximumf %235, %236 : vector<16x64xf32>
    %c0_117 = arith.constant 0 : index
    %c0_118 = arith.constant 0 : index
    %238 = vector.load %arg25[%c0_117, %c0_118] : memref<64x8xf32, #tpu.memory_space<vmem>>, vector<64x8xf32>
    %cst_119 = arith.constant dense<0.000000e+00> : vector<16x8xf32>
    %239 = tpu.matmul %237, %238, %cst_119 {dimension_numbers = #tpu.dot_dimension_numbers<[1], [0], [0], [1], [0, 0, 1, 1], [], []>} : vector<16x64xf32>, vector<64x8xf32>, vector<16x8xf32> -> vector<16x8xf32>
    %c0_120 = arith.constant 0 : index
    %c0_121 = arith.constant 0 : index
    %240 = vector.load %arg26[%c0_120, %c0_121] : memref<1x8xf32, #tpu.memory_space<vmem>>, vector<1x8xf32>
    %241 = vector.broadcast %240 : vector<1x8xf32> to vector<16x8xf32>
    %242 = arith.addf %239, %241 : vector<16x8xf32>
    %c0_122 = arith.constant 0 : index
    %c0_123 = arith.constant 0 : index
    %243 = vector.load %arg46[%c0_122, %c0_123] : memref<16x8xf32, #tpu.memory_space<vmem>>, vector<16x8xf32>
    tpu.vector_store %arg46[%c0_122, %c0_123], %242 {strides = array<i32>} : memref<16x8xf32, #tpu.memory_space<vmem>>, vector<16x8xf32>,
    %c0_124 = arith.constant 0 : index
    %c0_125 = arith.constant 0 : index
    %244 = vector.load %arg35[%c0_124, %c0_125] : memref<8x32xf32, #tpu.memory_space<vmem>>, vector<8x32xf32>
    %cst_126 = arith.constant dense<0.000000e+00> : vector<16x32xf32>
    %245 = tpu.matmul %242, %244, %cst_126 {dimension_numbers = #tpu.dot_dimension_numbers<[1], [0], [0], [1], [0, 0, 1, 1], [], []>} : vector<16x8xf32>, vector<8x32xf32>, vector<16x32xf32> -> vector<16x32xf32>
    %c0_127 = arith.constant 0 : index
    %c0_128 = arith.constant 0 : index
    %246 = vector.load %arg36[%c0_127, %c0_128] : memref<1x32xf32, #tpu.memory_space<vmem>>, vector<1x32xf32>
    %c0_129 = arith.constant 0 : index
    %c0_130 = arith.constant 0 : index
    %247 = vector.load %arg37[%c0_129, %c0_130] : memref<1x32xf32, #tpu.memory_space<vmem>>, vector<1x32xf32>
    %cst_131 = arith.constant dense<0.000000e+00> : vector<16xf32>
    %248 = vector.multi_reduction <add>, %245, %cst_131 [1] : vector<16x32xf32> to vector<16xf32>
    %249 = vector.shape_cast %248 : vector<16xf32> to vector<16x1xf32>
    %cst_132 = arith.constant 3.200000e+01 : f32
    %250 = vector.broadcast %cst_132 : f32 to vector<16x1xf32>
    %251 = arith.divf %249, %250 : vector<16x1xf32>
    %252 = vector.broadcast %251 : vector<16x1xf32> to vector<16x32xf32>
    %253 = arith.subf %245, %252 : vector<16x32xf32>
    %254 = arith.mulf %253, %253 : vector<16x32xf32>
    %cst_133 = arith.constant dense<0.000000e+00> : vector<16xf32>
    %255 = vector.multi_reduction <add>, %254, %cst_133 [1] : vector<16x32xf32> to vector<16xf32>
    %256 = vector.shape_cast %255 : vector<16xf32> to vector<16x1xf32>
    %cst_134 = arith.constant 3.200000e+01 : f32
    %257 = vector.broadcast %cst_134 : f32 to vector<16x1xf32>
    %258 = arith.divf %256, %257 : vector<16x1xf32>
    %259 = vector.broadcast %251 : vector<16x1xf32> to vector<16x32xf32>
    %260 = arith.subf %245, %259 : vector<16x32xf32>
    %cst_135 = arith.constant 9.99999974E-6 : f32
    %261 = vector.broadcast %cst_135 : f32 to vector<16x1xf32>
    %262 = arith.addf %258, %261 : vector<16x1xf32>
    %263 = math.rsqrt %262 : vector<16x1xf32>
    %264 = vector.broadcast %263 : vector<16x1xf32> to vector<16x32xf32>
    %265 = arith.mulf %260, %264 : vector<16x32xf32>
    %266 = vector.broadcast %246 : vector<1x32xf32> to vector<16x32xf32>
    %267 = arith.mulf %265, %266 : vector<16x32xf32>
    %268 = vector.broadcast %247 : vector<1x32xf32> to vector<16x32xf32>
    %269 = arith.addf %267, %268 : vector<16x32xf32>
    %cst_136 = arith.constant 0.000000e+00 : f32
    %270 = vector.broadcast %cst_136 : f32 to vector<16x32xf32>
    %271 = arith.maximumf %269, %270 : vector<16x32xf32>
    %c0_137 = arith.constant 0 : index
    %c0_138 = arith.constant 0 : index
    %272 = vector.load %arg43[%c0_137, %c0_138] : memref<32x64xf32, #tpu.memory_space<vmem>>, vector<32x64xf32>
    %cst_139 = arith.constant dense<0.000000e+00> : vector<16x64xf32>
    %273 = tpu.matmul %28, %272, %cst_139 {dimension_numbers = #tpu.dot_dimension_numbers<[1], [0], [0], [1], [0, 0, 1, 1], [], []>} : vector<16x32xf32>, vector<32x64xf32>, vector<16x64xf32> -> vector<16x64xf32>
    %c0_140 = arith.constant 0 : index
    %c0_141 = arith.constant 0 : index
    %274 = vector.load %arg44[%c0_140, %c0_141] : memref<32x64xf32, #tpu.memory_space<vmem>>, vector<32x64xf32>
    %cst_142 = arith.constant dense<0.000000e+00> : vector<16x64xf32>
    %275 = tpu.matmul %271, %274, %cst_142 {dimension_numbers = #tpu.dot_dimension_numbers<[1], [0], [0], [1], [0, 0, 1, 1], [], []>} : vector<16x32xf32>, vector<32x64xf32>, vector<16x64xf32> -> vector<16x64xf32>
    %276 = arith.addf %273, %275 : vector<16x64xf32>
    %c0_143 = arith.constant 0 : index
    %c0_144 = arith.constant 0 : index
    %277 = vector.load %arg11[%c0_143, %c0_144] : memref<64x64xf32, #tpu.memory_space<vmem>>, vector<64x64xf32>
    %cst_145 = arith.constant dense<0.000000e+00> : vector<16x64xf32>
    %278 = tpu.matmul %276, %277, %cst_145 {dimension_numbers = #tpu.dot_dimension_numbers<[1], [0], [0], [1], [0, 0, 1, 1], [], []>} : vector<16x64xf32>, vector<64x64xf32>, vector<16x64xf32> -> vector<16x64xf32>
    %c0_146 = arith.constant 0 : index
    %c0_147 = arith.constant 0 : index
    %279 = vector.load %arg12[%c0_146, %c0_147] : memref<1x64xf32, #tpu.memory_space<vmem>>, vector<1x64xf32>
    %c0_148 = arith.constant 0 : index
    %c0_149 = arith.constant 0 : index
    %280 = vector.load %arg13[%c0_148, %c0_149] : memref<1x64xf32, #tpu.memory_space<vmem>>, vector<1x64xf32>
    %cst_150 = arith.constant dense<0.000000e+00> : vector<16xf32>
    %281 = vector.multi_reduction <add>, %278, %cst_150 [1] : vector<16x64xf32> to vector<16xf32>
    %282 = vector.shape_cast %281 : vector<16xf32> to vector<16x1xf32>
    %cst_151 = arith.constant 6.400000e+01 : f32
    %283 = vector.broadcast %cst_151 : f32 to vector<16x1xf32>
    %284 = arith.divf %282, %283 : vector<16x1xf32>
    %285 = vector.broadcast %284 : vector<16x1xf32> to vector<16x64xf32>
    %286 = arith.subf %278, %285 : vector<16x64xf32>
    %287 = arith.mulf %286, %286 : vector<16x64xf32>
    %cst_152 = arith.constant dense<0.000000e+00> : vector<16xf32>
    %288 = vector.multi_reduction <add>, %287, %cst_152 [1] : vector<16x64xf32> to vector<16xf32>
    %289 = vector.shape_cast %288 : vector<16xf32> to vector<16x1xf32>
    %cst_153 = arith.constant 6.400000e+01 : f32
    %290 = vector.broadcast %cst_153 : f32 to vector<16x1xf32>
    %291 = arith.divf %289, %290 : vector<16x1xf32>
    %292 = vector.broadcast %284 : vector<16x1xf32> to vector<16x64xf32>
    %293 = arith.subf %278, %292 : vector<16x64xf32>
    %cst_154 = arith.constant 9.99999974E-6 : f32
    %294 = vector.broadcast %cst_154 : f32 to vector<16x1xf32>
    %295 = arith.addf %291, %294 : vector<16x1xf32>
    %296 = math.rsqrt %295 : vector<16x1xf32>
    %297 = vector.broadcast %296 : vector<16x1xf32> to vector<16x64xf32>
    %298 = arith.mulf %293, %297 : vector<16x64xf32>
    %299 = vector.broadcast %279 : vector<1x64xf32> to vector<16x64xf32>
    %300 = arith.mulf %298, %299 : vector<16x64xf32>
    %301 = vector.broadcast %280 : vector<1x64xf32> to vector<16x64xf32>
    %302 = arith.addf %300, %301 : vector<16x64xf32>
    %cst_155 = arith.constant 0.000000e+00 : f32
    %303 = vector.broadcast %cst_155 : f32 to vector<16x64xf32>
    %304 = arith.maximumf %302, %303 : vector<16x64xf32>
    %c0_156 = arith.constant 0 : index
    %c0_157 = arith.constant 0 : index
    %305 = vector.load %arg14[%c0_156, %c0_157] : memref<64x64xf32, #tpu.memory_space<vmem>>, vector<64x64xf32>
    %cst_158 = arith.constant dense<0.000000e+00> : vector<16x64xf32>
    %306 = tpu.matmul %304, %305, %cst_158 {dimension_numbers = #tpu.dot_dimension_numbers<[1], [0], [0], [1], [0, 0, 1, 1], [], []>} : vector<16x64xf32>, vector<64x64xf32>, vector<16x64xf32> -> vector<16x64xf32>
    %c0_159 = arith.constant 0 : index
    %c0_160 = arith.constant 0 : index
    %307 = vector.load %arg15[%c0_159, %c0_160] : memref<1x64xf32, #tpu.memory_space<vmem>>, vector<1x64xf32>
    %c0_161 = arith.constant 0 : index
    %c0_162 = arith.constant 0 : index
    %308 = vector.load %arg16[%c0_161, %c0_162] : memref<1x64xf32, #tpu.memory_space<vmem>>, vector<1x64xf32>
    %cst_163 = arith.constant dense<0.000000e+00> : vector<16xf32>
    %309 = vector.multi_reduction <add>, %306, %cst_163 [1] : vector<16x64xf32> to vector<16xf32>
    %310 = vector.shape_cast %309 : vector<16xf32> to vector<16x1xf32>
    %cst_164 = arith.constant 6.400000e+01 : f32
    %311 = vector.broadcast %cst_164 : f32 to vector<16x1xf32>
    %312 = arith.divf %310, %311 : vector<16x1xf32>
    %313 = vector.broadcast %312 : vector<16x1xf32> to vector<16x64xf32>
    %314 = arith.subf %306, %313 : vector<16x64xf32>
    %315 = arith.mulf %314, %314 : vector<16x64xf32>
    %cst_165 = arith.constant dense<0.000000e+00> : vector<16xf32>
    %316 = vector.multi_reduction <add>, %315, %cst_165 [1] : vector<16x64xf32> to vector<16xf32>
    %317 = vector.shape_cast %316 : vector<16xf32> to vector<16x1xf32>
    %cst_166 = arith.constant 6.400000e+01 : f32
    %318 = vector.broadcast %cst_166 : f32 to vector<16x1xf32>
    %319 = arith.divf %317, %318 : vector<16x1xf32>
    %320 = vector.broadcast %312 : vector<16x1xf32> to vector<16x64xf32>
    %321 = arith.subf %306, %320 : vector<16x64xf32>
    %cst_167 = arith.constant 9.99999974E-6 : f32
    %322 = vector.broadcast %cst_167 : f32 to vector<16x1xf32>
    %323 = arith.addf %319, %322 : vector<16x1xf32>
    %324 = math.rsqrt %323 : vector<16x1xf32>
    %325 = vector.broadcast %324 : vector<16x1xf32> to vector<16x64xf32>
    %326 = arith.mulf %321, %325 : vector<16x64xf32>
    %327 = vector.broadcast %307 : vector<1x64xf32> to vector<16x64xf32>
    %328 = arith.mulf %326, %327 : vector<16x64xf32>
    %329 = vector.broadcast %308 : vector<1x64xf32> to vector<16x64xf32>
    %330 = arith.addf %328, %329 : vector<16x64xf32>
    %331 = arith.addf %330, %276 : vector<16x64xf32>
    %cst_168 = arith.constant 0.000000e+00 : f32
    %332 = vector.broadcast %cst_168 : f32 to vector<16x64xf32>
    %333 = arith.maximumf %331, %332 : vector<16x64xf32>
    %c0_169 = arith.constant 0 : index
    %c0_170 = arith.constant 0 : index
    %334 = vector.load %arg17[%c0_169, %c0_170] : memref<64x16xf32, #tpu.memory_space<vmem>>, vector<64x16xf32>
    %cst_171 = arith.constant dense<0.000000e+00> : vector<16x16xf32>
    %335 = tpu.matmul %333, %334, %cst_171 {dimension_numbers = #tpu.dot_dimension_numbers<[1], [0], [0], [1], [0, 0, 1, 1], [], []>} : vector<16x64xf32>, vector<64x16xf32>, vector<16x16xf32> -> vector<16x16xf32>
    %c0_172 = arith.constant 0 : index
    %c0_173 = arith.constant 0 : index
    %336 = vector.load %arg18[%c0_172, %c0_173] : memref<1x16xf32, #tpu.memory_space<vmem>>, vector<1x16xf32>
    %337 = vector.broadcast %336 : vector<1x16xf32> to vector<16x16xf32>
    %338 = arith.addf %335, %337 : vector<16x16xf32>
    %c0_174 = arith.constant 0 : index
    %c0_175 = arith.constant 0 : index
    %339 = vector.load %arg47[%c0_174, %c0_175] : memref<16x16xf32, #tpu.memory_space<vmem>>, vector<16x16xf32>
    tpu.vector_store %arg47[%c0_174, %c0_175], %338 {strides = array<i32>} : memref<16x16xf32, #tpu.memory_space<vmem>>, vector<16x16xf32>,
    return
  }
  func.func @transform_0(%arg0: i32) -> (i32, i32) {
    %c0_i32 = arith.constant 0 : i32
    %c0_i32_0 = arith.constant 0 : i32
    return %arg0, %c0_i32 : i32, i32
  }
  func.func @transform_1(%arg0: i32) -> (i32, i32) {
    %c0_i32 = arith.constant 0 : i32
    %c0_i32_0 = arith.constant 0 : i32
    %c0_i32_1 = arith.constant 0 : i32
    return %c0_i32, %c0_i32_0 : i32, i32
  }
  func.func @transform_2(%arg0: i32) -> (i32, i32) {
    %c0_i32 = arith.constant 0 : i32
    %c0_i32_0 = arith.constant 0 : i32
    %c0_i32_1 = arith.constant 0 : i32
    return %c0_i32, %c0_i32_0 : i32, i32
  }
  func.func @transform_3(%arg0: i32) -> (i32, i32) {
    %c0_i32 = arith.constant 0 : i32
    %c0_i32_0 = arith.constant 0 : i32
    %c0_i32_1 = arith.constant 0 : i32
    return %c0_i32, %c0_i32_0 : i32, i32
  }
  func.func @transform_4(%arg0: i32) -> (i32, i32) {
    %c0_i32 = arith.constant 0 : i32
    %c0_i32_0 = arith.constant 0 : i32
    %c0_i32_1 = arith.constant 0 : i32
    return %c0_i32, %c0_i32_0 : i32, i32
  }
  func.func @transform_5(%arg0: i32) -> (i32, i32) {
    %c0_i32 = arith.constant 0 : i32
    %c0_i32_0 = arith.constant 0 : i32
    %c0_i32_1 = arith.constant 0 : i32
    return %c0_i32, %c0_i32_0 : i32, i32
  }
  func.func @transform_6(%arg0: i32) -> (i32, i32) {
    %c0_i32 = arith.constant 0 : i32
    %c0_i32_0 = arith.constant 0 : i32
    %c0_i32_1 = arith.constant 0 : i32
    return %c0_i32, %c0_i32_0 : i32, i32
  }
  func.func @transform_7(%arg0: i32) -> (i32, i32) {
    %c0_i32 = arith.constant 0 : i32
    %c0_i32_0 = arith.constant 0 : i32
    %c0_i32_1 = arith.constant 0 : i32
    return %c0_i32, %c0_i32_0 : i32, i32
  }
  func.func @transform_8(%arg0: i32) -> (i32, i32) {
    %c0_i32 = arith.constant 0 : i32
    %c0_i32_0 = arith.constant 0 : i32
    %c0_i32_1 = arith.constant 0 : i32
    return %c0_i32, %c0_i32_0 : i32, i32
  }
  func.func @transform_9(%arg0: i32) -> (i32, i32) {
    %c0_i32 = arith.constant 0 : i32
    %c0_i32_0 = arith.constant 0 : i32
    %c0_i32_1 = arith.constant 0 : i32
    return %c0_i32, %c0_i32_0 : i32, i32
  }
  func.func @transform_10(%arg0: i32) -> (i32, i32) {
    %c0_i32 = arith.constant 0 : i32
    %c0_i32_0 = arith.constant 0 : i32
    %c0_i32_1 = arith.constant 0 : i32
    return %c0_i32, %c0_i32_0 : i32, i32
  }
  func.func @transform_11(%arg0: i32) -> (i32, i32) {
    %c0_i32 = arith.constant 0 : i32
    %c0_i32_0 = arith.constant 0 : i32
    %c0_i32_1 = arith.constant 0 : i32
    return %c0_i32, %c0_i32_0 : i32, i32
  }
  func.func @transform_12(%arg0: i32) -> (i32, i32) {
    %c0_i32 = arith.constant 0 : i32
    %c0_i32_0 = arith.constant 0 : i32
    %c0_i32_1 = arith.constant 0 : i32
    return %c0_i32, %c0_i32_0 : i32, i32
  }
  func.func @transform_13(%arg0: i32) -> (i32, i32) {
    %c0_i32 = arith.constant 0 : i32
    %c0_i32_0 = arith.constant 0 : i32
    %c0_i32_1 = arith.constant 0 : i32
    return %c0_i32, %c0_i32_0 : i32, i32
  }
  func.func @transform_14(%arg0: i32) -> (i32, i32) {
    %c0_i32 = arith.constant 0 : i32
    %c0_i32_0 = arith.constant 0 : i32
    %c0_i32_1 = arith.constant 0 : i32
    return %c0_i32, %c0_i32_0 : i32, i32
  }
  func.func @transform_15(%arg0: i32) -> (i32, i32) {
    %c0_i32 = arith.constant 0 : i32
    %c0_i32_0 = arith.constant 0 : i32
    %c0_i32_1 = arith.constant 0 : i32
    return %c0_i32, %c0_i32_0 : i32, i32
  }
  func.func @transform_16(%arg0: i32) -> (i32, i32) {
    %c0_i32 = arith.constant 0 : i32
    %c0_i32_0 = arith.constant 0 : i32
    %c0_i32_1 = arith.constant 0 : i32
    return %c0_i32, %c0_i32_0 : i32, i32
  }
  func.func @transform_17(%arg0: i32) -> (i32, i32) {
    %c0_i32 = arith.constant 0 : i32
    %c0_i32_0 = arith.constant 0 : i32
    %c0_i32_1 = arith.constant 0 : i32
    return %c0_i32, %c0_i32_0 : i32, i32
  }
  func.func @transform_18(%arg0: i32) -> (i32, i32) {
    %c0_i32 = arith.constant 0 : i32
    %c0_i32_0 = arith.constant 0 : i32
    %c0_i32_1 = arith.constant 0 : i32
    return %c0_i32, %c0_i32_0 : i32, i32
  }
  func.func @transform_19(%arg0: i32) -> (i32, i32) {
    %c0_i32 = arith.constant 0 : i32
    %c0_i32_0 = arith.constant 0 : i32
    %c0_i32_1 = arith.constant 0 : i32
    return %c0_i32, %c0_i32_0 : i32, i32
  }
  func.func @transform_20(%arg0: i32) -> (i32, i32) {
    %c0_i32 = arith.constant 0 : i32
    %c0_i32_0 = arith.constant 0 : i32
    %c0_i32_1 = arith.constant 0 : i32
    return %c0_i32, %c0_i32_0 : i32, i32
  }
  func.func @transform_21(%arg0: i32) -> (i32, i32) {
    %c0_i32 = arith.constant 0 : i32
    %c0_i32_0 = arith.constant 0 : i32
    %c0_i32_1 = arith.constant 0 : i32
    return %c0_i32, %c0_i32_0 : i32, i32
  }
  func.func @transform_22(%arg0: i32) -> (i32, i32) {
    %c0_i32 = arith.constant 0 : i32
    %c0_i32_0 = arith.constant 0 : i32
    %c0_i32_1 = arith.constant 0 : i32
    return %c0_i32, %c0_i32_0 : i32, i32
  }
  func.func @transform_23(%arg0: i32) -> (i32, i32) {
    %c0_i32 = arith.constant 0 : i32
    %c0_i32_0 = arith.constant 0 : i32
    %c0_i32_1 = arith.constant 0 : i32
    return %c0_i32, %c0_i32_0 : i32, i32
  }
  func.func @transform_24(%arg0: i32) -> (i32, i32) {
    %c0_i32 = arith.constant 0 : i32
    %c0_i32_0 = arith.constant 0 : i32
    %c0_i32_1 = arith.constant 0 : i32
    return %c0_i32, %c0_i32_0 : i32, i32
  }
  func.func @transform_25(%arg0: i32) -> (i32, i32) {
    %c0_i32 = arith.constant 0 : i32
    %c0_i32_0 = arith.constant 0 : i32
    %c0_i32_1 = arith.constant 0 : i32
    return %c0_i32, %c0_i32_0 : i32, i32
  }
  func.func @transform_26(%arg0: i32) -> (i32, i32) {
    %c0_i32 = arith.constant 0 : i32
    %c0_i32_0 = arith.constant 0 : i32
    %c0_i32_1 = arith.constant 0 : i32
    return %c0_i32, %c0_i32_0 : i32, i32
  }
  func.func @transform_27(%arg0: i32) -> (i32, i32) {
    %c0_i32 = arith.constant 0 : i32
    %c0_i32_0 = arith.constant 0 : i32
    %c0_i32_1 = arith.constant 0 : i32
    return %c0_i32, %c0_i32_0 : i32, i32
  }
  func.func @transform_28(%arg0: i32) -> (i32, i32) {
    %c0_i32 = arith.constant 0 : i32
    %c0_i32_0 = arith.constant 0 : i32
    %c0_i32_1 = arith.constant 0 : i32
    return %c0_i32, %c0_i32_0 : i32, i32
  }
  func.func @transform_29(%arg0: i32) -> (i32, i32) {
    %c0_i32 = arith.constant 0 : i32
    %c0_i32_0 = arith.constant 0 : i32
    %c0_i32_1 = arith.constant 0 : i32
    return %c0_i32, %c0_i32_0 : i32, i32
  }
  func.func @transform_30(%arg0: i32) -> (i32, i32) {
    %c0_i32 = arith.constant 0 : i32
    %c0_i32_0 = arith.constant 0 : i32
    %c0_i32_1 = arith.constant 0 : i32
    return %c0_i32, %c0_i32_0 : i32, i32
  }
  func.func @transform_31(%arg0: i32) -> (i32, i32) {
    %c0_i32 = arith.constant 0 : i32
    %c0_i32_0 = arith.constant 0 : i32
    %c0_i32_1 = arith.constant 0 : i32
    return %c0_i32, %c0_i32_0 : i32, i32
  }
  func.func @transform_32(%arg0: i32) -> (i32, i32) {
    %c0_i32 = arith.constant 0 : i32
    %c0_i32_0 = arith.constant 0 : i32
    %c0_i32_1 = arith.constant 0 : i32
    return %c0_i32, %c0_i32_0 : i32, i32
  }
  func.func @transform_33(%arg0: i32) -> (i32, i32) {
    %c0_i32 = arith.constant 0 : i32
    %c0_i32_0 = arith.constant 0 : i32
    %c0_i32_1 = arith.constant 0 : i32
    return %c0_i32, %c0_i32_0 : i32, i32
  }
  func.func @transform_34(%arg0: i32) -> (i32, i32) {
    %c0_i32 = arith.constant 0 : i32
    %c0_i32_0 = arith.constant 0 : i32
    %c0_i32_1 = arith.constant 0 : i32
    return %c0_i32, %c0_i32_0 : i32, i32
  }
  func.func @transform_35(%arg0: i32) -> (i32, i32) {
    %c0_i32 = arith.constant 0 : i32
    %c0_i32_0 = arith.constant 0 : i32
    %c0_i32_1 = arith.constant 0 : i32
    return %c0_i32, %c0_i32_0 : i32, i32
  }
  func.func @transform_36(%arg0: i32) -> (i32, i32) {
    %c0_i32 = arith.constant 0 : i32
    %c0_i32_0 = arith.constant 0 : i32
    %c0_i32_1 = arith.constant 0 : i32
    return %c0_i32, %c0_i32_0 : i32, i32
  }
  func.func @transform_37(%arg0: i32) -> (i32, i32) {
    %c0_i32 = arith.constant 0 : i32
    %c0_i32_0 = arith.constant 0 : i32
    %c0_i32_1 = arith.constant 0 : i32
    return %c0_i32, %c0_i32_0 : i32, i32
  }
  func.func @transform_38(%arg0: i32) -> (i32, i32) {
    %c0_i32 = arith.constant 0 : i32
    %c0_i32_0 = arith.constant 0 : i32
    %c0_i32_1 = arith.constant 0 : i32
    return %c0_i32, %c0_i32_0 : i32, i32
  }
  func.func @transform_39(%arg0: i32) -> (i32, i32) {
    %c0_i32 = arith.constant 0 : i32
    %c0_i32_0 = arith.constant 0 : i32
    %c0_i32_1 = arith.constant 0 : i32
    return %c0_i32, %c0_i32_0 : i32, i32
  }
  func.func @transform_40(%arg0: i32) -> (i32, i32) {
    %c0_i32 = arith.constant 0 : i32
    %c0_i32_0 = arith.constant 0 : i32
    %c0_i32_1 = arith.constant 0 : i32
    return %c0_i32, %c0_i32_0 : i32, i32
  }
  func.func @transform_41(%arg0: i32) -> (i32, i32) {
    %c0_i32 = arith.constant 0 : i32
    %c0_i32_0 = arith.constant 0 : i32
    %c0_i32_1 = arith.constant 0 : i32
    return %c0_i32, %c0_i32_0 : i32, i32
  }
  func.func @transform_42(%arg0: i32) -> (i32, i32) {
    %c0_i32 = arith.constant 0 : i32
    %c0_i32_0 = arith.constant 0 : i32
    %c0_i32_1 = arith.constant 0 : i32
    return %c0_i32, %c0_i32_0 : i32, i32
  }
  func.func @transform_43(%arg0: i32) -> (i32, i32) {
    %c0_i32 = arith.constant 0 : i32
    %c0_i32_0 = arith.constant 0 : i32
    %c0_i32_1 = arith.constant 0 : i32
    return %c0_i32, %c0_i32_0 : i32, i32
  }
  func.func @transform_44(%arg0: i32) -> (i32, i32) {
    %c0_i32 = arith.constant 0 : i32
    %c0_i32_0 = arith.constant 0 : i32
    return %arg0, %c0_i32 : i32, i32
  }
  func.func @transform_45(%arg0: i32) -> (i32, i32) {
    %c0_i32 = arith.constant 0 : i32
    %c0_i32_0 = arith.constant 0 : i32
    return %arg0, %c0_i32 : i32, i32
  }
  func.func @transform_46(%arg0: i32) -> (i32, i32) {
    %c0_i32 = arith.constant 0 : i32
    %c0_i32_0 = arith.constant 0 : i32
    return %arg0, %c0_i32 : i32, i32
  }
}

</mosaic_0001>

<bundles_post_ra>
// kernel: tpu_custom_call.1
= control target key start
LH: loop header
LB: loop body
LE: loop exit
PB: predicated region body
PF: predicated region fallthrough
CT: control target
= control target key end

     0   :  { %s4225_s6 = smov 1   ;;  %s4226_s10 = smov 2   ;;  %s4951_s0 = inlined_call_operand.smem [shape: u32[47], index: -1, kind: input, shape index: {}] }
   0x1   :  { %s4314_s5 = sld [smem:[%s4951_s0]]   ;;  %s4227_s14 = smov 3  }
   0x2   :  { %s4319_s9 = sld [smem:[%s4951_s0 + %s4225_s6]]   ;;  %s4228_s18 = smov 4  }
   0x3   :  { %s4324_s13 = sld [smem:[%s4951_s0 + %s4226_s10]]   ;;  %s4229_s22 = smov 5  }
   0x4   :  { %s4329_s17 = sld [smem:[%s4951_s0 + %s4227_s14]]   ;;  %s4230_s26 = smov 6  }
   0x5   :  { %s4334_s21 = sld [smem:[%s4951_s0 + %s4228_s18]]   ;;  %s4231_s30 = smov 7  }
   0x6   :  { %s4339_s25 = sld [smem:[%s4951_s0 + %s4229_s22]]   ;;  %s4232_s4 = smov 8  }
   0x7   :  { %4978 = sst [smem:[#allocation71_spill]] %s4314_s5  ;;  %s4233_s10 = smov 9  }
   0x8   :  { %s4344_s29 = sld [smem:[%s4951_s0 + %s4230_s26]]   ;;  %s4234_s15 = smov 10  }
   0x9   :  { %4979 = sst [smem:[#allocation72_spill]] %s4324_s13  ;;  %s4235_s20 = smov 11  }
   0xa   :  { %s4349_s3 = sld [smem:[%s4951_s0 + %s4231_s30]]   ;;  %s4236_s26 = smov 12  }
   0xb   :  { %4980 = sst [smem:[#allocation73_spill]] %s4334_s21  ;;  %s4237_s1 = smov 13  }
   0xc   :  { %s4354_s8 = sld [smem:[%s4951_s0 + %s4232_s4]]   ;;  %s4238_s7 = smov 14  }
   0xd   :  { %s4359_s14 = sld [smem:[%s4951_s0 + %s4233_s10]]   ;;  %s4240_s22 = smov 16  }
   0xe   :  { %4981 = sst [smem:[#allocation74_spill]] %s4344_s29  ;;  %s4241_s28 = smov 17  }
   0xf   :  { %s4364_s19 = sld [smem:[%s4951_s0 + %s4234_s15]]   ;;  %s4239_s15 = smov 15  }
  0x10   :  { %s4369_s24 = sld [smem:[%s4951_s0 + %s4235_s20]]  }
  0x11   :  { %s4374_s30 = sld [smem:[%s4951_s0 + %s4236_s26]]  }
  0x12   :  { %4982 = sst [smem:[#allocation75_spill]] %s4354_s8 }
  0x13   :  { %s4379_s6 = sld [smem:[%s4951_s0 + %s4237_s1]]  }
  0x14   :  { %s4384_s12 = sld [smem:[%s4951_s0 + %s4238_s7]]   ;;  %s4242_s7 = smov 18  }
  0x15   :  { %4983 = sst [smem:[#allocation76_spill]] %s4364_s19 }
  0x16   :  { %4984 = sst [smem:[#allocation77_spill]] %s4369_s24 }
  0x17   :  { %s4389_s20 = sld [smem:[%s4951_s0 + %s4239_s15]]   ;;  %s4243_s15 = smov 19  }
  0x18   :  { %s4394_s27 = sld [smem:[%s4951_s0 + %s4240_s22]]   ;;  %s4244_s22 = smov 20  }
  0x19   :  { %4985 = sst [smem:[#allocation78_spill]] %s4379_s6 }
  0x1a   :  { %4986 = sst [smem:[#allocation79_spill]] %s4384_s12 }
  0x1b   :  { %s4399_s4 = sld [smem:[%s4951_s0 + %s4241_s28]]   ;;  %s4245_s28 = smov 21  }
  0x1c   :  { %s4404_s6 = sld [smem:[%s4951_s0 + %s4242_s7]]   ;;  %s4246_s7 = smov 22  }
  0x1d   :  { %s4409_s19 = sld [smem:[%s4951_s0 + %s4243_s15]]   ;;  %s4247_s15 = smov 23  }
  0x1e   :  { %4987 = sst [smem:[#allocation80_spill]] %s4394_s27 }
  0x1f   :  { %s4414_s27 = sld [smem:[%s4951_s0 + %s4244_s22]]   ;;  %s4248_s22 = smov 24  }
  0x20   :  { %s4429_s12 = sld [smem:[%s4951_s0 + %s4247_s15]]   ;;  %s4251_s15 = smov 27  }
  0x21   :  { %4988 = sst [smem:[#allocation81_spill]] %s4399_s4 }
  0x22   :  { %4989 = sst [smem:[#allocation82_spill]] %s4404_s6 }
  0x23   :  { %s4419_s4 = sld [smem:[%s4951_s0 + %s4245_s28]]   ;;  %s4249_s28 = smov 25  }
  0x24   :  { %s4424_s6 = sld [smem:[%s4951_s0 + %s4246_s7]]   ;;  %s4250_s7 = smov 26  }
  0x25   :  { %4990 = sst [smem:[#allocation83_spill]] %s4414_s27 }
  0x26   :  { %4992 = sst [smem:[#allocation85_spill]] %s4429_s12 }
  0x27   :  { %s4434_s27 = sld [smem:[%s4951_s0 + %s4248_s22]]   ;;  %s4252_s22 = smov 28  }
  0x28   :  { %s4444_s24 = sld [smem:[%s4951_s0 + %s4250_s7]]   ;;  %s4254_s7 = smov 30  }
  0x29   :  { %4991 = sst [smem:[#allocation84_spill]] %s4419_s4 }
  0x2a   :  { %s4439_s4 = sld [smem:[%s4951_s0 + %s4249_s28]]   ;;  %s4253_s28 = smov 29  }
  0x2b   :  { %s4449_s12 = sld [smem:[%s4951_s0 + %s4251_s15]]   ;;  %s4255_s15 = smov 31  }
  0x2c   :  { %s4459_s8 = sld [smem:[%s4951_s0 + %s4253_s28]]   ;;  %s4257_s28 = smov 33  }
  0x2d   :  { %4993 = sst [smem:[#allocation86_spill]] %s4434_s27 }
  0x2e   :  { %4994 = sst [smem:[#allocation87_spill]] %s4444_s24 }
  0x2f   :  { %s4454_s27 = sld [smem:[%s4951_s0 + %s4252_s22]]   ;;  %s4256_s22 = smov 32  }
  0x30   :  { %s4464_s24 = sld [smem:[%s4951_s0 + %s4254_s7]]   ;;  %s4258_s7 = smov 34  }
  0x31   :  { %s4469_s29 = sld [smem:[%s4951_s0 + %s4255_s15]]   ;;  %s4259_s15 = smov 35  }
  0x32   :  { %4996 = sst [smem:[#allocation89_spill]] %s4459_s8 }
  0x33   :  { %s4479_s8 = sld [smem:[%s4951_s0 + %s4257_s28]]   ;;  %s4261_s28 = smov 37  }
  0x34   :  { %s4484_s21 = sld [smem:[%s4951_s0 + %s4258_s7]]   ;;  %s4262_s7 = smov 38  }
  0x35   :  { %4995 = sst [smem:[#allocation88_spill]] %s4454_s27 }
  0x36   :  { %s4474_s27 = sld [smem:[%s4951_s0 + %s4256_s22]]   ;;  %s4260_s22 = smov 36  }
  0x37   :  { %4997 = sst [smem:[#allocation90_spill]] %s4469_s29 }
  0x38   :  { %s4489_s29 = sld [smem:[%s4951_s0 + %s4259_s15]]   ;;  %s4263_s15 = smov 39  }
  0x39   :  { %s4499_s13 = sld [smem:[%s4951_s0 + %s4261_s28]]   ;;  %s4265_s28 = smov 41  }
  0x3a   :  { %4999 = sst [smem:[#allocation92_spill]] %s4484_s21 }
  0x3b   :  { %s4504_s21 = sld [smem:[%s4951_s0 + %s4262_s7]]   ;;  %s4266_s7 = smov 42  }
  0x3c   :  { %4998 = sst [smem:[#allocation91_spill]] %s4474_s27 }
  0x3d   :  { %s4494_s27 = sld [smem:[%s4951_s0 + %s4260_s22]]   ;;  %s4264_s22 = smov 40  }
  0x3e   :  { %s4509_s5 = sld [smem:[%s4951_s0 + %s4263_s15]]   ;;  %s4267_s15 = smov 43  }
  0x3f   :  { %5001 = sst [smem:[#allocation94_spill]] %s4499_s13 }
  0x40   :  { %s4519_s13 = sld [smem:[%s4951_s0 + %s4265_s28]]   ;;  %s4269_s28 = smov 45  }
  0x41   :  { %5002 = sst [smem:[#allocation95_spill]] %s4504_s21 }
  0x42   :  { %s4524_s21 = sld [smem:[%s4951_s0 + %s4266_s7]]   ;;  %s4270_s7 = smov 46  }
  0x43   :  { %5000 = sst [smem:[#allocation93_spill]] %s4494_s27 }
  0x44   :  { %5003 = sst [smem:[#allocation96_spill]] %s4509_s5 }
  0x45   :  { %s4514_s27 = sld [smem:[%s4951_s0 + %s4264_s22]]   ;;  %s4268_s22 = smov 44  }
  0x46   :  { %5005 = sst [smem:[#allocation98_spill]] %s4519_s13 }
  0x47   :  { %s4529_s5 = sld [smem:[%s4951_s0 + %s4267_s15]]  }
  0x48   :  { %5006 = sst [smem:[#allocation99_spill]] %s4524_s21 }
  0x49   :  { %s4539_s13 = sld [smem:[%s4951_s0 + %s4269_s28]]  }
  0x4a   :  { %s4544_s21 = sld [smem:[%s4951_s0 + %s4270_s7]]  }
  0x4b   :  { %5004 = sst [smem:[#allocation97_spill]] %s4514_s27 }
  0x4c   :  { %s4534_s27 = sld [smem:[%s4951_s0 + %s4268_s22]]  }
  0x4d   :  { %99 = vsyncpa [#allocation3], 0 }
  0x4e   :  { %100 = vsyncpa [#allocation6], 0 }
  0x4f   :  { %101 = vsyncpa [#allocation9], 0 }
  0x50   :  { %102 = vsyncpa [#allocation12], 0 }
  0x51   :  { %103 = vsyncpa [#allocation15], 0 }
  0x52   :  { %104 = vsyncpa [#allocation18], 0 }
  0x53   :  { %105 = vsyncpa [#allocation21], 0 }
  0x54   :  { %106 = vsyncpa [#allocation24], 0 }
  0x55   :  { %107 = vsyncpa [#allocation27], 0 }
  0x56   :  { %108 = vsyncpa [#allocation30], 0 }
  0x57   :  { %109 = vsyncpa [#allocation33], 0 }
  0x58   :  { %110 = vsyncpa [#allocation36], 0 }
  0x59   :  { %111 = vsyncpa [#allocation39], 0 }
  0x5a   :  { %112 = vsyncpa [#allocation42], 0 }
  0x5b   :  { %113 = vsyncpa [#allocation45], 0 }
  0x5c   :  { %114 = vsyncpa [#allocation48], 0 }
  0x5d   :  { %115 = vsyncpa [#allocation51], 0 }
  0x5e   :  { %116 = vsyncpa [#allocation4], 0  ;;  %s4271_s0 = smov [#allocation5]   ;;  %s4272_s16 = smov [#allocation8]  }
  0x5f   :  { %s134_s15 = sshll.u32 %s4271_s0, 4  ;;  %s157_s18 = sshll.u32 %s4272_s16, 4  ;;  %s135_s15 = int_to_ptr.vmem [resolvable:$true] %s134_s15  ;;  %s4546_s18 = int_to_ptr.vmem [resolvable:$true] %s157_s18 }
  0x60   :  { %s3463_s22 = scalar_lea.hbm %s4319_s9, 256 }
  0x61   :  { %p3464_p0 = scmp.ne.s32.totalorder %s4319_s9, %s3463_s22  ;;  %p3467_p1 = scmp.lt.u32.totalorder %s3463_s22, %s4319_s9 }
  0x63   :  { %p3469_p2 = pnand %p3467_p1, %p3464_p0 }
  0x65   :  { %3472 = shalt.err (!%p3469_p2)
}
  0x66   :  { %s3473_s23 = scalar_lea.vmem %s135_s15, 256  ;;  %p3478_p4 = scmp.lt.s32.totalorder %s135_s15, %s135_s15 }
  0x67   :  { %p3474_p3 = scmp.ne.s32.totalorder %s135_s15, %s3473_s23  ;;  %p3479_p5 = scmp.lt.s32.totalorder %s3473_s23, %s3473_s23 }
  0x69   :  { %p3480_p6 = por %p3479_p5, %p3478_p4 }
  0x6b   :  { %p3481_p7 = pnand %p3480_p6, %p3474_p3 }
  0x6d   :  { %3484 = shalt.err (!%p3481_p7)
}
  0x6e   :  { %s4273_s26 = smov 128   ;;  %s4274_s28 = smov 8  }
  0x6f   :  { %140 = dma.hbm_to_vmem [thread:$0]  %s4319_s9, 256, %s135_s15, [#allocation6], %s4273_s26, %s4273_s26, %s4274_s28  }
  0x70   :  { %s3485_s1 = scalar_lea.hbm %s4329_s17, 16 }
  0x71   :  { %p3486_p8 = scmp.ne.s32.totalorder %s4329_s17, %s3485_s1  ;;  %p3489_p9 = scmp.lt.u32.totalorder %s3485_s1, %s4329_s17 }
  0x73   :  { %p3491_p10 = pnand %p3489_p9, %p3486_p8 }
  0x75   :  { %3494 = shalt.err (!%p3491_p10)
}
  0x76   :  { %s3495_s2 = scalar_lea.vmem %s4546_s18, 16  ;;  %s3499_s7 = scalar_lea.vmem %s4546_s18, 32 }
  0x77   :  { %p3496_p11 = scmp.ne.s32.totalorder %s4546_s18, %s3495_s2  ;;  %p3500_p12 = scmp.lt.s32.totalorder %s4546_s18, %s4546_s18 }
  0x78   :  { %p3501_p13 = scmp.lt.s32.totalorder %s3499_s7, %s3495_s2 }
  0x7a   :  { %p3502_p0 = por %p3501_p13, %p3500_p12 }
  0x7c   :  { %p3503_p1 = pnand %p3502_p0, %p3496_p11 }
  0x7e   :  { %3506 = shalt.err (!%p3503_p1)
}
  0x7f   :  { %160 = dma.hbm_to_vmem [thread:$0]  %s4329_s17, 16, %s4546_s18, [#allocation9]  }
  0x80   :  { %s4275_s9 = smov [#allocation11]   ;;  %s4276_s11 = smov [#allocation14]  }
  0x81   :  { %s179_s10 = sshll.u32 %s4275_s9, 4  ;;  %s198_s0 = sshll.u32 %s4276_s11, 4  ;;  %s180_s10 = int_to_ptr.vmem [resolvable:$true] %s179_s10  ;;  %s4565_s0 = int_to_ptr.vmem [resolvable:$true] %s198_s0 }
  0x82   :  { %s3507_s15 = scalar_lea.hbm %s4339_s25, 16 }
  0x83   :  { %p3508_p2 = scmp.ne.s32.totalorder %s4339_s25, %s3507_s15  ;;  %p3511_p3 = scmp.lt.u32.totalorder %s3507_s15, %s4339_s25 }
  0x85   :  { %p3513_p4 = pnand %p3511_p3, %p3508_p2 }
  0x87   :  { %3516 = shalt.err (!%p3513_p4)
}
  0x88   :  { %s3517_s16 = scalar_lea.vmem %s180_s10, 16  ;;  %s3521_s22 = scalar_lea.vmem %s180_s10, 32 }
  0x89   :  { %p3518_p5 = scmp.ne.s32.totalorder %s180_s10, %s3517_s16  ;;  %p3522_p6 = scmp.lt.s32.totalorder %s180_s10, %s180_s10 }
  0x8a   :  { %p3523_p7 = scmp.lt.s32.totalorder %s3521_s22, %s3517_s16 }
  0x8c   :  { %p3524_p8 = por %p3523_p7, %p3522_p6 }
  0x8e   :  { %p3525_p9 = pnand %p3524_p8, %p3518_p5 }
  0x90   :  { %3528 = shalt.err (!%p3525_p9)
}
  0x91   :  { %182 = dma.hbm_to_vmem [thread:$0]  %s4339_s25, 16, %s180_s10, [#allocation12]  }
  0x92   :  { %s3529_s17 = scalar_lea.hbm %s4349_s3, 512 }
  0x93   :  { %p3530_p10 = scmp.ne.s32.totalorder %s4349_s3, %s3529_s17  ;;  %p3533_p11 = scmp.lt.u32.totalorder %s3529_s17, %s4349_s3 }
  0x95   :  { %p3535_p12 = pnand %p3533_p11, %p3530_p10 }
  0x97   :  { %3538 = shalt.err (!%p3535_p12)
}
  0x98   :  { %s3539_s18 = scalar_lea.vmem %s4565_s0, 512  ;;  %p3544_p0 = scmp.lt.s32.totalorder %s4565_s0, %s4565_s0 }
  0x99   :  { %p3540_p13 = scmp.ne.s32.totalorder %s4565_s0, %s3539_s18  ;;  %p3545_p1 = scmp.lt.s32.totalorder %s3539_s18, %s3539_s18 }
  0x9b   :  { %p3546_p2 = por %p3545_p1, %p3544_p0 }
  0x9d   :  { %p3547_p3 = pnand %p3546_p2, %p3540_p13 }
  0x9f   :  { %3550 = shalt.err (!%p3547_p3)
}
  0xa0   :  { %204 = dma.hbm_to_vmem [thread:$0]  %s4349_s3, 512, %s4565_s0, [#allocation15], %s4273_s26, %s4273_s26, %s4274_s28  }
  0xa1   :  { %s4277_s25 = smov [#allocation17]   ;;  %s4278_s1 = smov [#allocation20]  }
  0xa2   :  { %s221_s23 = sshll.u32 %s4277_s25, 4  ;;  %s243_s2 = sshll.u32 %s4278_s1, 4  ;;  %s222_s23 = int_to_ptr.vmem [resolvable:$true] %s221_s23  ;;  %s244_s2 = int_to_ptr.vmem [resolvable:$true] %s243_s2 }
  0xa3   :  { %s3551_s7 = scalar_lea.hbm %s4359_s14, 16 }
  0xa4   :  { %p3552_p4 = scmp.ne.s32.totalorder %s4359_s14, %s3551_s7  ;;  %p3555_p5 = scmp.lt.u32.totalorder %s3551_s7, %s4359_s14 }
  0xa6   :  { %p3557_p6 = pnand %p3555_p5, %p3552_p4 }
  0xa8   :  { %3560 = shalt.err (!%p3557_p6)
}
  0xa9   :  { %s3561_s9 = scalar_lea.vmem %s222_s23, 16  ;;  %s3565_s10 = scalar_lea.vmem %s222_s23, 32 }
  0xaa   :  { %p3562_p7 = scmp.ne.s32.totalorder %s222_s23, %s3561_s9  ;;  %p3566_p8 = scmp.lt.s32.totalorder %s222_s23, %s222_s23 }
  0xab   :  { %p3567_p9 = scmp.lt.s32.totalorder %s3565_s10, %s3561_s9 }
  0xad   :  { %p3568_p10 = por %p3567_p9, %p3566_p8 }
  0xaf   :  { %p3569_p11 = pnand %p3568_p10, %p3562_p7 }
  0xb1   :  { %3572 = shalt.err (!%p3569_p11)
}
  0xb2   :  { %224 = dma.hbm_to_vmem [thread:$0]  %s4359_s14, 16, %s222_s23, [#allocation18]  }
  0xb3   :  { %s3573_s3 = scalar_lea.hbm %s4374_s30, 16 }
  0xb4   :  { %p3574_p12 = scmp.ne.s32.totalorder %s4374_s30, %s3573_s3  ;;  %p3577_p13 = scmp.lt.u32.totalorder %s3573_s3, %s4374_s30 }
  0xb6   :  { %p3579_p0 = pnand %p3577_p13, %p3574_p12 }
  0xb8   :  { %3582 = shalt.err (!%p3579_p0)
}
  0xb9   :  { %s3583_s11 = scalar_lea.vmem %s244_s2, 16  ;;  %s3587_s0 = scalar_lea.vmem %s244_s2, 32 }
  0xba   :  { %p3584_p1 = scmp.ne.s32.totalorder %s244_s2, %s3583_s11  ;;  %p3588_p2 = scmp.lt.s32.totalorder %s244_s2, %s244_s2 }
  0xbb   :  { %p3589_p3 = scmp.lt.s32.totalorder %s3587_s0, %s3583_s11 }
  0xbd   :  { %p3590_p4 = por %p3589_p3, %p3588_p2 }
  0xbf   :  { %p3591_p5 = pnand %p3590_p4, %p3584_p1 }
  0xc1   :  { %3594 = shalt.err (!%p3591_p5)
}
  0xc2   :  { %246 = dma.hbm_to_vmem [thread:$0]  %s4374_s30, 16, %s244_s2, [#allocation21]  }
  0xc3   :  { %s4279_s15 = smov [#allocation23]   ;;  %s4280_s16 = smov [#allocation26]  }
  0xc4   :  { %s265_s14 = sshll.u32 %s4279_s15, 4  ;;  %s289_s22 = sshll.u32 %s4280_s16, 4  ;;  %s266_s14 = int_to_ptr.vmem [resolvable:$true] %s265_s14  ;;  %s290_s22 = int_to_ptr.vmem [resolvable:$true] %s289_s22 }
  0xc5   :  { %s3595_s17 = scalar_lea.hbm %s4389_s20, 16 }
  0xc6   :  { %p3596_p6 = scmp.ne.s32.totalorder %s4389_s20, %s3595_s17  ;;  %p3599_p7 = scmp.lt.u32.totalorder %s3595_s17, %s4389_s20 }
  0xc8   :  { %p3601_p8 = pnand %p3599_p7, %p3596_p6 }
  0xca   :  { %3604 = shalt.err (!%p3601_p8)
}
  0xcb   :  { %s3605_s18 = scalar_lea.vmem %s266_s14, 16  ;;  %s3609_s25 = scalar_lea.vmem %s266_s14, 32 }
  0xcc   :  { %p3606_p9 = scmp.ne.s32.totalorder %s266_s14, %s3605_s18  ;;  %p3610_p10 = scmp.lt.s32.totalorder %s266_s14, %s266_s14 }
  0xcd   :  { %p3611_p11 = scmp.lt.s32.totalorder %s3609_s25, %s3605_s18 }
  0xcf   :  { %p3612_p12 = por %p3611_p11, %p3610_p10 }
  0xd1   :  { %p3613_p13 = pnand %p3612_p12, %p3606_p9 }
  0xd3   :  { %3616 = shalt.err (!%p3613_p13)
}
  0xd4   :  { %268 = dma.hbm_to_vmem [thread:$0]  %s4389_s20, 16, %s266_s14, [#allocation24]  }
  0xd5   :  { %s3617_s30 = scalar_lea.hbm %s4409_s19, 16 }
  0xd6   :  { %p3618_p0 = scmp.ne.s32.totalorder %s4409_s19, %s3617_s30  ;;  %p3621_p1 = scmp.lt.u32.totalorder %s3617_s30, %s4409_s19 }
  0xd8   :  { %p3623_p2 = pnand %p3621_p1, %p3618_p0 }
  0xda   :  { %3626 = shalt.err (!%p3623_p2)
}
  0xdb   :  { %s3627_s23 = scalar_lea.vmem %s290_s22, 16  ;;  %s3631_s1 = scalar_lea.vmem %s290_s22, 32 }
  0xdc   :  { %p3628_p3 = scmp.ne.s32.totalorder %s290_s22, %s3627_s23  ;;  %p3632_p4 = scmp.lt.s32.totalorder %s290_s22, %s290_s22 }
  0xdd   :  { %p3633_p5 = scmp.lt.s32.totalorder %s3631_s1, %s3627_s23 }
  0xdf   :  { %p3634_p6 = por %p3633_p5, %p3632_p4 }
  0xe1   :  { %p3635_p7 = pnand %p3634_p6, %p3628_p3 }
  0xe3   :  { %3638 = shalt.err (!%p3635_p7)
}
  0xe4   :  { %292 = dma.hbm_to_vmem [thread:$0]  %s4409_s19, 16, %s290_s22, [#allocation27]  }
  0xe5   :  { %s4281_s2 = smov [#allocation29]   ;;  %s4282_s7 = smov [#allocation32]  }
  0xe6   :  { %s311_s20 = sshll.u32 %s4281_s2, 4  ;;  %s333_s9 = sshll.u32 %s4282_s7, 4  ;;  %s312_s20 = int_to_ptr.vmem [resolvable:$true] %s311_s20  ;;  %s334_s9 = int_to_ptr.vmem [resolvable:$true] %s333_s9 }
  0xe7   :  { %s3639_s10 = scalar_lea.hbm %s4424_s6, 16 }
  0xe8   :  { %p3640_p8 = scmp.ne.s32.totalorder %s4424_s6, %s3639_s10  ;;  %p3643_p9 = scmp.lt.u32.totalorder %s3639_s10, %s4424_s6 }
  0xea   :  { %p3645_p10 = pnand %p3643_p9, %p3640_p8 }
  0xec   :  { %3648 = shalt.err (!%p3645_p10)
}
  0xed   :  { %s3649_s3 = scalar_lea.vmem %s312_s20, 16  ;;  %s3653_s11 = scalar_lea.vmem %s312_s20, 32 }
  0xee   :  { %p3650_p11 = scmp.ne.s32.totalorder %s312_s20, %s3649_s3  ;;  %p3654_p12 = scmp.lt.s32.totalorder %s312_s20, %s312_s20 }
  0xef   :  { %p3655_p13 = scmp.lt.s32.totalorder %s3653_s11, %s3649_s3 }
  0xf1   :  { %p3656_p0 = por %p3655_p13, %p3654_p12 }
  0xf3   :  { %p3657_p1 = pnand %p3656_p0, %p3650_p11 }
  0xf5   :  { %3660 = shalt.err (!%p3657_p1)
}
  0xf6   :  { %314 = dma.hbm_to_vmem [thread:$0]  %s4424_s6, 16, %s312_s20, [#allocation30]  }
  0xf7   :  { %s3661_s19 = scalar_lea.hbm %s4439_s4, 16 }
  0xf8   :  { %p3662_p2 = scmp.ne.s32.totalorder %s4439_s4, %s3661_s19  ;;  %p3665_p3 = scmp.lt.u32.totalorder %s3661_s19, %s4439_s4 }
  0xfa   :  { %p3667_p4 = pnand %p3665_p3, %p3662_p2 }
  0xfc   :  { %3670 = shalt.err (!%p3667_p4)
}
  0xfd   :  { %s3671_s0 = scalar_lea.vmem %s334_s9, 16  ;;  %s3675_s15 = scalar_lea.vmem %s334_s9, 32 }
  0xfe   :  { %p3672_p5 = scmp.ne.s32.totalorder %s334_s9, %s3671_s0  ;;  %p3676_p6 = scmp.lt.s32.totalorder %s334_s9, %s334_s9 }
  0xff   :  { %p3677_p7 = scmp.lt.s32.totalorder %s3675_s15, %s3671_s0 }
 0x101   :  { %p3678_p8 = por %p3677_p7, %p3676_p6 }
 0x103   :  { %p3679_p9 = pnand %p3678_p8, %p3672_p5 }
 0x105   :  { %3682 = shalt.err (!%p3679_p9)
}
 0x106   :  { %336 = dma.hbm_to_vmem [thread:$0]  %s4439_s4, 16, %s334_s9, [#allocation33]  }
 0x107   :  { %s4283_s14 = smov [#allocation35]   ;;  %s4284_s16 = smov [#allocation38]  }
 0x108   :  { %s355_s6 = sshll.u32 %s4283_s14, 4  ;;  %s377_s22 = sshll.u32 %s4284_s16, 4  ;;  %s356_s6 = int_to_ptr.vmem [resolvable:$true] %s355_s6  ;;  %s378_s22 = int_to_ptr.vmem [resolvable:$true] %s377_s22 }
 0x109   :  { %s3683_s17 = scalar_lea.hbm %s4449_s12, 16 }
 0x10a   :  { %p3684_p10 = scmp.ne.s32.totalorder %s4449_s12, %s3683_s17  ;;  %p3687_p11 = scmp.lt.u32.totalorder %s3683_s17, %s4449_s12 }
 0x10c   :  { %p3689_p12 = pnand %p3687_p11, %p3684_p10 }
 0x10e   :  { %3692 = shalt.err (!%p3689_p12)
}
 0x10f   :  { %s3693_s18 = scalar_lea.vmem %s356_s6, 16  ;;  %s3697_s25 = scalar_lea.vmem %s356_s6, 32 }
 0x110   :  { %p3694_p13 = scmp.ne.s32.totalorder %s356_s6, %s3693_s18  ;;  %p3698_p0 = scmp.lt.s32.totalorder %s356_s6, %s356_s6 }
 0x111   :  { %p3699_p1 = scmp.lt.s32.totalorder %s3697_s25, %s3693_s18 }
 0x113   :  { %p3700_p2 = por %p3699_p1, %p3698_p0 }
 0x115   :  { %p3701_p3 = pnand %p3700_p2, %p3694_p13 }
 0x117   :  { %3704 = shalt.err (!%p3701_p3)
}
 0x118   :  { %358 = dma.hbm_to_vmem [thread:$0]  %s4449_s12, 16, %s356_s6, [#allocation36]  }
 0x119   :  { %s3705_s4 = scalar_lea.hbm %s4464_s24, 16 }
 0x11a   :  { %p3706_p4 = scmp.ne.s32.totalorder %s4464_s24, %s3705_s4  ;;  %p3709_p5 = scmp.lt.u32.totalorder %s3705_s4, %s4464_s24 }
 0x11c   :  { %p3711_p6 = pnand %p3709_p5, %p3706_p4 }
 0x11e   :  { %3714 = shalt.err (!%p3711_p6)
}
 0x11f   :  { %s3715_s30 = scalar_lea.vmem %s378_s22, 16  ;;  %s3719_s23 = scalar_lea.vmem %s378_s22, 32 }
 0x120   :  { %p3716_p7 = scmp.ne.s32.totalorder %s378_s22, %s3715_s30  ;;  %p3720_p8 = scmp.lt.s32.totalorder %s378_s22, %s378_s22 }
 0x121   :  { %p3721_p9 = scmp.lt.s32.totalorder %s3719_s23, %s3715_s30 }
 0x123   :  { %p3722_p10 = por %p3721_p9, %p3720_p8 }
 0x125   :  { %p3723_p11 = pnand %p3722_p10, %p3716_p7 }
 0x127   :  { %3726 = shalt.err (!%p3723_p11)
}
 0x128   :  { %380 = dma.hbm_to_vmem [thread:$0]  %s4464_s24, 16, %s378_s22, [#allocation39]  }
 0x129   :  { %s4285_s1 = smov [#allocation41]   ;;  %s4286_s2 = smov [#allocation44]  }
 0x12a   :  { %s399_s12 = sshll.u32 %s4285_s1, 4  ;;  %s419_s20 = sshll.u32 %s4286_s2, 4  ;;  %s400_s12 = int_to_ptr.vmem [resolvable:$true] %s399_s12  ;;  %s420_s20 = int_to_ptr.vmem [resolvable:$true] %s419_s20 }
 0x12b   :  { %s3727_s7 = scalar_lea.hbm %s4479_s8, 16 }
 0x12c   :  { %p3728_p12 = scmp.ne.s32.totalorder %s4479_s8, %s3727_s7  ;;  %p3731_p13 = scmp.lt.u32.totalorder %s3727_s7, %s4479_s8 }
 0x12e   :  { %p3733_p0 = pnand %p3731_p13, %p3728_p12 }
 0x130   :  { %3736 = shalt.err (!%p3733_p0)
}
 0x131   :  { %s3737_s9 = scalar_lea.vmem %s400_s12, 16  ;;  %s3741_s10 = scalar_lea.vmem %s400_s12, 32 }
 0x132   :  { %p3738_p1 = scmp.ne.s32.totalorder %s400_s12, %s3737_s9  ;;  %p3742_p2 = scmp.lt.s32.totalorder %s400_s12, %s400_s12 }
 0x133   :  { %p3743_p3 = scmp.lt.s32.totalorder %s3741_s10, %s3737_s9 }
 0x135   :  { %p3744_p4 = por %p3743_p3, %p3742_p2 }
 0x137   :  { %p3745_p5 = pnand %p3744_p4, %p3738_p1 }
 0x139   :  { %3748 = shalt.err (!%p3745_p5)
}
 0x13a   :  { %402 = dma.hbm_to_vmem [thread:$0]  %s4479_s8, 16, %s400_s12, [#allocation42]  }
 0x13b   :  { %s3749_s24 = scalar_lea.hbm %s4489_s29, 16 }
 0x13c   :  { %p3750_p6 = scmp.ne.s32.totalorder %s4489_s29, %s3749_s24  ;;  %p3753_p7 = scmp.lt.u32.totalorder %s3749_s24, %s4489_s29 }
 0x13e   :  { %p3755_p8 = pnand %p3753_p7, %p3750_p6 }
 0x140   :  { %3758 = shalt.err (!%p3755_p8)
}
 0x141   :  { %s3759_s3 = scalar_lea.vmem %s420_s20, 16  ;;  %s3763_s11 = scalar_lea.vmem %s420_s20, 32 }
 0x142   :  { %p3760_p9 = scmp.ne.s32.totalorder %s420_s20, %s3759_s3  ;;  %p3764_p10 = scmp.lt.s32.totalorder %s420_s20, %s420_s20 }
 0x143   :  { %p3765_p11 = scmp.lt.s32.totalorder %s3763_s11, %s3759_s3 }
 0x145   :  { %p3766_p12 = por %p3765_p11, %p3764_p10 }
 0x147   :  { %p3767_p13 = pnand %p3766_p12, %p3760_p9 }
 0x149   :  { %3770 = shalt.err (!%p3767_p13)
}
 0x14a   :  { %s5007_s19 = sld [smem:[#allocation98_spill]]  ;;  %s4287_s0 = smov [#allocation47]  }
 0x14b   :  { %422 = dma.hbm_to_vmem [thread:$0]  %s4489_s29, 16, %s420_s20, [#allocation45]  }
 0x14c   :  { %s446_s8 = sshll.u32 %s4287_s0, 4  ;;  %s4288_s15 = smov [#allocation2]   ;;  %s447_s8 = int_to_ptr.vmem [resolvable:$true] %s446_s8 }
 0x14d   :  { %s122_s14 = sshll.u32 %s4288_s15, 4  ;;  %s4623_s14 = int_to_ptr.vmem [resolvable:$true] %s122_s14 }
 0x150   :  { %s3771_s6 = scalar_lea.hbm %s5007_s19, 512 }
 0x151   :  { %p3772_p0 = scmp.ne.s32.totalorder %s5007_s19, %s3771_s6  ;;  %p3775_p1 = scmp.lt.u32.totalorder %s3771_s6, %s5007_s19 }
 0x153   :  { %p3777_p2 = pnand %p3775_p1, %p3772_p0 }
 0x155   :  { %3780 = shalt.err (!%p3777_p2)
}
 0x156   :  { %s3781_s16 = scalar_lea.vmem %s447_s8, 512  ;;  %p3786_p4 = scmp.lt.s32.totalorder %s447_s8, %s447_s8 }
 0x157   :  { %p3782_p3 = scmp.ne.s32.totalorder %s447_s8, %s3781_s16  ;;  %p3787_p5 = scmp.lt.s32.totalorder %s3781_s16, %s3781_s16 }
 0x159   :  { %p3788_p6 = por %p3787_p5, %p3786_p4 }
 0x15b   :  { %p3789_p7 = pnand %p3788_p6, %p3782_p3 }
 0x15d   :  { %3792 = shalt.err (!%p3789_p7)
}
 0x15e   :  { %s5008_s29 = sld [smem:[#allocation71_spill]] }
 0x15f   :  { %452 = dma.hbm_to_vmem [thread:$0]  %s5007_s19, 512, %s447_s8, [#allocation48], %s4273_s26, %s4273_s26, %s4274_s28  }
 0x164   :  { %s3793_s22 = scalar_lea.hbm %s5008_s29, 256 }
 0x165   :  { %p3794_p8 = scmp.ne.s32.totalorder %s5008_s29, %s3793_s22  ;;  %p3797_p9 = scmp.lt.u32.totalorder %s3793_s22, %s5008_s29 }
 0x167   :  { %p3799_p10 = pnand %p3797_p9, %p3794_p8 }
 0x169   :  { %3802 = shalt.err (!%p3799_p10)
}
 0x16a   :  { %s3803_s17 = scalar_lea.vmem %s4623_s14, 256  ;;  %p3808_p12 = scmp.lt.s32.totalorder %s4623_s14, %s4623_s14 }
 0x16b   :  { %p3804_p11 = scmp.ne.s32.totalorder %s4623_s14, %s3803_s17  ;;  %p3809_p13 = scmp.lt.s32.totalorder %s3803_s17, %s3803_s17 }
 0x16d   :  { %p3810_p0 = por %p3809_p13, %p3808_p12 }
 0x16f   :  { %p3811_p1 = pnand %p3810_p0, %p3804_p11 }
 0x171   :  { %3814 = shalt.err (!%p3811_p1)
}
 0x172   :  { %s5009_s18 = sld [smem:[#allocation72_spill]]  ;;  %s4289_s25 = smov [#allocation7]  }
 0x173   :  { %128 = dma.hbm_to_vmem [thread:$0]  %s5008_s29, 256, %s4623_s14, [#allocation3], %s4273_s26, %s4273_s26, %s4274_s28  }
 0x174   :  { %s147_s4 = sshll.u32 %s4289_s25, 4  ;;  %s4290_s30 = smov [#allocation10]   ;;  %s148_s4 = int_to_ptr.vmem [resolvable:$true] %s147_s4 }
 0x175   :  { %s166_s23 = sshll.u32 %s4290_s30, 4  ;;  %s4644_s23 = int_to_ptr.vmem [resolvable:$true] %s166_s23 }
 0x178   :  { %s3815_s1 = scalar_lea.hbm %s5009_s18, 16 }
 0x179   :  { %p3816_p2 = scmp.ne.s32.totalorder %s5009_s18, %s3815_s1  ;;  %p3819_p3 = scmp.lt.u32.totalorder %s3815_s1, %s5009_s18 }
 0x17b   :  { %p3821_p4 = pnand %p3819_p3, %p3816_p2 }
 0x17d   :  { %3824 = shalt.err (!%p3821_p4)
}
 0x17e   :  { %s3825_s12 = scalar_lea.vmem %s148_s4, 16  ;;  %s3829_s2 = scalar_lea.vmem %s148_s4, 32 }
 0x17f   :  { %p3826_p5 = scmp.ne.s32.totalorder %s148_s4, %s3825_s12  ;;  %p3830_p6 = scmp.lt.s32.totalorder %s148_s4, %s148_s4 }
 0x180   :  { %p3831_p7 = scmp.lt.s32.totalorder %s3829_s2, %s3825_s12 }
 0x182   :  { %p3832_p8 = por %p3831_p7, %p3830_p6 }
 0x184   :  { %p3833_p9 = pnand %p3832_p8, %p3826_p5 }
 0x186   :  { %3836 = shalt.err (!%p3833_p9)
}
 0x187   :  { %s5010_s20 = sld [smem:[#allocation73_spill]] }
 0x188   :  { %150 = dma.hbm_to_vmem [thread:$0]  %s5009_s18, 16, %s148_s4, [#allocation6]  }
 0x18d   :  { %s3837_s7 = scalar_lea.hbm %s5010_s20, 512 }
 0x18e   :  { %p3838_p10 = scmp.ne.s32.totalorder %s5010_s20, %s3837_s7  ;;  %p3841_p11 = scmp.lt.u32.totalorder %s3837_s7, %s5010_s20 }
 0x190   :  { %p3843_p12 = pnand %p3841_p11, %p3838_p10 }
 0x192   :  { %3846 = shalt.err (!%p3843_p12)
}
 0x193   :  { %s3847_s9 = scalar_lea.vmem %s4644_s23, 512  ;;  %p3852_p0 = scmp.lt.s32.totalorder %s4644_s23, %s4644_s23 }
 0x194   :  { %p3848_p13 = scmp.ne.s32.totalorder %s4644_s23, %s3847_s9  ;;  %p3853_p1 = scmp.lt.s32.totalorder %s3847_s9, %s3847_s9 }
 0x196   :  { %p3854_p2 = por %p3853_p1, %p3852_p0 }
 0x198   :  { %p3855_p3 = pnand %p3854_p2, %p3848_p13 }
 0x19a   :  { %3858 = shalt.err (!%p3855_p3)
}
 0x19b   :  { %s5011_s10 = sld [smem:[#allocation74_spill]]  ;;  %s4291_s24 = smov [#allocation13]  }
 0x19c   :  { %172 = dma.hbm_to_vmem [thread:$0]  %s5010_s20, 512, %s4644_s23, [#allocation9], %s4273_s26, %s4273_s26, %s4274_s28  }
 0x19d   :  { %s189_s3 = sshll.u32 %s4291_s24, 4  ;;  %s4292_s11 = smov [#allocation16]   ;;  %s190_s3 = int_to_ptr.vmem [resolvable:$true] %s189_s3 }
 0x19e   :  { %s211_s19 = sshll.u32 %s4292_s11, 4  ;;  %s212_s19 = int_to_ptr.vmem [resolvable:$true] %s211_s19 }
 0x1a1   :  { %s3859_s0 = scalar_lea.hbm %s5011_s10, 16 }
 0x1a2   :  { %p3860_p4 = scmp.ne.s32.totalorder %s5011_s10, %s3859_s0  ;;  %p3863_p5 = scmp.lt.u32.totalorder %s3859_s0, %s5011_s10 }
 0x1a4   :  { %p3865_p6 = pnand %p3863_p5, %p3860_p4 }
 0x1a6   :  { %3868 = shalt.err (!%p3865_p6)
}
 0x1a7   :  { %s3869_s8 = scalar_lea.vmem %s190_s3, 16  ;;  %s3873_s15 = scalar_lea.vmem %s190_s3, 32 }
 0x1a8   :  { %p3870_p7 = scmp.ne.s32.totalorder %s190_s3, %s3869_s8  ;;  %p3874_p8 = scmp.lt.s32.totalorder %s190_s3, %s190_s3 }
 0x1a9   :  { %p3875_p9 = scmp.lt.s32.totalorder %s3873_s15, %s3869_s8 }
 0x1ab   :  { %p3876_p10 = por %p3875_p9, %p3874_p8 }
 0x1ad   :  { %p3877_p11 = pnand %p3876_p10, %p3870_p7 }
 0x1af   :  { %3880 = shalt.err (!%p3877_p11)
}
 0x1b0   :  { %s5012_s14 = sld [smem:[#allocation75_spill]] }
 0x1b1   :  { %192 = dma.hbm_to_vmem [thread:$0]  %s5011_s10, 16, %s190_s3, [#allocation12]  }
 0x1b6   :  { %s3881_s6 = scalar_lea.hbm %s5012_s14, 16 }
 0x1b7   :  { %p3882_p12 = scmp.ne.s32.totalorder %s5012_s14, %s3881_s6  ;;  %p3885_p13 = scmp.lt.u32.totalorder %s3881_s6, %s5012_s14 }
 0x1b9   :  { %p3887_p0 = pnand %p3885_p13, %p3882_p12 }
 0x1bb   :  { %3890 = shalt.err (!%p3887_p0)
}
 0x1bc   :  { %s3891_s16 = scalar_lea.vmem %s212_s19, 16  ;;  %s3895_s29 = scalar_lea.vmem %s212_s19, 32 }
 0x1bd   :  { %p3892_p1 = scmp.ne.s32.totalorder %s212_s19, %s3891_s16  ;;  %p3896_p2 = scmp.lt.s32.totalorder %s212_s19, %s212_s19 }
 0x1be   :  { %p3897_p3 = scmp.lt.s32.totalorder %s3895_s29, %s3891_s16 }
 0x1c0   :  { %p3898_p4 = por %p3897_p3, %p3896_p2 }
 0x1c2   :  { %p3899_p5 = pnand %p3898_p4, %p3892_p1 }
 0x1c4   :  { %3902 = shalt.err (!%p3899_p5)
}
 0x1c5   :  { %s5013_s22 = sld [smem:[#allocation77_spill]]  ;;  %s4293_s17 = smov [#allocation19]  }
 0x1c6   :  { %214 = dma.hbm_to_vmem [thread:$0]  %s5012_s14, 16, %s212_s19, [#allocation15]  }
 0x1c7   :  { %s233_s18 = sshll.u32 %s4293_s17, 4  ;;  %s4294_s25 = smov [#allocation22]   ;;  %s234_s18 = int_to_ptr.vmem [resolvable:$true] %s233_s18 }
 0x1c8   :  { %s255_s4 = sshll.u32 %s4294_s25, 4  ;;  %s256_s4 = int_to_ptr.vmem [resolvable:$true] %s255_s4 }
 0x1cb   :  { %s3903_s30 = scalar_lea.hbm %s5013_s22, 16 }
 0x1cc   :  { %p3904_p6 = scmp.ne.s32.totalorder %s5013_s22, %s3903_s30  ;;  %p3907_p7 = scmp.lt.u32.totalorder %s3903_s30, %s5013_s22 }
 0x1ce   :  { %p3909_p8 = pnand %p3907_p7, %p3904_p6 }
 0x1d0   :  { %3912 = shalt.err (!%p3909_p8)
}
 0x1d1   :  { %s3913_s23 = scalar_lea.vmem %s234_s18, 16  ;;  %s3917_s1 = scalar_lea.vmem %s234_s18, 32 }
 0x1d2   :  { %p3914_p9 = scmp.ne.s32.totalorder %s234_s18, %s3913_s23  ;;  %p3918_p10 = scmp.lt.s32.totalorder %s234_s18, %s234_s18 }
 0x1d3   :  { %p3919_p11 = scmp.lt.s32.totalorder %s3917_s1, %s3913_s23 }
 0x1d5   :  { %p3920_p12 = por %p3919_p11, %p3918_p10 }
 0x1d7   :  { %p3921_p13 = pnand %p3920_p12, %p3914_p9 }
 0x1d9   :  { %3924 = shalt.err (!%p3921_p13)
}
 0x1da   :  { %s5014_s12 = sld [smem:[#allocation79_spill]] }
 0x1db   :  { %236 = dma.hbm_to_vmem [thread:$0]  %s5013_s22, 16, %s234_s18, [#allocation18]  }
 0x1e0   :  { %s3925_s2 = scalar_lea.hbm %s5014_s12, 16 }
 0x1e1   :  { %p3926_p0 = scmp.ne.s32.totalorder %s5014_s12, %s3925_s2  ;;  %p3929_p1 = scmp.lt.u32.totalorder %s3925_s2, %s5014_s12 }
 0x1e3   :  { %p3931_p2 = pnand %p3929_p1, %p3926_p0 }
 0x1e5   :  { %3934 = shalt.err (!%p3931_p2)
}
 0x1e6   :  { %s3935_s20 = scalar_lea.vmem %s256_s4, 16  ;;  %s3939_s7 = scalar_lea.vmem %s256_s4, 32 }
 0x1e7   :  { %p3936_p3 = scmp.ne.s32.totalorder %s256_s4, %s3935_s20  ;;  %p3940_p4 = scmp.lt.s32.totalorder %s256_s4, %s256_s4 }
 0x1e8   :  { %p3941_p5 = scmp.lt.s32.totalorder %s3939_s7, %s3935_s20 }
 0x1ea   :  { %p3942_p6 = por %p3941_p5, %p3940_p4 }
 0x1ec   :  { %p3943_p7 = pnand %p3942_p6, %p3936_p3 }
 0x1ee   :  { %3946 = shalt.err (!%p3943_p7)
}
 0x1ef   :  { %s5015_s9 = sld [smem:[#allocation81_spill]]  ;;  %s4295_s10 = smov [#allocation25]  }
 0x1f0   :  { %258 = dma.hbm_to_vmem [thread:$0]  %s5014_s12, 16, %s256_s4, [#allocation21]  }
 0x1f1   :  { %s277_s24 = sshll.u32 %s4295_s10, 4  ;;  %s4296_s3 = smov [#allocation28]   ;;  %s278_s24 = int_to_ptr.vmem [resolvable:$true] %s277_s24 }
 0x1f2   :  { %s299_s11 = sshll.u32 %s4296_s3, 4  ;;  %s300_s11 = int_to_ptr.vmem [resolvable:$true] %s299_s11 }
 0x1f5   :  { %s3947_s19 = scalar_lea.hbm %s5015_s9, 16 }
 0x1f6   :  { %p3948_p8 = scmp.ne.s32.totalorder %s5015_s9, %s3947_s19  ;;  %p3951_p9 = scmp.lt.u32.totalorder %s3947_s19, %s5015_s9 }
 0x1f8   :  { %p3953_p10 = pnand %p3951_p9, %p3948_p8 }
 0x1fa   :  { %3956 = shalt.err (!%p3953_p10)
}
 0x1fb   :  { %s3957_s0 = scalar_lea.vmem %s278_s24, 16  ;;  %s3961_s8 = scalar_lea.vmem %s278_s24, 32 }
 0x1fc   :  { %p3958_p11 = scmp.ne.s32.totalorder %s278_s24, %s3957_s0  ;;  %p3962_p12 = scmp.lt.s32.totalorder %s278_s24, %s278_s24 }
 0x1fd   :  { %p3963_p13 = scmp.lt.s32.totalorder %s3961_s8, %s3957_s0 }
 0x1ff   :  { %p3964_p0 = por %p3963_p13, %p3962_p12 }
 0x201   :  { %p3965_p1 = pnand %p3964_p0, %p3958_p11 }
 0x203   :  { %3968 = shalt.err (!%p3965_p1)
}
 0x204   :  { %s5016_s15 = sld [smem:[#allocation83_spill]] }
 0x205   :  { %280 = dma.hbm_to_vmem [thread:$0]  %s5015_s9, 16, %s278_s24, [#allocation24]  }
 0x20a   :  { %s3969_s14 = scalar_lea.hbm %s5016_s15, 16 }
 0x20b   :  { %p3970_p2 = scmp.ne.s32.totalorder %s5016_s15, %s3969_s14  ;;  %p3973_p3 = scmp.lt.u32.totalorder %s3969_s14, %s5016_s15 }
 0x20d   :  { %p3975_p4 = pnand %p3973_p3, %p3970_p2 }
 0x20f   :  { %3978 = shalt.err (!%p3975_p4)
}
 0x210   :  { %s3979_s6 = scalar_lea.vmem %s300_s11, 16  ;;  %s3983_s16 = scalar_lea.vmem %s300_s11, 32 }
 0x211   :  { %p3980_p5 = scmp.ne.s32.totalorder %s300_s11, %s3979_s6  ;;  %p3984_p6 = scmp.lt.s32.totalorder %s300_s11, %s300_s11 }
 0x212   :  { %p3985_p7 = scmp.lt.s32.totalorder %s3983_s16, %s3979_s6 }
 0x214   :  { %p3986_p8 = por %p3985_p7, %p3984_p6 }
 0x216   :  { %p3987_p9 = pnand %p3986_p8, %p3980_p5 }
 0x218   :  { %3990 = shalt.err (!%p3987_p9)
}
 0x219   :  { %s5017_s29 = sld [smem:[#allocation85_spill]]  ;;  %s4297_s22 = smov [#allocation31]  }
 0x21a   :  { %302 = dma.hbm_to_vmem [thread:$0]  %s5016_s15, 16, %s300_s11, [#allocation27]  }
 0x21b   :  { %s321_s17 = sshll.u32 %s4297_s22, 4  ;;  %s4298_s18 = smov [#allocation34]   ;;  %s322_s17 = int_to_ptr.vmem [resolvable:$true] %s321_s17 }
 0x21c   :  { %s342_s25 = sshll.u32 %s4298_s18, 4  ;;  %s4686_s25 = int_to_ptr.vmem [resolvable:$true] %s342_s25 }
 0x21f   :  { %s3991_s4 = scalar_lea.hbm %s5017_s29, 16 }
 0x220   :  { %p3992_p10 = scmp.ne.s32.totalorder %s5017_s29, %s3991_s4  ;;  %p3995_p11 = scmp.lt.u32.totalorder %s3991_s4, %s5017_s29 }
 0x222   :  { %p3997_p12 = pnand %p3995_p11, %p3992_p10 }
 0x224   :  { %4000 = shalt.err (!%p3997_p12)
}
 0x225   :  { %s4001_s30 = scalar_lea.vmem %s322_s17, 16  ;;  %s4005_s23 = scalar_lea.vmem %s322_s17, 32 }
 0x226   :  { %p4002_p13 = scmp.ne.s32.totalorder %s322_s17, %s4001_s30  ;;  %p4006_p0 = scmp.lt.s32.totalorder %s322_s17, %s322_s17 }
 0x227   :  { %p4007_p1 = scmp.lt.s32.totalorder %s4005_s23, %s4001_s30 }
 0x229   :  { %p4008_p2 = por %p4007_p1, %p4006_p0 }
 0x22b   :  { %p4009_p3 = pnand %p4008_p2, %p4002_p13 }
 0x22d   :  { %4012 = shalt.err (!%p4009_p3)
}
 0x22e   :  { %s5018_s1 = sld [smem:[#allocation87_spill]] }
 0x22f   :  { %324 = dma.hbm_to_vmem [thread:$0]  %s5017_s29, 16, %s322_s17, [#allocation30]  }
 0x234   :  { %s4013_s12 = scalar_lea.hbm %s5018_s1, 512 }
 0x235   :  { %p4014_p4 = scmp.ne.s32.totalorder %s5018_s1, %s4013_s12  ;;  %p4017_p5 = scmp.lt.u32.totalorder %s4013_s12, %s5018_s1 }
 0x237   :  { %p4019_p6 = pnand %p4017_p5, %p4014_p4 }
 0x239   :  { %4022 = shalt.err (!%p4019_p6)
}
 0x23a   :  { %s4023_s2 = scalar_lea.vmem %s4686_s25, 512  ;;  %p4028_p8 = scmp.lt.s32.totalorder %s4686_s25, %s4686_s25 }
 0x23b   :  { %p4024_p7 = scmp.ne.s32.totalorder %s4686_s25, %s4023_s2  ;;  %p4029_p9 = scmp.lt.s32.totalorder %s4023_s2, %s4023_s2 }
 0x23d   :  { %p4030_p10 = por %p4029_p9, %p4028_p8 }
 0x23f   :  { %p4031_p11 = pnand %p4030_p10, %p4024_p7 }
 0x241   :  { %4034 = shalt.err (!%p4031_p11)
}
 0x242   :  { %s5019_s20 = sld [smem:[#allocation88_spill]]  ;;  %s4299_s7 = smov [#allocation37]  }
 0x243   :  { %348 = dma.hbm_to_vmem [thread:$0]  %s5018_s1, 512, %s4686_s25, [#allocation33], %s4273_s26, %s4273_s26, %s4274_s28  }
 0x244   :  { %s365_s9 = sshll.u32 %s4299_s7, 4  ;;  %s4300_s10 = smov [#allocation40]   ;;  %s366_s9 = int_to_ptr.vmem [resolvable:$true] %s365_s9 }
 0x245   :  { %s387_s24 = sshll.u32 %s4300_s10, 4  ;;  %s388_s24 = int_to_ptr.vmem [resolvable:$true] %s387_s24 }
 0x248   :  { %s4035_s3 = scalar_lea.hbm %s5019_s20, 16 }
 0x249   :  { %p4036_p12 = scmp.ne.s32.totalorder %s5019_s20, %s4035_s3  ;;  %p4039_p13 = scmp.lt.u32.totalorder %s4035_s3, %s5019_s20 }
 0x24b   :  { %p4041_p0 = pnand %p4039_p13, %p4036_p12 }
 0x24d   :  { %4044 = shalt.err (!%p4041_p0)
}
 0x24e   :  { %s4045_s11 = scalar_lea.vmem %s366_s9, 16  ;;  %s4049_s19 = scalar_lea.vmem %s366_s9, 32 }
 0x24f   :  { %p4046_p1 = scmp.ne.s32.totalorder %s366_s9, %s4045_s11  ;;  %p4050_p2 = scmp.lt.s32.totalorder %s366_s9, %s366_s9 }
 0x250   :  { %p4051_p3 = scmp.lt.s32.totalorder %s4049_s19, %s4045_s11 }
 0x252   :  { %p4052_p4 = por %p4051_p3, %p4050_p2 }
 0x254   :  { %p4053_p5 = pnand %p4052_p4, %p4046_p1 }
 0x256   :  { %4056 = shalt.err (!%p4053_p5)
}
 0x257   :  { %s5020_s0 = sld [smem:[#allocation90_spill]] }
 0x258   :  { %368 = dma.hbm_to_vmem [thread:$0]  %s5019_s20, 16, %s366_s9, [#allocation36]  }
 0x25d   :  { %s4057_s8 = scalar_lea.hbm %s5020_s0, 16 }
 0x25e   :  { %p4058_p6 = scmp.ne.s32.totalorder %s5020_s0, %s4057_s8  ;;  %p4061_p7 = scmp.lt.u32.totalorder %s4057_s8, %s5020_s0 }
 0x260   :  { %p4063_p8 = pnand %p4061_p7, %p4058_p6 }
 0x262   :  { %4066 = shalt.err (!%p4063_p8)
}
 0x263   :  { %s4067_s15 = scalar_lea.vmem %s388_s24, 16  ;;  %s4071_s14 = scalar_lea.vmem %s388_s24, 32 }
 0x264   :  { %p4068_p9 = scmp.ne.s32.totalorder %s388_s24, %s4067_s15  ;;  %p4072_p10 = scmp.lt.s32.totalorder %s388_s24, %s388_s24 }
 0x265   :  { %p4073_p11 = scmp.lt.s32.totalorder %s4071_s14, %s4067_s15 }
 0x267   :  { %p4074_p12 = por %p4073_p11, %p4072_p10 }
 0x269   :  { %p4075_p13 = pnand %p4074_p12, %p4068_p9 }
 0x26b   :  { %4078 = shalt.err (!%p4075_p13)
}
 0x26c   :  { %s5021_s6 = sld [smem:[#allocation92_spill]]  ;;  %s4301_s16 = smov [#allocation43]  }
 0x26d   :  { %390 = dma.hbm_to_vmem [thread:$0]  %s5020_s0, 16, %s388_s24, [#allocation39]  }
 0x26e   :  { %s409_s29 = sshll.u32 %s4301_s16, 4  ;;  %s4302_s22 = smov [#allocation46]   ;;  %s410_s29 = int_to_ptr.vmem [resolvable:$true] %s409_s29 }
 0x26f   :  { %s429_s17 = sshll.u32 %s4302_s22, 4  ;;  %s430_s17 = int_to_ptr.vmem [resolvable:$true] %s429_s17 }
 0x272   :  { %s4079_s18 = scalar_lea.hbm %s5021_s6, 128 }
 0x273   :  { %p4080_p0 = scmp.ne.s32.totalorder %s5021_s6, %s4079_s18  ;;  %p4083_p1 = scmp.lt.u32.totalorder %s4079_s18, %s5021_s6 }
 0x275   :  { %p4085_p2 = pnand %p4083_p1, %p4080_p0 }
 0x277   :  { %4088 = shalt.err (!%p4085_p2)
}
 0x278   :  { %s4089_s25 = scalar_lea.vmem %s410_s29, 128  ;;  %p4094_p4 = scmp.lt.s32.totalorder %s410_s29, %s410_s29 }
 0x279   :  { %p4090_p3 = scmp.ne.s32.totalorder %s410_s29, %s4089_s25  ;;  %p4095_p5 = scmp.lt.s32.totalorder %s4089_s25, %s4089_s25 }
 0x27b   :  { %p4096_p6 = por %p4095_p5, %p4094_p4 }
 0x27d   :  { %p4097_p7 = pnand %p4096_p6, %p4090_p3 }
 0x27f   :  { %4100 = shalt.err (!%p4097_p7)
}
 0x280   :  { %s5022_s4 = sld [smem:[#allocation93_spill]] }
 0x281   :  { %412 = dma.hbm_to_vmem [thread:$0]  %s5021_s6, 128, %s410_s29, [#allocation42]  }
 0x286   :  { %s4101_s30 = scalar_lea.hbm %s5022_s4, 16 }
 0x287   :  { %p4102_p8 = scmp.ne.s32.totalorder %s5022_s4, %s4101_s30  ;;  %p4105_p9 = scmp.lt.u32.totalorder %s4101_s30, %s5022_s4 }
 0x289   :  { %p4107_p10 = pnand %p4105_p9, %p4102_p8 }
 0x28b   :  { %4110 = shalt.err (!%p4107_p10)
}
 0x28c   :  { %s4111_s23 = scalar_lea.vmem %s430_s17, 16  ;;  %s4115_s1 = scalar_lea.vmem %s430_s17, 32 }
 0x28d   :  { %p4112_p11 = scmp.ne.s32.totalorder %s430_s17, %s4111_s23  ;;  %p4116_p12 = scmp.lt.s32.totalorder %s430_s17, %s430_s17 }
 0x28e   :  { %p4117_p13 = scmp.lt.s32.totalorder %s4115_s1, %s4111_s23 }
 0x290   :  { %p4118_p0 = por %p4117_p13, %p4116_p12 }
 0x292   :  { %p4119_p1 = pnand %p4118_p0, %p4112_p11 }
 0x294   :  { %4122 = shalt.err (!%p4119_p1)
}
 0x295   :  { %s5023_s12 = sld [smem:[#allocation99_spill]]  ;;  %s4303_s2 = smov [#allocation49]  }
 0x296   :  { %432 = dma.hbm_to_vmem [thread:$0]  %s5022_s4, 16, %s430_s17, [#allocation45]  }
 0x297   :  { %s458_s20 = sshll.u32 %s4303_s2, 4  ;;  %s4304_s7 = smov [#allocation50]   ;;  %s459_s20 = int_to_ptr.vmem [resolvable:$true] %s458_s20 }
 0x298   :  { %s470_s9 = sshll.u32 %s4304_s7, 4  ;;  %s4720_s9 = int_to_ptr.vmem [resolvable:$true] %s470_s9 }
 0x29b   :  { %s4123_s10 = scalar_lea.hbm %s5023_s12, 512 }
 0x29c   :  { %p4124_p2 = scmp.ne.s32.totalorder %s5023_s12, %s4123_s10  ;;  %p4127_p3 = scmp.lt.u32.totalorder %s4123_s10, %s5023_s12 }
 0x29e   :  { %p4129_p4 = pnand %p4127_p3, %p4124_p2 }
 0x2a0   :  { %4132 = shalt.err (!%p4129_p4)
}
 0x2a1   :  { %s4133_s24 = scalar_lea.vmem %s459_s20, 512  ;;  %p4138_p6 = scmp.lt.s32.totalorder %s459_s20, %s459_s20 }
 0x2a2   :  { %p4134_p5 = scmp.ne.s32.totalorder %s459_s20, %s4133_s24  ;;  %p4139_p7 = scmp.lt.s32.totalorder %s4133_s24, %s4133_s24 }
 0x2a4   :  { %p4140_p8 = por %p4139_p7, %p4138_p6 }
 0x2a6   :  { %p4141_p9 = pnand %p4140_p8, %p4134_p5 }
 0x2a8   :  { %4144 = shalt.err (!%p4141_p9)
}
 0x2a9   :  { %464 = dma.hbm_to_vmem [thread:$0]  %s5023_s12, 512, %s459_s20, [#allocation48], %s4273_s26, %s4273_s26, %s4274_s28  }
 0x2aa   :  { %s4145_s3 = scalar_lea.hbm %s4529_s5, 512 }
 0x2ab   :  { %p4146_p10 = scmp.ne.s32.totalorder %s4529_s5, %s4145_s3  ;;  %p4149_p11 = scmp.lt.u32.totalorder %s4145_s3, %s4529_s5 }
 0x2ad   :  { %p4151_p12 = pnand %p4149_p11, %p4146_p10 }
 0x2af   :  { %4154 = shalt.err (!%p4151_p12)
}
 0x2b0   :  { %s4155_s11 = scalar_lea.vmem %s4720_s9, 512  ;;  %p4160_p0 = scmp.lt.s32.totalorder %s4720_s9, %s4720_s9 }
 0x2b1   :  { %p4156_p13 = scmp.ne.s32.totalorder %s4720_s9, %s4155_s11  ;;  %p4161_p1 = scmp.lt.s32.totalorder %s4155_s11, %s4155_s11 }
 0x2b3   :  { %p4162_p2 = por %p4161_p1, %p4160_p0 }
 0x2b5   :  { %p4163_p3 = pnand %p4162_p2, %p4156_p13 }
 0x2b7   :  { %4166 = shalt.err (!%p4163_p3)
}
 0x2b8   :  { %476 = dma.hbm_to_vmem [thread:$0]  %s4529_s5, 512, %s4720_s9, [#allocation51], %s4273_s26, %s4273_s26, %s4274_s28  }
 0x2b9   :  { %4189 = dma.done.wait [#allocation3], 256  }
 0x2ba   :  { %4190 = vsyncadd [#allocation3], 4294967040 }
 0x2bb   :  { %4191 = dma.done.wait [#allocation6], 272  }
 0x2bc   :  { %4192 = vsyncadd [#allocation6], 4294967024 }
 0x2bd   :  { %4193 = dma.done.wait [#allocation9], 528  }
 0x2be   :  { %4194 = vsyncadd [#allocation9], 4294966768 }
 0x2bf   :  { %4195 = dma.done.wait [#allocation12], 32  }
 0x2c0   :  { %4196 = vsyncadd [#allocation12], 4294967264 }
 0x2c1   :  { %4197 = dma.done.wait [#allocation15], 528  }
 0x2c2   :  { %4198 = vsyncadd [#allocation15], 4294966768 }
 0x2c3   :  { %4199 = dma.done.wait [#allocation18], 32  }
 0x2c4   :  { %4200 = vsyncadd [#allocation18], 4294967264 }
 0x2c5   :  { %4201 = dma.done.wait [#allocation21], 32  }
 0x2c6   :  { %4202 = vsyncadd [#allocation21], 4294967264 }
 0x2c7   :  { %4203 = dma.done.wait [#allocation24], 32  }
 0x2c8   :  { %4204 = vsyncadd [#allocation24], 4294967264 }
 0x2c9   :  { %4205 = dma.done.wait [#allocation27], 32  }
 0x2ca   :  { %4206 = vsyncadd [#allocation27], 4294967264 }
 0x2cb   :  { %4207 = dma.done.wait [#allocation30], 32  }
 0x2cc   :  { %4208 = vsyncadd [#allocation30], 4294967264 }
 0x2cd   :  { %4209 = dma.done.wait [#allocation33], 528  }
 0x2ce   :  { %4210 = vsyncadd [#allocation33], 4294966768 }
 0x2cf   :  { %4211 = dma.done.wait [#allocation36], 32  }
 0x2d0   :  { %4212 = vsyncadd [#allocation36], 4294967264 }
 0x2d1   :  { %4213 = dma.done.wait [#allocation39], 32  }
 0x2d2   :  { %4214 = vsyncadd [#allocation39], 4294967264 }
 0x2d3   :  { %4215 = dma.done.wait [#allocation42], 144  }
 0x2d4   :  { %4216 = vsyncadd [#allocation42], 4294967152 }
 0x2d5   :  { %4217 = dma.done.wait [#allocation45], 32  }
 0x2d6   :  { %4218 = vsyncadd [#allocation45], 4294967264 }
 0x2d7   :  { %4219 = dma.done.wait [#allocation48], 1024  }
 0x2d8   :  { %4220 = vsyncadd [#allocation48], 4294966272 }
 0x2d9   :  { %4221 = dma.done.wait [#allocation51], 512  }
 0x2da   :  { %4222 = vsyncadd [#allocation51], 4294966784  ;;  %vm577_vm0 = vcmask 130048   ;;  %v575_v0 = vld [vmem:[#allocation5] sm:$0xff]  ;;  %v576_v1 = vld [vmem:[#allocation5 + $0x8] sm:$0xff]  ;;  %vm661_vm1 = vcmask 261120  }
 0x2db   :  { %v573_v2 = vld [vmem:[#allocation2] sm:$0xff]  ;;  %v3162_v3 = vpack.c.bf16 %v576_v1, %v575_v0  ;;  %v574_v4 = vld [vmem:[#allocation2 + $0x8] sm:$0xff]  ;;  %v709_v21 = vld [vmem:[#allocation10 + $0x10] sm:$0xff]  ;;  %s5024_s5 = sld [smem:[#allocation89_spill]]  ;;  %s5025_s19 = sld [smem:[#allocation91_spill]]  ;;  %vm1335_vm2 = vcmask 1043456  }
 0x2dc   :  { %2936 = vmatprep.mubr.msk.f32.mxu0 %vm577_vm0, %v573_v2  ;;  %v707_v19 = vld [vmem:[#allocation10] sm:$0xff]  ;;  %v708_v20 = vld [vmem:[#allocation10 + $0x8] sm:$0xff]  ;;  %v710_v23 = vld [vmem:[#allocation10 + $0x18] sm:$0xff]  ;;  %s5026_s0 = sld [smem:[#allocation94_spill]]  ;;  %vm1325_vm3 = vcmask 31744   ;;  %s5027_s8 = sld [smem:[#allocation97_spill]] }
 0x2dd   :  { %3163 = vmatprep.subr.bf16.mxu0 %v3162_v3  ;;  %v3166_v22 = vpack.c.bf16 %v708_v20, %v707_v19  ;;  %v3170_v24 = vpack.c.bf16 %v710_v23, %v709_v21  ;;  %v2748_v32 = vld [vmem:[#allocation7] ss:$0 sm:$0xff]  ;;  %v2749_v34 = vld [vmem:[#allocation8] ss:$0 sm:$0xff]  ;;  %v838_v57 = vld [vmem:[#allocation14] sm:$0xff]  ;;  %s5029_s15 = sld [smem:[#allocation95_spill]] }
 0x2de   :  { %3165 = vmatpush3.bf16.msra.mxu0 %v3162_v3  ;;  %v839_v58 = vld [vmem:[#allocation14 + $0x8] sm:$0xff]  ;;  %v840_v60 = vld [vmem:[#allocation14 + $0x10] sm:$0xff]  ;;  %v841_v61 = vld [vmem:[#allocation14 + $0x18] sm:$0xff]  ;;  %s5030_s14 = sld [smem:[#allocation96_spill]]  ;;  %vm1632_vm4 = vcmask 523264   ;;  %s5031_s6 = sld [smem:[#allocation84_spill]] }
 0x2df   :  { %3167 = vmatprep.subr.bf16.mxu1 %v3166_v22  ;;  %v3174_v59 = vpack.c.bf16 %v839_v58, %v838_v57  ;;  %v3178_v62 = vpack.c.bf16 %v841_v61, %v840_v60  ;;  %s5032_s16 = sld [smem:[#allocation86_spill]]  ;;  %vm1994_vm5 = vcmask 64512   ;;  %s5035_s22 = sld [smem:[#allocation80_spill]] }
 0x2e0   :  { %3169 = vmatpush3.bf16.msra.mxu1 %v3166_v22  ;;  %s5034_s29 = sld [smem:[#allocation78_spill]]  ;;  %s4305_s17 = smov [#allocation52]  }
 0x2e1   :  { %2937 = vmatmul.mubr.msk.f32.vlgmr.msra.gmra.mrb[0].mxu0 %vm577_vm0, %v574_v4  ;;  %3171 = vmatprep.subr.bf16.mxu1 %v3170_v24  ;;  %s2668_s18 = sshll.u32 %s4305_s17, 4  ;;  %s2669_s18 = int_to_ptr.vmem [resolvable:$true] %s2668_s18 }
 0x2e2   :  { %3175 = vmatprep.subr.bf16.mxu0 %v3174_v59  ;;  %s4167_s25 = scalar_lea.vmem %s2669_s18, 256  ;;  %p4172_p5 = scmp.lt.s32.totalorder %s2669_s18, %s2669_s18 }
 0x2e3   :  { %3177 = vmatpush3.bf16.msra.mxu0 %v3174_v59  ;;  %p4168_p4 = scmp.ne.s32.totalorder %s2669_s18, %s4167_s25  ;;  %p4173_p6 = scmp.lt.s32.totalorder %s4167_s25, %s4167_s25 }
 0x2e4   :  { %3173 = vmatpush3.bf16.msra.mxu1 %v3170_v24  ;;  %3179 = vmatprep.subr.bf16.mxu0 %v3178_v62 }
 0x2e5   :  { %p4174_p7 = por %p4173_p6, %p4172_p5 }
 0x2e7   :  { %3181 = vmatpush3.bf16.msra.mxu0 %v3178_v62  ;;  %p4175_p8 = pnand %p4174_p7, %p4168_p4 }
 0x3b4   :  { %v2938_v5 = vpop.f32.mrb[0].mxu0 }
 0x3b5   :  { %v650_v6 = vpop.f32.mrb[1].mxu0  ;;  %v665_v8 = vsel %vm661_vm1, %v2938_v5, 0.0 }
 0x3b6   :  { %v662_v7 = vsel %vm661_vm1, %v650_v6, 0.0 }
 0x3b7   :  { %663 = vadd.xlane.f32.xlu0 %v662_v7 }
 0x3bb   :  { %666 = vadd.xlane.f32.xlu0 %v665_v8 }
 0x444   :  { %v664_v9 = vpop.xlane.xlu0 %663 }
 0x445   :  { %v669_v10 = vmul.f32 0.03125, %v664_v9  ;;  %v2753_v9 = vld [vmem:[#allocation13] ss:$0 sm:$0xff] }
 0x447   :  { %v671_v11 = vsub.f32 %v650_v6, %v669_v10  ;;  %v2752_v6 = vld [vmem:[#allocation11] ss:$0 sm:$0xff] }
 0x448   :  { %v667_v12 = vpop.xlane.xlu0 %666 }
 0x449   :  { %v670_v13 = vmul.f32 0.03125, %v667_v12  ;;  %v673_v14 = vmul.f32 %v671_v11, %v671_v11 }
 0x44b   :  { %v672_v15 = vsub.f32 %v2938_v5, %v670_v13  ;;  %v675_v16 = vsel %vm661_vm1, %v673_v14, 0.0 }
 0x44c   :  { %676 = vadd.xlane.f32.xlu1 %v675_v16 }
 0x44d   :  { %v674_v17 = vmul.f32 %v672_v15, %v672_v15 }
 0x44f   :  { %v678_v18 = vsel %vm661_vm1, %v674_v17, 0.0 }
 0x450   :  { %679 = vadd.xlane.f32.xlu1 %v678_v18 }
 0x4d9   :  { %v677_v25 = vpop.xlane.xlu1 %676 }
 0x4da   :  { %v681_v26 = vmul.f32 0.03125, %v677_v25 }
 0x4dc   :  { %v683_v27 = vadd.f32 1e-05, %v681_v26 }
 0x4dd   :  { %v680_v28 = vpop.xlane.xlu1 %679 }
 0x4de   :  { %3419 = vrsqrt.f32 %v683_v27  ;;  %v682_v29 = vmul.f32 0.03125, %v680_v28 }
 0x4e0   :  { %v684_v30 = vadd.f32 1e-05, %v682_v29 }
 0x4e2   :  { %3421 = vrsqrt.f32 %v684_v30 }
 0x4e8   :  { %v3420_v31 = vpop.eup %3419 }
 0x4e9   :  { %v687_v33 = vmul.f32 %v3420_v31, %v671_v11  ;;  %v969_v31 = vld [vmem:[#allocation34] sm:$0xff] }
 0x4eb   :  { %v695_v35 = vmul.f32 %v2748_v32, %v687_v33 }
 0x4ec   :  { %v3422_v36 = vpop.eup %3421 }
 0x4ed   :  { %v688_v37 = vmul.f32 %v3422_v36, %v672_v15  ;;  %v4747_v38 = vadd.f32 %v2749_v34, %v695_v35  ;;  %v972_v35 = vld [vmem:[#allocation34 + $0x18] sm:$0xff] }
 0x4ef   :  { %v696_v39 = vmul.f32 %v2748_v32, %v688_v37  ;;  %v705_v40 = vmax.f32 %v4747_v38, 0.0  ;;  %v970_v32 = vld [vmem:[#allocation34 + $0x8] sm:$0xff] }
 0x4f0   :  { %v3182_v33 = vpack.c.bf16 %v970_v32, %v969_v31 }
 0x4f1   :  { %v4750_v41 = vadd.f32 %v2749_v34, %v696_v39  ;;  %2947 = vmatprep.mubr.msk.f32.mxu1 %vm661_vm1, %v705_v40  ;;  %v971_v34 = vld [vmem:[#allocation34 + $0x10] sm:$0xff] }
 0x4f2   :  { %v3186_v36 = vpack.c.bf16 %v972_v35, %v971_v34  ;;  %3183 = vmatprep.subr.bf16.mxu1 %v3182_v33 }
 0x4f3   :  { %v706_v42 = vmax.f32 %v4750_v41, 0.0 }
 0x4f5   :  { %2948 = vmatmul.mubr.msk.f32.vlgmr.msra.gmra.mrb[0].mxu1 %vm661_vm1, %v706_v42 }
 0x4f6   :  { %3185 = vmatpush3.bf16.msra.mxu1 %v3182_v33 }
 0x4f7   :  { %3187 = vmatprep.subr.bf16.mxu1 %v3186_v36 }
 0x4fa   :  { %3189 = vmatpush3.bf16.msra.mxu1 %v3186_v36 }
 0x5c8   :  { %v2949_v43 = vpop.f32.mrb[0].mxu1 }
 0x5c9   :  { %v783_v44 = vpop.f32.mrb[1].mxu1  ;;  %v797_v45 = vsel %vm661_vm1, %v2949_v43, 0.0 }
 0x5ca   :  { %798 = vadd.xlane.f32.xlu1 %v797_v45  ;;  %v794_v46 = vsel %vm661_vm1, %v783_v44, 0.0 }
 0x5cb   :  { %795 = vadd.xlane.f32.xlu0 %v794_v46 }
 0x657   :  { %v799_v47 = vpop.xlane.xlu1 %798 }
 0x658   :  { %v801_v48 = vmul.f32 0.03125, %v799_v47  ;;  %v796_v49 = vpop.xlane.xlu0 %795 }
 0x659   :  { %v800_v50 = vmul.f32 0.03125, %v796_v49 }
 0x65a   :  { %v803_v51 = vsub.f32 %v2949_v43, %v801_v48  ;;  %v2756_v48 = vld [vmem:[#allocation16] ss:$0 sm:$0xff] }
 0x65b   :  { %v802_v52 = vsub.f32 %v783_v44, %v800_v50 }
 0x65c   :  { %v805_v53 = vmul.f32 %v803_v51, %v803_v51 }
 0x65d   :  { %v804_v54 = vmul.f32 %v802_v52, %v802_v52 }
 0x65e   :  { %v809_v55 = vsel %vm661_vm1, %v805_v53, 0.0 }
 0x65f   :  { %810 = vadd.xlane.f32.xlu1 %v809_v55  ;;  %v806_v56 = vsel %vm661_vm1, %v804_v54, 0.0 }
 0x660   :  { %807 = vadd.xlane.f32.xlu0 %v806_v56 }
 0x6ec   :  { %v811_v63 = vpop.xlane.xlu1 %810 }
 0x6ed   :  { %v813_v0 = vmul.f32 0.03125, %v811_v63  ;;  %v808_v1 = vpop.xlane.xlu0 %807 }
 0x6ee   :  { %v812_v2 = vmul.f32 0.03125, %v808_v1 }
 0x6ef   :  { %v815_v3 = vadd.f32 1e-05, %v813_v0 }
 0x6f0   :  { %v814_v4 = vadd.f32 1e-05, %v812_v2 }
 0x6f1   :  { %3423 = vrsqrt.f32 %v815_v3 }
 0x6f2   :  { %3425 = vrsqrt.f32 %v814_v4 }
 0x6fb   :  { %v3424_v5 = vpop.eup %3423 }
 0x6fc   :  { %v3426_v7 = vpop.eup %3425  ;;  %v819_v8 = vmul.f32 %v3424_v5, %v803_v51  ;;  %v2757_v51 = vld [vmem:[#allocation17] ss:$0 sm:$0xff] }
 0x6fd   :  { %v818_v10 = vmul.f32 %v3426_v7, %v802_v52 }
 0x6fe   :  { %v827_v11 = vmul.f32 %v2752_v6, %v819_v8 }
 0x6ff   :  { %v826_v12 = vmul.f32 %v2752_v6, %v818_v10  ;;  %v1101_v10 = vld [vmem:[%s5024_s5 + $0x8] sm:$0xff] }
 0x700   :  { %v4763_v13 = vadd.f32 %v2753_v9, %v827_v11 }
 0x701   :  { %v4765_v14 = vadd.f32 %v2753_v9, %v826_v12  ;;  %v1100_v9 = vld [vmem:[%s5024_s5] sm:$0xff]  ;;  %v1102_v12 = vld [vmem:[%s5024_s5 + $0x10] sm:$0xff] }
 0x702   :  { %v837_v16 = vmax.f32 %v4763_v13, 0.0  ;;  %v3190_v11 = vpack.c.bf16 %v1101_v10, %v1100_v9 }
 0x703   :  { %v836_v15 = vmax.f32 %v4765_v14, 0.0 }
 0x704   :  { %3191 = vmatprep.subr.bf16.mxu0 %v3190_v11 }
 0x705   :  { %2958 = vmatprep.mubr.msk.f32.mxu0 %vm661_vm1, %v836_v15 }
 0x706   :  { %2959 = vmatmul.mubr.msk.f32.vlgmr.msra.gmra.mrb[2].mxu0 %vm661_vm1, %v837_v16 }
 0x707   :  { %3193 = vmatpush3.bf16.msra.mxu0 %v3190_v11 }
 0x7d9   :  { %v2960_v17 = vpop.f32.mrb[2].mxu0 }
 0x7da   :  { %v914_v18 = vpop.f32.mrb[3].mxu0  ;;  %v928_v19 = vsel %vm661_vm1, %v2960_v17, 0.0 }
 0x7db   :  { %929 = vadd.xlane.f32.xlu1 %v928_v19  ;;  %v925_v20 = vsel %vm661_vm1, %v914_v18, 0.0 }
 0x7dc   :  { %926 = vadd.xlane.f32.xlu0 %v925_v20 }
 0x868   :  { %v930_v21 = vpop.xlane.xlu1 %929 }
 0x869   :  { %v932_v22 = vmul.f32 0.03125, %v930_v21  ;;  %v927_v23 = vpop.xlane.xlu0 %926 }
 0x86a   :  { %v931_v24 = vmul.f32 0.03125, %v927_v23 }
 0x86b   :  { %v934_v25 = vsub.f32 %v2960_v17, %v932_v22  ;;  %v1103_v17 = vld [vmem:[%s5024_s5 + $0x18] sm:$0xff] }
 0x86c   :  { %v933_v26 = vsub.f32 %v914_v18, %v931_v24  ;;  %v3194_v18 = vpack.c.bf16 %v1103_v17, %v1102_v12  ;;  %v2765_v12 = vld [vmem:[#allocation40] ss:$0 sm:$0xff] }
 0x86d   :  { %v936_v27 = vmul.f32 %v934_v25, %v934_v25 }
 0x86e   :  { %v935_v28 = vmul.f32 %v933_v26, %v933_v26  ;;  %3195 = vmatprep.subr.bf16.mxu0 %v3194_v18 }
 0x86f   :  { %v940_v29 = vsel %vm661_vm1, %v936_v27, 0.0  ;;  %3197 = vmatpush3.bf16.msra.mxu0 %v3194_v18 }
 0x870   :  { %941 = vadd.xlane.f32.xlu1 %v940_v29  ;;  %v937_v30 = vsel %vm661_vm1, %v935_v28, 0.0  ;;  %v2761_v29 = vld [vmem:[#allocation37] ss:$0 sm:$0xff] }
 0x871   :  { %938 = vadd.xlane.f32.xlu0 %v937_v30 }
 0x8fd   :  { %v942_v37 = vpop.xlane.xlu1 %941 }
 0x8fe   :  { %v944_v39 = vmul.f32 0.03125, %v942_v37  ;;  %v939_v43 = vpop.xlane.xlu0 %938 }
 0x8ff   :  { %v943_v44 = vmul.f32 0.03125, %v939_v43 }
 0x900   :  { %v946_v45 = vadd.f32 1e-05, %v944_v39 }
 0x901   :  { %v945_v46 = vadd.f32 1e-05, %v943_v44 }
 0x902   :  { %3427 = vrsqrt.f32 %v946_v45 }
 0x903   :  { %3429 = vrsqrt.f32 %v945_v46 }
 0x90c   :  { %v3428_v47 = vpop.eup %3427 }
 0x90d   :  { %v3430_v49 = vpop.eup %3429  ;;  %v950_v50 = vmul.f32 %v3428_v47, %v934_v25 }
 0x90e   :  { %v949_v52 = vmul.f32 %v3430_v49, %v933_v26  ;;  %v2760_v26 = vld [vmem:[#allocation35] ss:$0 sm:$0xff] }
 0x90f   :  { %v958_v53 = vmul.f32 %v2756_v48, %v950_v50 }
 0x910   :  { %v957_v54 = vmul.f32 %v2756_v48, %v949_v52 }
 0x911   :  { %v4779_v55 = vadd.f32 %v2757_v51, %v958_v53 }
 0x912   :  { %v4781_v56 = vadd.f32 %v2757_v51, %v957_v54 }
 0x913   :  { %v968_v58 = vmax.f32 %v4779_v55, 0.0 }
 0x914   :  { %v967_v57 = vmax.f32 %v4781_v56, 0.0 }
 0x916   :  { %2969 = vmatprep.mubr.msk.f32.mxu1 %vm661_vm1, %v967_v57 }
 0x917   :  { %2970 = vmatmul.mubr.msk.f32.vlgmr.msra.gmra.mrb[2].mxu1 %vm661_vm1, %v968_v58 }
 0x9ea   :  { %v2971_v59 = vpop.f32.mrb[2].mxu1 }
 0x9eb   :  { %v1045_v60 = vpop.f32.mrb[3].mxu1  ;;  %v1059_v61 = vsel %vm661_vm1, %v2971_v59, 0.0 }
 0x9ec   :  { %1060 = vadd.xlane.f32.xlu1 %v1059_v61  ;;  %v1056_v62 = vsel %vm661_vm1, %v1045_v60, 0.0  ;;  %v1235_v61 = vld [vmem:[%s5025_s19 + $0x10] sm:$0xff] }
 0x9ed   :  { %1057 = vadd.xlane.f32.xlu0 %v1056_v62 }
 0xa79   :  { %v1061_v63 = vpop.xlane.xlu1 %1060 }
 0xa7a   :  { %v1063_v0 = vmul.f32 0.03125, %v1061_v63  ;;  %v1058_v1 = vpop.xlane.xlu0 %1057  ;;  %v1236_v63 = vld [vmem:[%s5025_s19 + $0x18] sm:$0xff] }
 0xa7b   :  { %v1062_v2 = vmul.f32 0.03125, %v1058_v1 }
 0xa7c   :  { %v1065_v3 = vsub.f32 %v2971_v59, %v1063_v0  ;;  %v1233_v59 = vld [vmem:[%s5025_s19] sm:$0xff]  ;;  %v3202_v0 = vpack.c.bf16 %v1236_v63, %v1235_v61 }
 0xa7d   :  { %v1064_v4 = vsub.f32 %v1045_v60, %v1062_v2  ;;  %v1234_v60 = vld [vmem:[%s5025_s19 + $0x8] sm:$0xff] }
 0xa7e   :  { %v1067_v5 = vmul.f32 %v1065_v3, %v1065_v3  ;;  %v3198_v62 = vpack.c.bf16 %v1234_v60, %v1233_v59 }
 0xa7f   :  { %v1066_v6 = vmul.f32 %v1064_v4, %v1064_v4 }
 0xa80   :  { %v1071_v7 = vsel %vm661_vm1, %v1067_v5, 0.0  ;;  %3199 = vmatprep.subr.bf16.mxu1 %v3198_v62 }
 0xa81   :  { %1072 = vadd.xlane.f32.xlu1 %v1071_v7  ;;  %v1068_v8 = vsel %vm661_vm1, %v1066_v6, 0.0  ;;  %3201 = vmatpush3.bf16.msra.mxu1 %v3198_v62 }
 0xa82   :  { %1069 = vadd.xlane.f32.xlu0 %v1068_v8  ;;  %3203 = vmatprep.subr.bf16.mxu1 %v3202_v0  ;;  %v2764_v8 = vld [vmem:[#allocation38] ss:$0 sm:$0xff] }
 0xa85   :  { %3205 = vmatpush3.bf16.msra.mxu1 %v3202_v0 }
 0xb0e   :  { %v1073_v19 = vpop.xlane.xlu1 %1072 }
 0xb0f   :  { %v1075_v20 = vmul.f32 0.03125, %v1073_v19  ;;  %v1070_v21 = vpop.xlane.xlu0 %1069 }
 0xb10   :  { %v1074_v22 = vmul.f32 0.03125, %v1070_v21 }
 0xb11   :  { %v1077_v23 = vadd.f32 1e-05, %v1075_v20 }
 0xb12   :  { %v1076_v24 = vadd.f32 1e-05, %v1074_v22 }
 0xb13   :  { %3431 = vrsqrt.f32 %v1077_v23 }
 0xb14   :  { %3433 = vrsqrt.f32 %v1076_v24 }
 0xb1d   :  { %v3432_v25 = vpop.eup %3431 }
 0xb1e   :  { %v3434_v27 = vpop.eup %3433  ;;  %v1081_v28 = vmul.f32 %v3432_v25, %v1065_v3  ;;  %v1328_v25 = vld [vmem:[%s5026_s0] sm:$0xf] }
 0xb1f   :  { %v1080_v30 = vmul.f32 %v3434_v27, %v1064_v4  ;;  %2994 = vmatprep.subr.msk.mxu0 %vm1335_vm2, %v1328_v25 }
 0xb20   :  { %v1089_v31 = vmul.f32 %v2760_v26, %v1081_v28 }
 0xb21   :  { %v1088_v32 = vmul.f32 %v2760_v26, %v1080_v30  ;;  %v2766_v26 = vld [vmem:[#allocation41] ss:$0 sm:$0xff] }
 0xb22   :  { %v1097_v33 = vadd.f32 %v2761_v29, %v1089_v31 }
 0xb23   :  { %v1096_v34 = vadd.f32 %v2761_v29, %v1088_v32 }
 0xb24   :  { %v1099_v36 = vmax.f32 %v1097_v33, 0.0 }
 0xb25   :  { %v1098_v35 = vmax.f32 %v1096_v34, 0.0 }
 0xb27   :  { %2980 = vmatprep.mubr.msk.f32.mxu0 %vm661_vm1, %v1098_v35 }
 0xb28   :  { %2981 = vmatmul.mubr.msk.f32.vlgmr.msra.gmra.mrb[4].mxu0 %vm661_vm1, %v1099_v36 }
 0xb29   :  { %2995 = vmatpush3.msk.msra.mxu0 %vm1335_vm2, %v1328_v25 }
 0xbfb   :  { %v2982_v37 = vpop.f32.mrb[4].mxu0 }
 0xbfc   :  { %v1176_v39 = vpop.f32.mrb[5].mxu0  ;;  %v1190_v43 = vsel %vm661_vm1, %v2982_v37, 0.0 }
 0xbfd   :  { %1191 = vadd.xlane.f32.xlu1 %v1190_v43  ;;  %v1187_v44 = vsel %vm661_vm1, %v1176_v39, 0.0 }
 0xbfe   :  { %1188 = vadd.xlane.f32.xlu0 %v1187_v44 }
 0xc8a   :  { %v1192_v45 = vpop.xlane.xlu1 %1191 }
 0xc8b   :  { %v1194_v46 = vmul.f32 0.03125, %v1192_v45  ;;  %v1189_v47 = vpop.xlane.xlu0 %1188  ;;  %v1464_v45 = vld [vmem:[#allocation47] sm:$0xff] }
 0xc8c   :  { %v1193_v48 = vmul.f32 0.03125, %v1189_v47 }
 0xc8d   :  { %v1196_v49 = vsub.f32 %v2982_v37, %v1194_v46  ;;  %v1465_v46 = vld [vmem:[#allocation47 + $0x8] sm:$0xff] }
 0xc8e   :  { %v1195_v50 = vsub.f32 %v1176_v39, %v1193_v48  ;;  %v3206_v47 = vpack.c.bf16 %v1465_v46, %v1464_v45  ;;  %v1466_v48 = vld [vmem:[#allocation47 + $0x10] sm:$0xff]  ;;  %v1763_v46 = vld [vmem:[%s5031_s6 + $0x10] sm:$0xff] }
 0xc8f   :  { %v1198_v51 = vmul.f32 %v1196_v49, %v1196_v49 }
 0xc90   :  { %v1197_v52 = vmul.f32 %v1195_v50, %v1195_v50  ;;  %3207 = vmatprep.subr.bf16.mxu0 %v3206_v47 }
 0xc91   :  { %v1202_v53 = vsel %vm661_vm1, %v1198_v51, 0.0  ;;  %v1460_v51 = vld [vmem:[%s5027_s8] sm:$0xff] }
 0xc92   :  { %1203 = vadd.xlane.f32.xlu1 %v1202_v53  ;;  %v1199_v54 = vsel %vm661_vm1, %v1197_v52, 0.0  ;;  %v1461_v52 = vld [vmem:[%s5027_s8 + $0x8] sm:$0xff] }
 0xc93   :  { %1200 = vadd.xlane.f32.xlu0 %v1199_v54  ;;  %v3214_v53 = vpack.c.bf16 %v1461_v52, %v1460_v51  ;;  %v1767_v52 = vld [vmem:[%s5031_s6 + $0x30] sm:$0xff] }
 0xd1f   :  { %v1204_v1 = vpop.xlane.xlu1 %1203 }
 0xd20   :  { %v1206_v2 = vmul.f32 0.03125, %v1204_v1  ;;  %v1201_v3 = vpop.xlane.xlu0 %1200 }
 0xd21   :  { %v1205_v4 = vmul.f32 0.03125, %v1201_v3 }
 0xd22   :  { %v1208_v5 = vadd.f32 1e-05, %v1206_v2 }
 0xd23   :  { %v1207_v6 = vadd.f32 1e-05, %v1205_v4 }
 0xd24   :  { %3435 = vrsqrt.f32 %v1208_v5 }
 0xd25   :  { %3437 = vrsqrt.f32 %v1207_v6 }
 0xd2e   :  { %v3436_v7 = vpop.eup %3435 }
 0xd2f   :  { %v3438_v9 = vpop.eup %3437  ;;  %v1212_v10 = vmul.f32 %v3436_v7, %v1196_v49  ;;  %v1467_v49 = vld [vmem:[#allocation47 + $0x18] sm:$0xff] }
 0xd30   :  { %v1211_v11 = vmul.f32 %v3438_v9, %v1195_v50  ;;  %v3210_v50 = vpack.c.bf16 %v1467_v49, %v1466_v48  ;;  %v1765_v49 = vld [vmem:[%s5031_s6 + $0x20] sm:$0xff] }
 0xd31   :  { %v1220_v17 = vmul.f32 %v2764_v8, %v1212_v10 }
 0xd32   :  { %v1219_v18 = vmul.f32 %v2764_v8, %v1211_v11 }
 0xd33   :  { %v1228_v19 = vadd.f32 %v2765_v12, %v1220_v17  ;;  %v2772_v17 = vld [vmem:[%s5029_s15] ss:$0 sm:$0xff] }
 0xd34   :  { %v1227_v20 = vadd.f32 %v2765_v12, %v1219_v18 }
 0xd35   :  { %v1230_v21 = vadd.f32 %v1228_v19, %v968_v58 }
 0xd36   :  { %v1229_v22 = vadd.f32 %v1227_v20, %v967_v57  ;;  %v2773_v20 = vld [vmem:[%s5030_s14] ss:$0 sm:$0xff] }
 0xd37   :  { %v1232_v24 = vmax.f32 %v1230_v21, 0.0 }
 0xd38   :  { %v1231_v23 = vmax.f32 %v1229_v22, 0.0 }
 0xd3a   :  { %2991 = vmatprep.mubr.msk.f32.mxu1 %vm661_vm1, %v1231_v23 }
 0xd3b   :  { %2992 = vmatmul.mubr.msk.f32.vlgmr.msra.gmra.mrb[4].mxu1 %vm661_vm1, %v1232_v24 }
 0xe0e   :  { %v2993_v27 = vpop.f32.mrb[4].mxu1 }
 0xe0f   :  { %v1322_v55 = vadd.f32 %v2993_v27, %v2766_v26  ;;  %v1316_v58 = vpop.f32.mrb[5].mxu1  ;;  %v1463_v27 = vld [vmem:[%s5027_s8 + $0x18] sm:$0xff] }
 0xe10   :  { %v1317_v28 = vadd.f32 %v2766_v26, %v1316_v58  ;;  %v1462_v26 = vld [vmem:[%s5027_s8 + $0x10] sm:$0xff] }
 0xe11   :  { %1327 = vst.msk [vmem:[%s4534_s27 + $0x8] sm:$0xff] %vm1325_vm3, %v1322_v55 }
 0xe12   :  { %1326 = vst.msk [vmem:[%s4534_s27] sm:$0xff] %vm1325_vm3, %v1317_v28  ;;  %2996 = vmatprep.mubr.msk.f32.mxu0 %vm1325_vm3, %v1317_v28  ;;  %s5028_s27 = sld [smem:[#allocation82_spill]]  ;;  %v3218_v28 = vpack.c.bf16 %v1463_v27, %v1462_v26 }
 0xe13   :  { %2997 = vmatmul.mubr.msk.f32.vlgmr.msra.gmra.mrb[6].mxu0 %vm1325_vm3, %v1322_v55 }
 0xe14   :  { %3209 = vmatpush3.bf16.msra.mxu0 %v3206_v47  ;;  %v1764_v47 = vld [vmem:[%s5031_s6 + $0x18] sm:$0xff] }
 0xe15   :  { %3211 = vmatprep.subr.bf16.mxu0 %v3210_v50  ;;  %v3242_v48 = vpack.c.bf16 %v1764_v47, %v1763_v46 }
 0xe18   :  { %3213 = vmatpush3.bf16.msra.mxu0 %v3210_v50  ;;  %v1624_v54 = vld [vmem:[%s5028_s27] sm:$0xff]  ;;  %v1625_v59 = vld [vmem:[%s5028_s27 + $0x8] sm:$0xff]  ;;  %v1626_v60 = vld [vmem:[%s5028_s27 + $0x10] sm:$0xff] }
 0xe19   :  { %3215 = vmatprep.subr.bf16.mxu0 %v3214_v53  ;;  %v3222_v61 = vpack.c.bf16 %v1625_v59, %v1624_v54  ;;  %v1627_v62 = vld [vmem:[%s5028_s27 + $0x18] sm:$0xff]  ;;  %v1628_v0 = vld [vmem:[%s5028_s27 + $0x20] sm:$0xff]  ;;  %v1629_v1 = vld [vmem:[%s5028_s27 + $0x28] sm:$0xff] }
 0xe1a   :  { %v3226_v63 = vpack.c.bf16 %v1627_v62, %v1626_v60  ;;  %v3230_v2 = vpack.c.bf16 %v1629_v1, %v1628_v0  ;;  %v1630_v3 = vld [vmem:[%s5028_s27 + $0x30] sm:$0xff]  ;;  %v1631_v4 = vld [vmem:[%s5028_s27 + $0x38] sm:$0xff]  ;;  %v1766_v50 = vld [vmem:[%s5031_s6 + $0x28] sm:$0xff] }
 0xe1b   :  { %3223 = vmatprep.subr.bf16.mxu1 %v3222_v61  ;;  %v3234_v5 = vpack.c.bf16 %v1631_v4, %v1630_v3  ;;  %v3246_v51 = vpack.c.bf16 %v1766_v50, %v1765_v49 }
 0xe1c   :  { %3225 = vmatpush3.bf16.msra.mxu1 %v3222_v61 }
 0xe1d   :  { %3227 = vmatprep.subr.bf16.mxu1 %v3226_v63 }
 0xe20   :  { %3229 = vmatpush3.bf16.msra.mxu1 %v3226_v63 }
 0xe21   :  { %3231 = vmatprep.subr.bf16.mxu1 %v3230_v2 }
 0xe24   :  { %3233 = vmatpush3.bf16.msra.mxu1 %v3230_v2  ;;  %v2780_v2 = vld [vmem:[#allocation26] ss:$0 sm:$0xff] }
 0xe25   :  { %3235 = vmatprep.subr.bf16.mxu1 %v3234_v5 }
 0xe28   :  { %3237 = vmatpush3.bf16.msra.mxu1 %v3234_v5  ;;  %v2781_v5 = vld [vmem:[#allocation28] ss:$0 sm:$0xff] }
 0xee6   :  { %v2998_v56 = vpop.f32.mrb[6].mxu0 }
 0xee7   :  { %v1405_v57 = vpop.f32.mrb[7].mxu0  ;;  %v1419_v29 = vsel %vm661_vm1, %v2998_v56, 0.0 }
 0xee8   :  { %1420 = vadd.xlane.f32.xlu1 %v1419_v29  ;;  %v1416_v30 = vsel %vm661_vm1, %v1405_v57, 0.0 }
 0xee9   :  { %1417 = vadd.xlane.f32.xlu0 %v1416_v30 }
 0xf75   :  { %v1421_v31 = vpop.xlane.xlu1 %1420 }
 0xf76   :  { %v1423_v32 = vmul.f32 0.03125, %v1421_v31  ;;  %v1418_v33 = vpop.xlane.xlu0 %1417 }
 0xf77   :  { %v1422_v34 = vmul.f32 0.03125, %v1418_v33 }
 0xf78   :  { %v1425_v35 = vsub.f32 %v2998_v56, %v1423_v32 }
 0xf79   :  { %v1424_v36 = vsub.f32 %v1405_v57, %v1422_v34 }
 0xf7a   :  { %v1427_v37 = vmul.f32 %v1425_v35, %v1425_v35 }
 0xf7b   :  { %v1426_v39 = vmul.f32 %v1424_v36, %v1424_v36 }
 0xf7c   :  { %v1431_v43 = vsel %vm661_vm1, %v1427_v37, 0.0 }
 0xf7d   :  { %1432 = vadd.xlane.f32.xlu1 %v1431_v43  ;;  %v1428_v44 = vsel %vm661_vm1, %v1426_v39, 0.0  ;;  %v1761_v43 = vld [vmem:[%s5031_s6] sm:$0xff] }
 0xf7e   :  { %1429 = vadd.xlane.f32.xlu0 %v1428_v44  ;;  %v1762_v44 = vld [vmem:[%s5031_s6 + $0x8] sm:$0xff] }
 0xf7f   :  { %v3238_v45 = vpack.c.bf16 %v1762_v44, %v1761_v43 }
0x100a   :  { %v1433_v6 = vpop.xlane.xlu1 %1432 }
0x100b   :  { %v1435_v7 = vmul.f32 0.03125, %v1433_v6  ;;  %v1430_v8 = vpop.xlane.xlu0 %1429 }
0x100c   :  { %v1434_v9 = vmul.f32 0.03125, %v1430_v8 }
0x100d   :  { %v1437_v10 = vadd.f32 1e-05, %v1435_v7 }
0x100e   :  { %v1436_v11 = vadd.f32 1e-05, %v1434_v9 }
0x100f   :  { %3439 = vrsqrt.f32 %v1437_v10 }
0x1010   :  { %3441 = vrsqrt.f32 %v1436_v11 }
0x1019   :  { %v3440_v12 = vpop.eup %3439 }
0x101a   :  { %v3442_v18 = vpop.eup %3441  ;;  %v1441_v19 = vmul.f32 %v3440_v12, %v1425_v35 }
0x101b   :  { %v1440_v21 = vmul.f32 %v3442_v18, %v1424_v36 }
0x101c   :  { %v1449_v22 = vmul.f32 %v2772_v17, %v1441_v19 }
0x101d   :  { %v1448_v23 = vmul.f32 %v2772_v17, %v1440_v21 }
0x101e   :  { %v1457_v24 = vadd.f32 %v2773_v20, %v1449_v22 }
0x101f   :  { %v1456_v25 = vadd.f32 %v2773_v20, %v1448_v23 }
0x1020   :  { %v1459_v58 = vmax.f32 %v1457_v24, 0.0 }
0x1021   :  { %v1458_v55 = vmax.f32 %v1456_v25, 0.0 }
0x1023   :  { %3007 = vmatprep.mubr.msk.f32.mxu0 %vm661_vm1, %v1458_v55 }
0x1024   :  { %3008 = vmatmul.mubr.msk.f32.vlgmr.msra.gmra.mrb[8].mxu0 %vm661_vm1, %v1459_v58 }
0x1025   :  { %3217 = vmatpush3.bf16.msra.mxu0 %v3214_v53  ;;  %3018 = vmatprep.mubr.msk.f32.mxu0 %vm661_vm1, %v836_v15  ;;  %v1768_v53 = vld [vmem:[%s5031_s6 + $0x38] sm:$0xff] }
0x1026   :  { %3219 = vmatprep.subr.bf16.mxu0 %v3218_v28  ;;  %v3250_v54 = vpack.c.bf16 %v1768_v53, %v1767_v52  ;;  %v2785_v52 = vld [vmem:[#allocation31] ss:$0 sm:$0xff] }
0x1029   :  { %3221 = vmatpush3.bf16.msra.mxu0 %v3218_v28 }
0x102a   :  { %3239 = vmatprep.subr.bf16.mxu0 %v3238_v45 }
0x102c   :  { %3019 = vmatmul.mubr.msk.f32.vlgmr.msra.gmra.mrb[8].mxu0 %vm661_vm1, %v837_v16 }
0x102d   :  { %3241 = vmatpush3.bf16.msra.mxu0 %v3238_v45 }
0x102e   :  { %3243 = vmatprep.subr.bf16.mxu0 %v3242_v48 }
0x1031   :  { %3245 = vmatpush3.bf16.msra.mxu0 %v3242_v48  ;;  %v2784_v48 = vld [vmem:[#allocation29] ss:$0 sm:$0xff] }
0x1032   :  { %3247 = vmatprep.subr.bf16.mxu0 %v3246_v51 }
0x1035   :  { %3249 = vmatpush3.bf16.msra.mxu0 %v3246_v51 }
0x1036   :  { %3251 = vmatprep.subr.bf16.mxu0 %v3250_v54 }
0x1039   :  { %3253 = vmatpush3.bf16.msra.mxu0 %v3250_v54 }
0x10ff   :  { %v4844_v56 = vpop.f32.mrb[8].mxu0 }
0x1100   :  { %v4846_v57 = vpop.f32.mrb[9].mxu0 }
0x1101   :  { %3037 = vmatprep.mubr.msk.f32.mxu1 %vm1632_vm4, %v4846_v57 }
0x1102   :  { %3038 = vmatmul.mubr.msk.f32.vlgmr.msra.gmra.mrb[6].mxu1 %vm1632_vm4, %v4844_v56 }
0x11d5   :  { %v3039_v14 = vpop.f32.mrb[6].mxu1 }
0x11d6   :  { %v1705_v29 = vpop.f32.mrb[7].mxu1  ;;  %v1719_v15 = vsel %vm1632_vm4, %v3039_v14, 0.0 }
0x11d7   :  { %1720 = vadd.xlane.f32.xlu1 %v1719_v15  ;;  %v1716_v13 = vsel %vm1632_vm4, %v1705_v29, 0.0 }
0x11d8   :  { %1717 = vadd.xlane.f32.xlu0 %v1716_v13  ;;  %v1900_v13 = vld [vmem:[%s5032_s16 + $0x10] sm:$0xff] }
0x1264   :  { %v1721_v16 = vpop.xlane.xlu1 %1720 }
0x1265   :  { %v1724_v30 = vmul.f32 0.015625, %v1721_v16  ;;  %v1718_v31 = vpop.xlane.xlu0 %1717  ;;  %v1901_v16 = vld [vmem:[%s5032_s16 + $0x18] sm:$0xff] }
0x1266   :  { %v1723_v32 = vmul.f32 0.015625, %v1718_v31  ;;  %v1902_v31 = vld [vmem:[%s5032_s16 + $0x20] sm:$0xff] }
0x1267   :  { %v1726_v33 = vsub.f32 %v3039_v14, %v1724_v30  ;;  %v1898_v14 = vld [vmem:[%s5032_s16] sm:$0xff]  ;;  %v3258_v30 = vpack.c.bf16 %v1901_v16, %v1900_v13 }
0x1268   :  { %v1725_v34 = vsub.f32 %v1705_v29, %v1723_v32  ;;  %v1899_v29 = vld [vmem:[%s5032_s16 + $0x8] sm:$0xff] }
0x1269   :  { %v1728_v35 = vmul.f32 %v1726_v33, %v1726_v33  ;;  %v3254_v15 = vpack.c.bf16 %v1899_v29, %v1898_v14  ;;  %v1903_v32 = vld [vmem:[%s5032_s16 + $0x28] sm:$0xff] }
0x126a   :  { %v1727_v36 = vmul.f32 %v1725_v34, %v1725_v34 }
0x126b   :  { %v1732_v37 = vsel %vm1632_vm4, %v1728_v35, 0.0  ;;  %3255 = vmatprep.subr.bf16.mxu1 %v3254_v15  ;;  %v1905_v35 = vld [vmem:[%s5032_s16 + $0x38] sm:$0xff] }
0x126c   :  { %1733 = vadd.xlane.f32.xlu1 %v1732_v37  ;;  %v1729_v39 = vsel %vm1632_vm4, %v1727_v36, 0.0  ;;  %3257 = vmatpush3.bf16.msra.mxu1 %v3254_v15 }
0x126d   :  { %1730 = vadd.xlane.f32.xlu0 %v1729_v39  ;;  %3259 = vmatprep.subr.bf16.mxu1 %v3258_v30 }
0x1270   :  { %3261 = vmatpush3.bf16.msra.mxu1 %v3258_v30 }
0x12f9   :  { %v1734_v59 = vpop.xlane.xlu1 %1733 }
0x12fa   :  { %v1736_v60 = vmul.f32 0.015625, %v1734_v59  ;;  %v1731_v61 = vpop.xlane.xlu0 %1730 }
0x12fb   :  { %v1735_v62 = vmul.f32 0.015625, %v1731_v61 }
0x12fc   :  { %v1738_v63 = vadd.f32 1e-05, %v1736_v60 }
0x12fd   :  { %v1737_v0 = vadd.f32 1e-05, %v1735_v62 }
0x12fe   :  { %3443 = vrsqrt.f32 %v1738_v63 }
0x12ff   :  { %3445 = vrsqrt.f32 %v1737_v0 }
0x1308   :  { %v3444_v1 = vpop.eup %3443 }
0x1309   :  { %v3446_v3 = vpop.eup %3445  ;;  %v1742_v4 = vmul.f32 %v3444_v1, %v1726_v33  ;;  %v1904_v33 = vld [vmem:[%s5032_s16 + $0x30] sm:$0xff] }
0x130a   :  { %v1741_v6 = vmul.f32 %v3446_v3, %v1725_v34  ;;  %v3262_v34 = vpack.c.bf16 %v1903_v32, %v1902_v31  ;;  %v3266_v36 = vpack.c.bf16 %v1905_v35, %v1904_v33  ;;  %v1997_v1 = vld [vmem:[#allocation43] sm:$0xff] }
0x130b   :  { %v1750_v7 = vmul.f32 %v2780_v2, %v1742_v4  ;;  %3078 = vmatprep.subr.mxu0 %v1997_v1 }
0x130c   :  { %v1749_v8 = vmul.f32 %v2780_v2, %v1741_v6  ;;  %3263 = vmatprep.subr.bf16.mxu1 %v3262_v34  ;;  %v2786_v2 = vld [vmem:[#allocation32] ss:$0 sm:$0xff] }
0x130d   :  { %v1758_v9 = vadd.f32 %v2781_v5, %v1750_v7  ;;  %3265 = vmatpush3.bf16.msra.mxu1 %v3262_v34 }
0x130e   :  { %v1757_v10 = vadd.f32 %v2781_v5, %v1749_v8  ;;  %3267 = vmatprep.subr.bf16.mxu1 %v3266_v36 }
0x130f   :  { %v1760_v12 = vmax.f32 %v1758_v9, 0.0 }
0x1310   :  { %v1759_v11 = vmax.f32 %v1757_v10, 0.0 }
0x1311   :  { %3269 = vmatpush3.bf16.msra.mxu1 %v3266_v36 }
0x1312   :  { %3056 = vmatprep.mubr.msk.f32.mxu0 %vm1632_vm4, %v1759_v11 }
0x1313   :  { %3057 = vmatmul.mubr.msk.f32.vlgmr.msra.gmra.mrb[10].mxu0 %vm1632_vm4, %v1760_v12 }
0x1314   :  { %3079 = vmatpush3.msra.mxu0 %v1997_v1 }
0x13e6   :  { %v3058_v17 = vpop.f32.mrb[10].mxu0 }
0x13e7   :  { %v1841_v18 = vpop.f32.mrb[11].mxu0  ;;  %v1855_v19 = vsel %vm1632_vm4, %v3058_v17, 0.0 }
0x13e8   :  { %1856 = vadd.xlane.f32.xlu1 %v1855_v19  ;;  %v1852_v20 = vsel %vm1632_vm4, %v1841_v18, 0.0 }
0x13e9   :  { %1853 = vadd.xlane.f32.xlu0 %v1852_v20 }
0x1475   :  { %v1857_v21 = vpop.xlane.xlu1 %1856 }
0x1476   :  { %v1859_v22 = vmul.f32 0.015625, %v1857_v21  ;;  %v1854_v23 = vpop.xlane.xlu0 %1853 }
0x1477   :  { %v1858_v24 = vmul.f32 0.015625, %v1854_v23  ;;  %v2129_v23 = vld [vmem:[#allocation50] sm:$0xff] }
0x1478   :  { %v1861_v25 = vsub.f32 %v3058_v17, %v1859_v22 }
0x1479   :  { %v1860_v26 = vsub.f32 %v1841_v18, %v1858_v24  ;;  %v2130_v24 = vld [vmem:[#allocation50 + $0x8] sm:$0xff] }
0x147a   :  { %v1863_v27 = vmul.f32 %v1861_v25, %v1861_v25 }
0x147b   :  { %v1862_v55 = vmul.f32 %v1860_v26, %v1860_v26 }
0x147c   :  { %v1867_v58 = vsel %vm1632_vm4, %v1863_v27, 0.0  ;;  %v2132_v27 = vld [vmem:[#allocation50 + $0x18] sm:$0xff] }
0x147d   :  { %1868 = vadd.xlane.f32.xlu1 %v1867_v58  ;;  %v1864_v28 = vsel %vm1632_vm4, %v1862_v55, 0.0  ;;  %v2125_v58 = vld [vmem:[#allocation49] sm:$0xff] }
0x147e   :  { %1865 = vadd.xlane.f32.xlu0 %v1864_v28  ;;  %v2126_v28 = vld [vmem:[#allocation49 + $0x8] sm:$0xff] }
0x147f   :  { %v3278_v14 = vpack.c.bf16 %v2126_v28, %v2125_v58 }
0x150a   :  { %v1869_v37 = vpop.xlane.xlu1 %1868 }
0x150b   :  { %v1871_v39 = vmul.f32 0.015625, %v1869_v37  ;;  %v1866_v43 = vpop.xlane.xlu0 %1865 }
0x150c   :  { %v1870_v44 = vmul.f32 0.015625, %v1866_v43 }
0x150d   :  { %v1873_v45 = vadd.f32 1e-05, %v1871_v39 }
0x150e   :  { %v1872_v46 = vadd.f32 1e-05, %v1870_v44 }
0x150f   :  { %3447 = vrsqrt.f32 %v1873_v45 }
0x1510   :  { %3449 = vrsqrt.f32 %v1872_v46 }
0x1519   :  { %v3448_v47 = vpop.eup %3447 }
0x151a   :  { %v3450_v49 = vpop.eup %3449  ;;  %v1877_v50 = vmul.f32 %v3448_v47, %v1861_v25  ;;  %v3270_v25 = vpack.c.bf16 %v2130_v24, %v2129_v23  ;;  %v2428_v23 = vld [vmem:[%s5034_s29 + $0x20] sm:$0xff]  ;;  %v2429_v24 = vld [vmem:[%s5034_s29 + $0x28] sm:$0xff] }
0x151b   :  { %v1876_v51 = vmul.f32 %v3450_v49, %v1860_v26  ;;  %v2131_v26 = vld [vmem:[#allocation50 + $0x10] sm:$0xff]  ;;  %v2791_v49 = vld [vmem:[#allocation44] ss:$0 sm:$0xff] }
0x151c   :  { %v1885_v53 = vmul.f32 %v2784_v48, %v1877_v50  ;;  %v3274_v55 = vpack.c.bf16 %v2132_v27, %v2131_v26  ;;  %3271 = vmatprep.subr.bf16.mxu1 %v3270_v25  ;;  %v2430_v26 = vld [vmem:[%s5034_s29 + $0x30] sm:$0xff]  ;;  %v2431_v27 = vld [vmem:[%s5034_s29 + $0x38] sm:$0xff] }
0x151d   :  { %v1884_v54 = vmul.f32 %v2784_v48, %v1876_v51 }
0x151e   :  { %v1893_v59 = vadd.f32 %v2785_v52, %v1885_v53 }
0x151f   :  { %v1892_v60 = vadd.f32 %v2785_v52, %v1884_v54  ;;  %v2792_v52 = vld [vmem:[#allocation46] ss:$0 sm:$0xff] }
0x1520   :  { %v1895_v61 = vadd.f32 %v4844_v56, %v1893_v59 }
0x1521   :  { %v1894_v62 = vadd.f32 %v1892_v60, %v4846_v57 }
0x1522   :  { %v1897_v0 = vmax.f32 %v1895_v61, 0.0 }
0x1523   :  { %v1896_v63 = vmax.f32 %v1894_v62, 0.0  ;;  %v2127_v62 = vld [vmem:[#allocation49 + $0x10] sm:$0xff] }
0x1525   :  { %3075 = vmatprep.mubr.msk.f32.mxu1 %vm1632_vm4, %v1896_v63  ;;  %v2128_v63 = vld [vmem:[#allocation49 + $0x18] sm:$0xff] }
0x1526   :  { %3076 = vmatmul.mubr.msk.f32.vlgmr.msra.gmra.mrb[8].mxu1 %vm1632_vm4, %v1897_v0 }
0x1527   :  { %3273 = vmatpush3.bf16.msra.mxu1 %v3270_v25  ;;  %v3310_v25 = vpack.c.bf16 %v2429_v24, %v2428_v23 }
0x1528   :  { %3275 = vmatprep.subr.bf16.mxu1 %v3274_v55 }
0x152b   :  { %3277 = vmatpush3.bf16.msra.mxu1 %v3274_v55  ;;  %v3314_v55 = vpack.c.bf16 %v2431_v27, %v2430_v26 }
0x152c   :  { %3279 = vmatprep.subr.bf16.mxu1 %v3278_v14 }
0x15f9   :  { %v3077_v3 = vpop.f32.mrb[8].mxu1 }
0x15fa   :  { %v1991_v4 = vadd.f32 %v3077_v3, %v2786_v2  ;;  %v1985_v5 = vpop.f32.mrb[9].mxu1 }
0x15fb   :  { %v1986_v6 = vadd.f32 %v2786_v2, %v1985_v5  ;;  %v3282_v2 = vpack.c.bf16 %v2128_v63, %v2127_v62  ;;  %v2561_v63 = vld [vmem:[%s5035_s22] sm:$0xff] }
0x15fc   :  { %1996 = vst.msk [vmem:[%s4539_s13 + $0x8] sm:$0xff] %vm1994_vm5, %v1991_v4 }
0x15fd   :  { %1995 = vst.msk [vmem:[%s4539_s13] sm:$0xff] %vm1994_vm5, %v1986_v6  ;;  %3080 = vmatprep.mubr.msk.f32.mxu0 %vm1994_vm5, %v1986_v6  ;;  %s5033_s13 = sld [smem:[#allocation76_spill]] }
0x15fe   :  { %3081 = vmatmul.mubr.msk.f32.vlgmr.msra.gmra.mrb[12].mxu0 %vm1994_vm5, %v1991_v4 }
0x1603   :  { %v2289_v29 = vld [vmem:[%s5033_s13] sm:$0xff]  ;;  %v2290_v15 = vld [vmem:[%s5033_s13 + $0x8] sm:$0xff]  ;;  %v2291_v13 = vld [vmem:[%s5033_s13 + $0x10] sm:$0xff] }
0x1604   :  { %v3286_v16 = vpack.c.bf16 %v2290_v15, %v2289_v29  ;;  %v2292_v30 = vld [vmem:[%s5033_s13 + $0x18] sm:$0xff]  ;;  %v2293_v32 = vld [vmem:[%s5033_s13 + $0x20] sm:$0xff]  ;;  %v2294_v33 = vld [vmem:[%s5033_s13 + $0x28] sm:$0xff] }
0x1605   :  { %v3290_v31 = vpack.c.bf16 %v2292_v30, %v2291_v13  ;;  %v3294_v34 = vpack.c.bf16 %v2294_v33, %v2293_v32  ;;  %v2295_v35 = vld [vmem:[%s5033_s13 + $0x30] sm:$0xff]  ;;  %v2296_v36 = vld [vmem:[%s5033_s13 + $0x38] sm:$0xff]  ;;  %v2799_v30 = vld [vmem:[#allocation19] ss:$0 sm:$0xff] }
0x1606   :  { %3287 = vmatprep.subr.bf16.mxu0 %v3286_v16  ;;  %v3298_v37 = vpack.c.bf16 %v2296_v36, %v2295_v35  ;;  %v2800_v33 = vld [vmem:[#allocation20] ss:$0 sm:$0xff] }
0x1607   :  { %3289 = vmatpush3.bf16.msra.mxu0 %v3286_v16 }
0x1608   :  { %3291 = vmatprep.subr.bf16.mxu0 %v3290_v31 }
0x160b   :  { %3293 = vmatpush3.bf16.msra.mxu0 %v3290_v31 }
0x160c   :  { %3295 = vmatprep.subr.bf16.mxu0 %v3294_v34 }
0x160f   :  { %3297 = vmatpush3.bf16.msra.mxu0 %v3294_v34 }
0x1610   :  { %3299 = vmatprep.subr.bf16.mxu0 %v3298_v37 }
0x1613   :  { %3301 = vmatpush3.bf16.msra.mxu0 %v3298_v37 }
0x16d1   :  { %v3082_v56 = vpop.f32.mrb[12].mxu0 }
0x16d2   :  { %v2070_v57 = vpop.f32.mrb[13].mxu0  ;;  %v2084_v7 = vsel %vm661_vm1, %v3082_v56, 0.0 }
0x16d3   :  { %2085 = vadd.xlane.f32.xlu1 %v2084_v7  ;;  %v2081_v8 = vsel %vm661_vm1, %v2070_v57, 0.0 }
0x16d4   :  { %2082 = vadd.xlane.f32.xlu0 %v2081_v8 }
0x1760   :  { %v2086_v9 = vpop.xlane.xlu1 %2085 }
0x1761   :  { %v2088_v10 = vmul.f32 0.03125, %v2086_v9  ;;  %v2083_v11 = vpop.xlane.xlu0 %2082 }
0x1762   :  { %v2087_v12 = vmul.f32 0.03125, %v2083_v11 }
0x1763   :  { %v2090_v17 = vsub.f32 %v3082_v56, %v2088_v10 }
0x1764   :  { %v2089_v18 = vsub.f32 %v2070_v57, %v2087_v12 }
0x1765   :  { %v2092_v19 = vmul.f32 %v2090_v17, %v2090_v17 }
0x1766   :  { %v2091_v20 = vmul.f32 %v2089_v18, %v2089_v18 }
0x1767   :  { %v2096_v21 = vsel %vm661_vm1, %v2092_v19, 0.0 }
0x1768   :  { %2097 = vadd.xlane.f32.xlu1 %v2096_v21  ;;  %v2093_v22 = vsel %vm661_vm1, %v2091_v20, 0.0  ;;  %v2426_v20 = vld [vmem:[%s5034_s29 + $0x10] sm:$0xff]  ;;  %v2427_v21 = vld [vmem:[%s5034_s29 + $0x18] sm:$0xff] }
0x1769   :  { %2094 = vadd.xlane.f32.xlu0 %v2093_v22  ;;  %v3306_v22 = vpack.c.bf16 %v2427_v21, %v2426_v20 }
0x17f5   :  { %v2098_v39 = vpop.xlane.xlu1 %2097 }
0x17f6   :  { %v2100_v43 = vmul.f32 0.03125, %v2098_v39  ;;  %v2095_v44 = vpop.xlane.xlu0 %2094 }
0x17f7   :  { %v2099_v45 = vmul.f32 0.03125, %v2095_v44 }
0x17f8   :  { %v2102_v46 = vadd.f32 1e-05, %v2100_v43 }
0x17f9   :  { %v2101_v47 = vadd.f32 1e-05, %v2099_v45 }
0x17fa   :  { %3451 = vrsqrt.f32 %v2102_v46 }
0x17fb   :  { %3453 = vrsqrt.f32 %v2101_v47 }
0x1804   :  { %v3452_v48 = vpop.eup %3451 }
0x1805   :  { %v3454_v50 = vpop.eup %3453  ;;  %v2106_v51 = vmul.f32 %v3452_v48, %v2090_v17  ;;  %v2424_v17 = vld [vmem:[%s5034_s29] sm:$0xff] }
0x1806   :  { %v2105_v53 = vmul.f32 %v3454_v50, %v2089_v18  ;;  %v2425_v18 = vld [vmem:[%s5034_s29 + $0x8] sm:$0xff] }
0x1807   :  { %v2114_v54 = vmul.f32 %v2791_v49, %v2106_v51  ;;  %v3302_v19 = vpack.c.bf16 %v2425_v18, %v2424_v17  ;;  %v2803_v18 = vld [vmem:[#allocation22] ss:$0 sm:$0xff] }
0x1808   :  { %v2113_v59 = vmul.f32 %v2791_v49, %v2105_v53 }
0x1809   :  { %v2122_v60 = vadd.f32 %v2792_v52, %v2114_v54 }
0x180a   :  { %v2121_v61 = vadd.f32 %v2792_v52, %v2113_v59 }
0x180b   :  { %v2124_v1 = vmax.f32 %v2122_v60, 0.0 }
0x180c   :  { %v2123_v0 = vmax.f32 %v2121_v61, 0.0 }
0x180e   :  { %3091 = vmatprep.mubr.msk.f32.mxu1 %vm661_vm1, %v2123_v0  ;;  %v2562_v0 = vld [vmem:[%s5035_s22 + $0x8] sm:$0xff] }
0x180f   :  { %3092 = vmatmul.mubr.msk.f32.vlgmr.msra.gmra.mrb[10].mxu1 %vm661_vm1, %v2124_v1  ;;  %v3318_v1 = vpack.c.bf16 %v2562_v0, %v2561_v63 }
0x1810   :  { %3281 = vmatpush3.bf16.msra.mxu1 %v3278_v14  ;;  %3102 = vmatprep.mubr.msk.f32.mxu1 %vm661_vm1, %v705_v40 }
0x1811   :  { %3283 = vmatprep.subr.bf16.mxu1 %v3282_v2  ;;  %3319 = vmatprep.subr.bf16.mxu0 %v3318_v1 }
0x1814   :  { %3285 = vmatpush3.bf16.msra.mxu1 %v3282_v2  ;;  %v2563_v2 = vld [vmem:[%s5035_s22 + $0x10] sm:$0xff] }
0x1815   :  { %3303 = vmatprep.subr.bf16.mxu1 %v3302_v19 }
0x1817   :  { %3103 = vmatmul.mubr.msk.f32.vlgmr.msra.gmra.mrb[10].mxu1 %vm661_vm1, %v706_v42 }
0x1818   :  { %3305 = vmatpush3.bf16.msra.mxu1 %v3302_v19 }
0x1819   :  { %3307 = vmatprep.subr.bf16.mxu1 %v3306_v22 }
0x181c   :  { %3309 = vmatpush3.bf16.msra.mxu1 %v3306_v22  ;;  %v2804_v22 = vld [vmem:[#allocation23] ss:$0 sm:$0xff] }
0x181d   :  { %3311 = vmatprep.subr.bf16.mxu1 %v3310_v25 }
0x1820   :  { %3313 = vmatpush3.bf16.msra.mxu1 %v3310_v25 }
0x1821   :  { %3315 = vmatprep.subr.bf16.mxu1 %v3314_v55 }
0x1824   :  { %3317 = vmatpush3.bf16.msra.mxu1 %v3314_v55 }
0x18ea   :  { %v4904_v3 = vpop.f32.mrb[10].mxu1 }
0x18eb   :  { %v4906_v4 = vpop.f32.mrb[11].mxu1 }
0x18ec   :  { %3121 = vmatprep.mubr.msk.f32.mxu0 %vm1632_vm4, %v4906_v4 }
0x18ed   :  { %3122 = vmatmul.mubr.msk.f32.vlgmr.msra.gmra.mrb[14].mxu0 %vm1632_vm4, %v4904_v3 }
0x18ee   :  { %3321 = vmatpush3.bf16.msra.mxu0 %v3318_v1 }
0x19c0   :  { %v3123_v5 = vpop.f32.mrb[14].mxu0 }
0x19c1   :  { %v2369_v38 = vpop.f32.mrb[15].mxu0  ;;  %v2383_v40 = vsel %vm1632_vm4, %v3123_v5, 0.0 }
0x19c2   :  { %2384 = vadd.xlane.f32.xlu1 %v2383_v40  ;;  %v2380_v41 = vsel %vm1632_vm4, %v2369_v38, 0.0  ;;  %v2565_v40 = vld [vmem:[%s5035_s22 + $0x20] sm:$0xff] }
0x19c3   :  { %2381 = vadd.xlane.f32.xlu0 %v2380_v41  ;;  %v2566_v41 = vld [vmem:[%s5035_s22 + $0x28] sm:$0xff] }
0x1a4f   :  { %v2385_v42 = vpop.xlane.xlu1 %2384 }
0x1a50   :  { %v2387_v6 = vmul.f32 0.015625, %v2385_v42  ;;  %v2382_v56 = vpop.xlane.xlu0 %2381  ;;  %v2567_v42 = vld [vmem:[%s5035_s22 + $0x30] sm:$0xff] }
0x1a51   :  { %v2386_v57 = vmul.f32 0.015625, %v2382_v56  ;;  %v2568_v56 = vld [vmem:[%s5035_s22 + $0x38] sm:$0xff] }
0x1a52   :  { %v2389_v7 = vsub.f32 %v3123_v5, %v2387_v6  ;;  %v2564_v5 = vld [vmem:[%s5035_s22 + $0x18] sm:$0xff]  ;;  %v3326_v6 = vpack.c.bf16 %v2566_v41, %v2565_v40 }
0x1a53   :  { %v2388_v8 = vsub.f32 %v2369_v38, %v2386_v57  ;;  %v3322_v38 = vpack.c.bf16 %v2564_v5, %v2563_v2  ;;  %v3330_v57 = vpack.c.bf16 %v2568_v56, %v2567_v42 }
0x1a54   :  { %v2391_v9 = vmul.f32 %v2389_v7, %v2389_v7 }
0x1a55   :  { %v2390_v10 = vmul.f32 %v2388_v8, %v2388_v8  ;;  %3323 = vmatprep.subr.bf16.mxu0 %v3322_v38 }
0x1a56   :  { %v2395_v11 = vsel %vm1632_vm4, %v2391_v9, 0.0  ;;  %3325 = vmatpush3.bf16.msra.mxu0 %v3322_v38 }
0x1a57   :  { %2396 = vadd.xlane.f32.xlu1 %v2395_v11  ;;  %v2392_v12 = vsel %vm1632_vm4, %v2390_v10, 0.0  ;;  %3327 = vmatprep.subr.bf16.mxu0 %v3326_v6 }
0x1a58   :  { %2393 = vadd.xlane.f32.xlu0 %v2392_v12 }
0x1a5a   :  { %3329 = vmatpush3.bf16.msra.mxu0 %v3326_v6 }
0x1a5b   :  { %3331 = vmatprep.subr.bf16.mxu0 %v3330_v57 }
0x1a5e   :  { %3333 = vmatpush3.bf16.msra.mxu0 %v3330_v57 }
0x1ae4   :  { %v2397_v58 = vpop.xlane.xlu1 %2396 }
0x1ae5   :  { %v2399_v28 = vmul.f32 0.015625, %v2397_v58  ;;  %v2394_v14 = vpop.xlane.xlu0 %2393 }
0x1ae6   :  { %v2398_v29 = vmul.f32 0.015625, %v2394_v14  ;;  %v2805_v14 = vld [vmem:[#allocation25] ss:$0 sm:$0xff] }
0x1ae7   :  { %v2401_v15 = vadd.f32 1e-05, %v2399_v28 }
0x1ae8   :  { %v2400_v13 = vadd.f32 1e-05, %v2398_v29 }
0x1ae9   :  { %3455 = vrsqrt.f32 %v2401_v15 }
0x1aea   :  { %3457 = vrsqrt.f32 %v2400_v13 }
0x1af3   :  { %v3456_v16 = vpop.eup %3455 }
0x1af4   :  { %v3458_v31 = vpop.eup %3457  ;;  %v2405_v32 = vmul.f32 %v3456_v16, %v2389_v7 }
0x1af5   :  { %v2404_v34 = vmul.f32 %v3458_v31, %v2388_v8 }
0x1af6   :  { %v2413_v35 = vmul.f32 %v2799_v30, %v2405_v32 }
0x1af7   :  { %v2412_v36 = vmul.f32 %v2799_v30, %v2404_v34 }
0x1af8   :  { %v2421_v37 = vadd.f32 %v2800_v33, %v2413_v35 }
0x1af9   :  { %v2420_v39 = vadd.f32 %v2800_v33, %v2412_v36 }
0x1afa   :  { %v2423_v44 = vmax.f32 %v2421_v37, 0.0 }
0x1afb   :  { %v2422_v43 = vmax.f32 %v2420_v39, 0.0 }
0x1afd   :  { %3140 = vmatprep.mubr.msk.f32.mxu1 %vm1632_vm4, %v2422_v43 }
0x1afe   :  { %3141 = vmatmul.mubr.msk.f32.vlgmr.msra.gmra.mrb[12].mxu1 %vm1632_vm4, %v2423_v44 }
0x1bd1   :  { %v3142_v45 = vpop.f32.mrb[12].mxu1 }
0x1bd2   :  { %v2504_v46 = vpop.f32.mrb[13].mxu1  ;;  %v2518_v47 = vsel %vm1632_vm4, %v3142_v45, 0.0 }
0x1bd3   :  { %2519 = vadd.xlane.f32.xlu1 %v2518_v47  ;;  %v2515_v48 = vsel %vm1632_vm4, %v2504_v46, 0.0 }
0x1bd4   :  { %2516 = vadd.xlane.f32.xlu0 %v2515_v48 }
0x1c60   :  { %v2520_v49 = vpop.xlane.xlu1 %2519 }
0x1c61   :  { %v2522_v50 = vmul.f32 0.015625, %v2520_v49  ;;  %v2517_v51 = vpop.xlane.xlu0 %2516 }
0x1c62   :  { %v2521_v52 = vmul.f32 0.015625, %v2517_v51 }
0x1c63   :  { %v2524_v53 = vsub.f32 %v3142_v45, %v2522_v50 }
0x1c64   :  { %v2523_v54 = vsub.f32 %v2504_v46, %v2521_v52 }
0x1c65   :  { %v2526_v59 = vmul.f32 %v2524_v53, %v2524_v53 }
0x1c66   :  { %v2525_v60 = vmul.f32 %v2523_v54, %v2523_v54 }
0x1c67   :  { %v2530_v61 = vsel %vm1632_vm4, %v2526_v59, 0.0 }
0x1c68   :  { %2531 = vadd.xlane.f32.xlu1 %v2530_v61  ;;  %v2527_v62 = vsel %vm1632_vm4, %v2525_v60, 0.0 }
0x1c69   :  { %2528 = vadd.xlane.f32.xlu0 %v2527_v62 }
0x1cf5   :  { %v2532_v7 = vpop.xlane.xlu1 %2531 }
0x1cf6   :  { %v2534_v8 = vmul.f32 0.015625, %v2532_v7  ;;  %v2529_v9 = vpop.xlane.xlu0 %2528 }
0x1cf7   :  { %v2533_v10 = vmul.f32 0.015625, %v2529_v9 }
0x1cf8   :  { %v2536_v11 = vadd.f32 1e-05, %v2534_v8 }
0x1cf9   :  { %v2535_v12 = vadd.f32 1e-05, %v2533_v10 }
0x1cfa   :  { %3459 = vrsqrt.f32 %v2536_v11 }
0x1cfb   :  { %3461 = vrsqrt.f32 %v2535_v12 }
0x1d04   :  { %v3460_v17 = vpop.eup %3459 }
0x1d05   :  { %v3462_v19 = vpop.eup %3461  ;;  %v2540_v20 = vmul.f32 %v3460_v17, %v2524_v53 }
0x1d06   :  { %v2539_v21 = vmul.f32 %v3462_v19, %v2523_v54 }
0x1d07   :  { %v2548_v23 = vmul.f32 %v2803_v18, %v2540_v20 }
0x1d08   :  { %v2547_v24 = vmul.f32 %v2803_v18, %v2539_v21 }
0x1d09   :  { %v2556_v25 = vadd.f32 %v2804_v22, %v2548_v23 }
0x1d0a   :  { %v2555_v26 = vadd.f32 %v2804_v22, %v2547_v24 }
0x1d0b   :  { %v2558_v27 = vadd.f32 %v4904_v3, %v2556_v25 }
0x1d0c   :  { %v2557_v55 = vadd.f32 %v2555_v26, %v4906_v4 }
0x1d0d   :  { %v2560_v28 = vmax.f32 %v2558_v27, 0.0 }
0x1d0e   :  { %v2559_v58 = vmax.f32 %v2557_v55, 0.0 }
0x1d10   :  { %3159 = vmatprep.mubr.msk.f32.mxu0 %vm1632_vm4, %v2559_v58 }
0x1d11   :  { %3160 = vmatmul.mubr.msk.f32.vlgmr.msra.gmra.mrb[16].mxu0 %vm1632_vm4, %v2560_v28 }
0x1de4   :  { %v3161_v29 = vpop.f32.mrb[16].mxu0 }
0x1de5   :  { %v2654_v15 = vadd.f32 %v3161_v29, %v2805_v14  ;;  %v2648_v13 = vpop.f32.mrb[17].mxu0 }
0x1de6   :  { %v2649_v16 = vadd.f32 %v2805_v14, %v2648_v13 }
0x1de7   :  { %2658 = vst.msk [vmem:[#allocation52 + $0x8] sm:$0xff] %vm577_vm0, %v2654_v15 }
0x1de8   :  { %2657 = vst.msk [vmem:[#allocation52] sm:$0xff] %vm577_vm0, %v2649_v16 }
0x1de9   :  { %4178 = shalt.err (!%p4175_p8)
}
0x1dea   :  { %s4179_s4 = scalar_lea.hbm %s4544_s21, 256 }
0x1deb   :  { %p4180_p9 = scmp.ne.s32.totalorder %s4544_s21, %s4179_s4  ;;  %p4183_p10 = scmp.lt.u32.totalorder %s4179_s4, %s4544_s21 }
0x1ded   :  { %p4185_p11 = pnand %p4183_p10, %p4180_p9 }
0x1def   :  { %4188 = shalt.err (!%p4185_p11)
}
0x1df0   :  { %2674 = dma.vmem_to_hbm [thread:$0]  %s2669_s18, 256, %s4544_s21, [#allocation4], %s4273_s26, %s4273_s26, %s4274_s28  }
0x1df1   :  { %4223 = dma.done.wait [#allocation4], 256  }
0x1df2   :  { %4224 = vsyncadd [#allocation4], 4294967040 }
0x1df3   :  { %2682 = vsyncpa [#allocation3], 1 }
0x1df4   :  { %2683 = vsyncpa [#allocation6], 1 }
0x1df5   :  { %2684 = vsyncpa [#allocation9], 1 }
0x1df6   :  { %2685 = vsyncpa [#allocation12], 1 }
0x1df7   :  { %2686 = vsyncpa [#allocation15], 1 }
0x1df8   :  { %2687 = vsyncpa [#allocation18], 1 }
0x1df9   :  { %2688 = vsyncpa [#allocation21], 1 }
0x1dfa   :  { %2689 = vsyncpa [#allocation24], 1 }
0x1dfb   :  { %2690 = vsyncpa [#allocation27], 1 }
0x1dfc   :  { %2691 = vsyncpa [#allocation30], 1 }
0x1dfd   :  { %2692 = vsyncpa [#allocation33], 1 }
0x1dfe   :  { %2693 = vsyncpa [#allocation36], 1 }
0x1dff   :  { %2694 = vsyncpa [#allocation39], 1 }
0x1e00   :  { %2695 = vsyncpa [#allocation42], 1 }
0x1e01   :  { %2696 = vsyncpa [#allocation45], 1 }
0x1e02   :  { %2697 = vsyncpa [#allocation48], 1 }
0x1e03   :  { %2698 = vsyncpa [#allocation51], 1 }
0x1e04   :  { %2699 = vsyncpa [#allocation4], 1 }

</bundles_post_ra>
